<compile_context>
chip_gen: v7x
topology: tpu7x:2x2x1
jax: 0.10.0
libtpu: 0.0.40
codegen_flags: <defaults>
</compile_context>

<pallas_src>
import functools

import jax
import jax.numpy as jnp
from jax.experimental import pallas as pl
from jax.experimental.pallas import tpu as pltpu


# ----------------------------- helpers ---------------------------------------

def _layer_norm(x, g, b, eps=1e-5):
    # Two-pass statistics (numerically matches torch.nn.LayerNorm; the one-pass
    # E[x^2]-mu^2 form can cancel catastrophically at E=2048).
    mu = jnp.mean(x, axis=-1, keepdims=True)
    d = x - mu
    var = jnp.mean(d * d, axis=-1, keepdims=True)
    return d * jax.lax.rsqrt(var + eps) * g + b


def _tpu_vmem_capacity_bytes():
    try:
        return int(pltpu.get_tpu_info().vmem_capacity_bytes)
    except Exception:
        return 128 << 20   # conservative default for v5e/v6e; v7x reports 64 MiB


# ----------------------------- Pallas kernel ---------------------------------

def taggregate_kernel(x_ref,
                      wq_ref, bq_ref, wk_ref, bk_ref, wv_ref, bv_ref,
                      wout_ref, bout_ref,
                      w1_ref, b1_ref, w2_ref, b2_ref,
                      ln1w_ref, ln1b_ref, ln2w_ref, ln2b_ref,
                      lnfw_ref, lnfb_ref,
                      o_ref,
                      x_sc, attn_sc,
                      *, n_heads, seq_len):
    """One grid step = (one batch tile) x (one encoder layer)."""
    l = pl.program_id(1)
    n_l = pl.num_programs(1)

    Bt, Sp, E = x_sc.shape
    dh = E // n_heads
    scale = 1.0 / (dh ** 0.5)
    M = Bt * Sp

    # Load the (cls + pos-embedded, padded) activations once per batch tile.
    @pl.when(l == 0)
    def _():
        x_sc[...] = x_ref[...]

    x2d = x_sc[...].reshape(M, E)                 # fp32 activations
    x_bf = x2d.astype(jnp.bfloat16)               # MXU operand

    # Mask padded key positions (seq was padded from seq_len to Sp).
    kidx = jax.lax.broadcasted_iota(jnp.int32, (1, 1, Sp), 2)
    kmask = jnp.where(kidx < seq_len, 0.0, -1e30).astype(jnp.float32)

    # ---------------- Multi-head self attention (post-LN layer) --------------
    # Q/K/V are projected per head from column slices of wq/wk/wv so the peak
    # f32 intermediate is (M, dh) rather than (M, 3E).  The per-head loop is
    # kept on purpose: a heads-batched dot_general still performs one tiny
    # (Sp x Sp) matmul per (batch, head), so merging heads would not enlarge
    # the MXU work items (only shrink code size).
    for h in range(n_heads):                       # static unroll over heads
        sl = slice(h * dh, (h + 1) * dh)
        qh = (jnp.dot(x_bf, wq_ref[0, :, sl], preferred_element_type=jnp.float32)
              + bq_ref[0, :, sl]).reshape(Bt, Sp, dh)
        kh = (jnp.dot(x_bf, wk_ref[0, :, sl], preferred_element_type=jnp.float32)
              + bk_ref[0, :, sl]).reshape(Bt, Sp, dh)
        vh = (jnp.dot(x_bf, wv_ref[0, :, sl], preferred_element_type=jnp.float32)
              + bv_ref[0, :, sl]).reshape(Bt, Sp, dh)

        s = jnp.einsum('bqd,bkd->bqk', qh, kh,
                       preferred_element_type=jnp.float32) * scale + kmask
        s = s - jnp.max(s, axis=-1, keepdims=True)
        p = jnp.exp(s)
        p = p / jnp.sum(p, axis=-1, keepdims=True)            # exact softmax
        attn_sc[:, :, sl] = jnp.einsum(
            'bqk,bkd->bqd', p, vh,
            preferred_element_type=jnp.float32).astype(jnp.bfloat16)

    attn = (jnp.dot(attn_sc[...].reshape(M, E), wout_ref[0],
                    preferred_element_type=jnp.float32) + bout_ref[0])   # (M, E)

    x2d = _layer_norm(x2d + attn, ln1w_ref[0], ln1b_ref[0])

    # ---------------- Feed-forward (Linear -> ReLU -> Linear) ----------------
    h1 = jnp.maximum(
        jnp.dot(x2d.astype(jnp.bfloat16), w1_ref[0],
                preferred_element_type=jnp.float32) + b1_ref[0], 0.0)     # (M, F)
    ff = (jnp.dot(h1.astype(jnp.bfloat16), w2_ref[0],
                  preferred_element_type=jnp.float32) + b2_ref[0])        # (M, E)

    x2d = _layer_norm(x2d + ff, ln2w_ref[0], ln2b_ref[0])
    x_sc[...] = x2d.reshape(Bt, Sp, E)

    # Final LayerNorm of nn.TransformerEncoder(norm=...) + cls-token readout.
    @pl.when(l == n_l - 1)
    def _():
        cls = x_sc[:, 0:1, :].reshape(Bt, E)       # slice the ref: only row 0
        o_ref[...] = _layer_norm(cls, lnfw_ref[...], lnfb_ref[...])


# ------------------------------ wrapper ---------------------------------------

def taggregate_forward(x, params, *, n_layers, n_heads, b_tile=None):
    """x: (B, clip_length, E) float32  ->  (B, E) float32 (cls token)."""
    B, T, E = x.shape
    S = T + 1
    Sp = ((S + 7) // 8) * 8                        # pad seq to a multiple of 8
    L = n_layers
    F = params["w1_t"].shape[2]

    # Glue in plain JAX: prepend cls token, add positional embedding, pad seq.
    cls = jnp.broadcast_to(params["cls_token"], (B, 1, E)).astype(jnp.float32)
    xs = jnp.concatenate([cls, x.astype(jnp.float32)], axis=1) + params["pos_embed"]
    xs = jnp.pad(xs, ((0, 0), (0, Sp - S), (0, 0)))             # (B, Sp, E)

    # --------------------- generation-aware VMEM budgeting -------------------
    vmem_cap = _tpu_vmem_capacity_bytes()
    # One layer of bf16 weights: wq/wk/wv/wout (E*E each) + w1 (E*F) + w2 (F*E).
    layer_w_bytes = 2 * (4 * E * E + 2 * E * F)
    # Per-batch-row activation footprint: double-buffered f32 x block, f32
    # activation-carry scratch, bf16 attention scratch, largest f32 transients.
    per_row = Sp * (2 * E * 4 + E * 4 + E * 2 + (F + 2 * E) * 4)

    # Double-buffer the per-layer weights (prefetch layer l+1 under layer l)
    # only when that still leaves room for at least a minimal batch tile.
    dbl_ok = 2 * layer_w_bytes + min(B, 8) * per_row + (6 << 20) <= vmem_cap
    w_buf_factor = 2 if dbl_ok else 1

    act_budget = vmem_cap - w_buf_factor * layer_w_bytes - (6 << 20)
    bt_cap = max(8, min(int(act_budget // per_row), 512))
    if bt_cap >= 16:
        bt_cap = (bt_cap // 16) * 16   # keep M = Bt*Sp 256-aligned for the MXU
    if b_tile is not None:
        bt_cap = min(bt_cap, int(b_tile))

    if B <= bt_cap:                    # whole batch in one tile -> weights are
        Bt, Bp = B, B                  # streamed from HBM exactly once per layer
    else:
        Bt = int(bt_cap)
        Bp = ((B + Bt - 1) // Bt) * Bt
        xs = jnp.pad(xs, ((0, Bp - B), (0, 0), (0, 0)))
    nb = Bp // Bt

    vmem_limit = int(min(vmem_cap,
                         max(32 << 20,
                             w_buf_factor * layer_w_bytes
                             + Bt * per_row + (6 << 20))))

    # -------------------------------- specs ----------------------------------
    w_mode = None if w_buf_factor == 2 else pl.Buffered(1)

    def w_spec(shape):                 # per-layer streamed (large) weight block
        idx = lambda b, l: (l,) + (0,) * (len(shape) - 1)
        if w_mode is None:
            return pl.BlockSpec(shape, idx)
        return pl.BlockSpec(shape, idx, pipeline_mode=w_mode)

    def p_spec(shape):                 # small per-layer params (biases, norms)
        return pl.BlockSpec(shape, lambda b, l: (l,) + (0,) * (len(shape) - 1))

    fixed = lambda shape: pl.BlockSpec(shape, lambda b, l: (0,) * len(shape))

    # Batch-parallel megacore sharding only once each tile is compute-bound;
    # otherwise both cores would re-stream the full weights (2x HBM traffic).
    batch_sem = "parallel" if (nb > 1 and Bt * Sp >= 512) else "arbitrary"

    kernel = functools.partial(taggregate_kernel, n_heads=n_heads, seq_len=S)

    out = pl.pallas_call(
        kernel,
        out_shape=jax.ShapeDtypeStruct((Bp, E), jnp.float32),
        grid=(nb, L),
        in_specs=[
            pl.BlockSpec((Bt, Sp, E), lambda b, l: (b, 0, 0)),   # activations
            w_spec((1, E, E)), p_spec((1, 1, E)),                # Wq^T, bq
            w_spec((1, E, E)), p_spec((1, 1, E)),                # Wk^T, bk
            w_spec((1, E, E)), p_spec((1, 1, E)),                # Wv^T, bv
            w_spec((1, E, E)), p_spec((1, 1, E)),                # out_proj W^T, b
            w_spec((1, E, F)), p_spec((1, 1, F)),                # linear1 W^T, b
            w_spec((1, F, E)), p_spec((1, 1, E)),                # linear2 W^T, b
            p_spec((1, 1, E)), p_spec((1, 1, E)),                # norm1 w, b
            p_spec((1, 1, E)), p_spec((1, 1, E)),                # norm2 w, b
            fixed((1, E)), fixed((1, E)),                        # final norm w, b
        ],
        out_specs=pl.BlockSpec((Bt, E), lambda b, l: (b, 0)),
        scratch_shapes=[pltpu.VMEM((Bt, Sp, E), jnp.float32),    # activation carry
                        pltpu.VMEM((Bt, Sp, E), jnp.bfloat16)],  # attention output
        compiler_params=pltpu.CompilerParams(
            dimension_semantics=(batch_sem, "arbitrary"),
            vmem_limit_bytes=vmem_limit),
    )(xs,
      params["wq_t"], params["bq"], params["wk_t"], params["bk"],
      params["wv_t"], params["bv"], params["wout_t"], params["bout"],
      params["w1_t"], params["b1"], params["w2_t"], params["b2"],
      params["ln1w"], params["ln1b"], params["ln2w"], params["ln2b"],
      params["lnfw"], params["lnfb"])

    return out[:B]


# --------------------------- parameter init -----------------------------------

def trunc_normal(key, shape, std=0.02):
    # mirrors torch: normal_().fmod_(2).mul_(std)
    return jnp.fmod(jax.random.normal(key, shape, jnp.float32), 2.0) * std


def init_params(key, *, clip_length, embed_dim, n_layers, dim_ff):
    E, F, L = embed_dim, dim_ff, n_layers
    ks = jax.random.split(key, 4 * L + 2)
    it = iter(ks)

    # PyTorch layout weights (out_features, in_features), pre-transposed to the
    # x @ W layout and cast to bf16 ONCE (documented precision change; weight
    # streaming is HBM-bound, so halving weight bytes matters).
    wqkv = jnp.stack([trunc_normal(next(it), (3 * E, E)) for _ in range(L)])
    wout = jnp.stack([trunc_normal(next(it), (E, E)) for _ in range(L)])
    w1 = jnp.stack([trunc_normal(next(it), (F, E)) for _ in range(L)])
    w2 = jnp.stack([trunc_normal(next(it), (E, F)) for _ in range(L)])
    wqkv_t = jnp.transpose(wqkv, (0, 2, 1))                     # (L, E, 3E)

    return dict(
        cls_token=trunc_normal(next(it), (1, 1, E)),
        pos_embed=trunc_normal(next(it), (1, clip_length + 1, E)),
        wq_t=wqkv_t[:, :, 0 * E:1 * E].astype(jnp.bfloat16),
        wk_t=wqkv_t[:, :, 1 * E:2 * E].astype(jnp.bfloat16),
        wv_t=wqkv_t[:, :, 2 * E:3 * E].astype(jnp.bfloat16),
        wout_t=jnp.transpose(wout, (0, 2, 1)).astype(jnp.bfloat16),
        w1_t=jnp.transpose(w1, (0, 2, 1)).astype(jnp.bfloat16),
        w2_t=jnp.transpose(w2, (0, 2, 1)).astype(jnp.bfloat16),
        bq=jnp.zeros((L, 1, E), jnp.float32),
        bk=jnp.zeros((L, 1, E), jnp.float32),
        bv=jnp.zeros((L, 1, E), jnp.float32),
        bout=jnp.zeros((L, 1, E), jnp.float32),
        b1=jnp.zeros((L, 1, F), jnp.float32),
        b2=jnp.zeros((L, 1, E), jnp.float32),
        ln1w=jnp.ones((L, 1, E), jnp.float32),
        ln1b=jnp.zeros((L, 1, E), jnp.float32),
        ln2w=jnp.ones((L, 1, E), jnp.float32),
        ln2b=jnp.zeros((L, 1, E), jnp.float32),
        lnfw=jnp.ones((1, E), jnp.float32),
        lnfb=jnp.zeros((1, E), jnp.float32),
    )


# ------------------------------- main -----------------------------------------

if __name__ == "__main__":
    # Small, forward-consistent shapes (module default embed_dim=2048, n_layers=6,
    # nhead=8, dim_feedforward=2048 scaled down for a smoke test).
    B, CLIP, E, L, H, F = 2, 8, 32, 2, 8, 64

    key = jax.random.PRNGKey(0)
    kx, kp = jax.random.split(key)
    x = jax.random.normal(kx, (B, CLIP, E), jnp.float32)

    params = init_params(kp, clip_length=CLIP, embed_dim=E,
                         n_layers=L, dim_ff=F)

    out = taggregate_forward(x, params, n_layers=L, n_heads=H)
    out = jax.block_until_ready(out)
    assert out.shape == (B, E) and out.dtype == jnp.float32
    assert bool(jnp.all(jnp.isfinite(out)))
    print("KERNEL_OK")
</pallas_src>

<mosaic_0001>
module attributes {stable_mosaic.version = 11 : i64} {
  func.func @taggregate_kernel(%arg0: i32, %arg1: i32, %arg2: memref<2x16x32xf32, #tpu.memory_space<vmem>>, %arg3: memref<1x32x32xbf16, #tpu.memory_space<vmem>>, %arg4: memref<1x1x32xf32, #tpu.memory_space<vmem>>, %arg5: memref<1x32x32xbf16, #tpu.memory_space<vmem>>, %arg6: memref<1x1x32xf32, #tpu.memory_space<vmem>>, %arg7: memref<1x32x32xbf16, #tpu.memory_space<vmem>>, %arg8: memref<1x1x32xf32, #tpu.memory_space<vmem>>, %arg9: memref<1x32x32xbf16, #tpu.memory_space<vmem>>, %arg10: memref<1x1x32xf32, #tpu.memory_space<vmem>>, %arg11: memref<1x32x64xbf16, #tpu.memory_space<vmem>>, %arg12: memref<1x1x64xf32, #tpu.memory_space<vmem>>, %arg13: memref<1x64x32xbf16, #tpu.memory_space<vmem>>, %arg14: memref<1x1x32xf32, #tpu.memory_space<vmem>>, %arg15: memref<1x1x32xf32, #tpu.memory_space<vmem>>, %arg16: memref<1x1x32xf32, #tpu.memory_space<vmem>>, %arg17: memref<1x1x32xf32, #tpu.memory_space<vmem>>, %arg18: memref<1x1x32xf32, #tpu.memory_space<vmem>>, %arg19: memref<1x32xf32, #tpu.memory_space<vmem>>, %arg20: memref<1x32xf32, #tpu.memory_space<vmem>>, %arg21: memref<2x32xf32, #tpu.memory_space<vmem>>, %arg22: memref<2x16x32xf32, #tpu.memory_space<vmem>>, %arg23: memref<2x16x32xbf16, #tpu.memory_space<vmem>>) attributes {dimension_semantics = [#tpu.dimension_semantics<arbitrary>, #tpu.dimension_semantics<arbitrary>], iteration_bounds = array<i64: 1, 2>, scalar_prefetch = 0 : i64, scratch_operands = 2 : i64, tpu.core_type = #tpu.core_type<tc>, window_params = [{transform_indices = @transform_0, window_bounds = array<i64: 2, 16, 32>}, {transform_indices = @transform_1, window_bounds = array<i64: 1, 32, 32>}, {transform_indices = @transform_2, window_bounds = array<i64: 1, 1, 32>}, {transform_indices = @transform_3, window_bounds = array<i64: 1, 32, 32>}, {transform_indices = @transform_4, window_bounds = array<i64: 1, 1, 32>}, {transform_indices = @transform_5, window_bounds = array<i64: 1, 32, 32>}, {transform_indices = @transform_6, window_bounds = array<i64: 1, 1, 32>}, {transform_indices = @transform_7, window_bounds = array<i64: 1, 32, 32>}, {transform_indices = @transform_8, window_bounds = array<i64: 1, 1, 32>}, {transform_indices = @transform_9, window_bounds = array<i64: 1, 32, 64>}, {transform_indices = @transform_10, window_bounds = array<i64: 1, 1, 64>}, {transform_indices = @transform_11, window_bounds = array<i64: 1, 64, 32>}, {transform_indices = @transform_12, window_bounds = array<i64: 1, 1, 32>}, {transform_indices = @transform_13, window_bounds = array<i64: 1, 1, 32>}, {transform_indices = @transform_14, window_bounds = array<i64: 1, 1, 32>}, {transform_indices = @transform_15, window_bounds = array<i64: 1, 1, 32>}, {transform_indices = @transform_16, window_bounds = array<i64: 1, 1, 32>}, {pipeline_mode = #tpu.pipeline_mode<synchronous>, transform_indices = @transform_17, window_bounds = array<i64: 1, 32>}, {pipeline_mode = #tpu.pipeline_mode<synchronous>, transform_indices = @transform_18, window_bounds = array<i64: 1, 32>}, {transform_indices = @transform_19, window_bounds = array<i64: 2, 32>}]} {
    %c0_i32 = arith.constant 0 : i32
    %0 = arith.cmpi eq, %arg1, %c0_i32 : i32
    %1 = arith.extui %0 : i1 to i32
    %c0_i32_0 = arith.constant 0 : i32
    %2 = arith.cmpi ne, %1, %c0_i32_0 : i32
    scf.if %2 {
      %c0_280 = arith.constant 0 : index
      %c0_281 = arith.constant 0 : index
      %c0_282 = arith.constant 0 : index
      %422 = vector.load %arg2[%c0_280, %c0_281, %c0_282] : memref<2x16x32xf32, #tpu.memory_space<vmem>>, vector<2x16x32xf32>
      %c0_283 = arith.constant 0 : index
      %c0_284 = arith.constant 0 : index
      %c0_285 = arith.constant 0 : index
      %423 = vector.load %arg22[%c0_283, %c0_284, %c0_285] : memref<2x16x32xf32, #tpu.memory_space<vmem>>, vector<2x16x32xf32>
      tpu.vector_store %arg22[%c0_283, %c0_284, %c0_285], %422 {strides = array<i32>} : memref<2x16x32xf32, #tpu.memory_space<vmem>>, vector<2x16x32xf32>,
    } else {
    }
    %c0 = arith.constant 0 : index
    %c0_1 = arith.constant 0 : index
    %c0_2 = arith.constant 0 : index
    %3 = vector.load %arg22[%c0, %c0_1, %c0_2] : memref<2x16x32xf32, #tpu.memory_space<vmem>>, vector<2x16x32xf32>
    %4 = vector.shape_cast %3 : vector<2x16x32xf32> to vector<32x32xf32>
    %5 = arith.truncf %4 : vector<32x32xf32> to vector<32x32xbf16>
    %6 = tpu.iota {dimensions = array<i32: 2>} : vector<1x1x16xi32>
    %c9_i32 = arith.constant 9 : i32
    %7 = vector.broadcast %c9_i32 : i32 to vector<1x1x16xi32>
    %8 = arith.cmpi slt, %6, %7 : vector<1x1x16xi32>
    %cst = arith.constant 0.000000e+00 : f32
    %cst_3 = arith.constant -1.000000e+30 : f32
    %9 = vector.broadcast %cst : f32 to vector<1x1x16xf32>
    %10 = vector.broadcast %cst_3 : f32 to vector<1x1x16xf32>
    %11 = arith.select %8, %9, %10 : vector<1x1x16xi1>, vector<1x1x16xf32>
    %c0_4 = arith.constant 0 : index
    %c0_5 = arith.constant 0 : index
    %c0_6 = arith.constant 0 : index
    %12 = vector.load %arg3[%c0_4, %c0_5, %c0_6] : memref<1x32x32xbf16, #tpu.memory_space<vmem>>, vector<1x32x4xbf16>
    %13 = vector.shape_cast %12 : vector<1x32x4xbf16> to vector<32x4xbf16>
    %cst_7 = arith.constant dense<0.000000e+00> : vector<32x4xf32>
    %14 = tpu.matmul %5, %13, %cst_7 {dimension_numbers = #tpu.dot_dimension_numbers<[1], [0], [0], [1], [0, 0, 1, 1], [], []>} : vector<32x32xbf16>, vector<32x4xbf16>, vector<32x4xf32> -> vector<32x4xf32>
    %c0_8 = arith.constant 0 : index
    %c0_9 = arith.constant 0 : index
    %c0_10 = arith.constant 0 : index
    %15 = vector.load %arg4[%c0_8, %c0_9, %c0_10] : memref<1x1x32xf32, #tpu.memory_space<vmem>>, vector<1x1x4xf32>
    %16 = vector.shape_cast %15 : vector<1x1x4xf32> to vector<1x4xf32>
    %17 = vector.broadcast %16 : vector<1x4xf32> to vector<32x4xf32>
    %18 = arith.addf %14, %17 : vector<32x4xf32>
    %19 = vector.shape_cast %18 : vector<32x4xf32> to vector<2x16x4xf32>
    %c0_11 = arith.constant 0 : index
    %c0_12 = arith.constant 0 : index
    %c0_13 = arith.constant 0 : index
    %20 = vector.load %arg5[%c0_11, %c0_12, %c0_13] : memref<1x32x32xbf16, #tpu.memory_space<vmem>>, vector<1x32x4xbf16>
    %21 = vector.shape_cast %20 : vector<1x32x4xbf16> to vector<32x4xbf16>
    %cst_14 = arith.constant dense<0.000000e+00> : vector<32x4xf32>
    %22 = tpu.matmul %5, %21, %cst_14 {dimension_numbers = #tpu.dot_dimension_numbers<[1], [0], [0], [1], [0, 0, 1, 1], [], []>} : vector<32x32xbf16>, vector<32x4xbf16>, vector<32x4xf32> -> vector<32x4xf32>
    %c0_15 = arith.constant 0 : index
    %c0_16 = arith.constant 0 : index
    %c0_17 = arith.constant 0 : index
    %23 = vector.load %arg6[%c0_15, %c0_16, %c0_17] : memref<1x1x32xf32, #tpu.memory_space<vmem>>, vector<1x1x4xf32>
    %24 = vector.shape_cast %23 : vector<1x1x4xf32> to vector<1x4xf32>
    %25 = vector.broadcast %24 : vector<1x4xf32> to vector<32x4xf32>
    %26 = arith.addf %22, %25 : vector<32x4xf32>
    %27 = vector.shape_cast %26 : vector<32x4xf32> to vector<2x16x4xf32>
    %c0_18 = arith.constant 0 : index
    %c0_19 = arith.constant 0 : index
    %c0_20 = arith.constant 0 : index
    %28 = vector.load %arg7[%c0_18, %c0_19, %c0_20] : memref<1x32x32xbf16, #tpu.memory_space<vmem>>, vector<1x32x4xbf16>
    %29 = vector.shape_cast %28 : vector<1x32x4xbf16> to vector<32x4xbf16>
    %cst_21 = arith.constant dense<0.000000e+00> : vector<32x4xf32>
    %30 = tpu.matmul %5, %29, %cst_21 {dimension_numbers = #tpu.dot_dimension_numbers<[1], [0], [0], [1], [0, 0, 1, 1], [], []>} : vector<32x32xbf16>, vector<32x4xbf16>, vector<32x4xf32> -> vector<32x4xf32>
    %c0_22 = arith.constant 0 : index
    %c0_23 = arith.constant 0 : index
    %c0_24 = arith.constant 0 : index
    %31 = vector.load %arg8[%c0_22, %c0_23, %c0_24] : memref<1x1x32xf32, #tpu.memory_space<vmem>>, vector<1x1x4xf32>
    %32 = vector.shape_cast %31 : vector<1x1x4xf32> to vector<1x4xf32>
    %33 = vector.broadcast %32 : vector<1x4xf32> to vector<32x4xf32>
    %34 = arith.addf %30, %33 : vector<32x4xf32>
    %35 = vector.shape_cast %34 : vector<32x4xf32> to vector<2x16x4xf32>
    "tpu.trace_start"() <{level = 10 : i32, message = "bqd,bkd->bqk"}> : () -> ()
    %cst_25 = arith.constant dense<0.000000e+00> : vector<2x16x16xf32>
    %36 = tpu.matmul %19, %27, %cst_25 {dimension_numbers = #tpu.dot_dimension_numbers<[2], [2], [1], [1], [0, 0, 0, 1, 1, 1], [0], [0]>} : vector<2x16x4xf32>, vector<2x16x4xf32>, vector<2x16x16xf32> -> vector<2x16x16xf32>
    "tpu.trace_stop"() : () -> ()
    %cst_26 = arith.constant 5.000000e-01 : f32
    %37 = vector.broadcast %cst_26 : f32 to vector<2x16x16xf32>
    %38 = arith.mulf %36, %37 : vector<2x16x16xf32>
    %39 = vector.broadcast %11 : vector<1x1x16xf32> to vector<2x16x16xf32>
    %40 = arith.addf %38, %39 : vector<2x16x16xf32>
    %cst_27 = arith.constant dense<0xFF800000> : vector<2x16xf32>
    %41 = vector.multi_reduction <maximumf>, %40, %cst_27 [2] : vector<2x16x16xf32> to vector<2x16xf32>
    %42 = vector.shape_cast %41 : vector<2x16xf32> to vector<2x16x1xf32>
    %43 = vector.broadcast %42 : vector<2x16x1xf32> to vector<2x16x16xf32>
    %44 = arith.subf %40, %43 : vector<2x16x16xf32>
    %45 = math.exp %44 : vector<2x16x16xf32>
    %cst_28 = arith.constant dense<0.000000e+00> : vector<2x16xf32>
    %46 = vector.multi_reduction <add>, %45, %cst_28 [2] : vector<2x16x16xf32> to vector<2x16xf32>
    %47 = vector.shape_cast %46 : vector<2x16xf32> to vector<2x16x1xf32>
    %48 = vector.broadcast %47 : vector<2x16x1xf32> to vector<2x16x16xf32>
    %49 = arith.divf %45, %48 : vector<2x16x16xf32>
    "tpu.trace_start"() <{level = 10 : i32, message = "bqk,bkd->bqd"}> : () -> ()
    %cst_29 = arith.constant dense<0.000000e+00> : vector<2x16x4xf32>
    %50 = tpu.matmul %49, %35, %cst_29 {dimension_numbers = #tpu.dot_dimension_numbers<[2], [1], [1], [2], [0, 0, 0, 1, 1, 2], [0], [0]>} : vector<2x16x16xf32>, vector<2x16x4xf32>, vector<2x16x4xf32> -> vector<2x16x4xf32>
    "tpu.trace_stop"() : () -> ()
    %51 = arith.truncf %50 : vector<2x16x4xf32> to vector<2x16x4xbf16>
    %c0_30 = arith.constant 0 : index
    %c0_31 = arith.constant 0 : index
    %c0_32 = arith.constant 0 : index
    %52 = vector.load %arg23[%c0_30, %c0_31, %c0_32] : memref<2x16x32xbf16, #tpu.memory_space<vmem>>, vector<2x16x4xbf16>
    tpu.vector_store %arg23[%c0_30, %c0_31, %c0_32], %51 {strides = array<i32>} : memref<2x16x32xbf16, #tpu.memory_space<vmem>>, vector<2x16x4xbf16>,
    %c0_33 = arith.constant 0 : index
    %c0_34 = arith.constant 0 : index
    %c4 = arith.constant 4 : index
    %53 = vector.load %arg3[%c0_33, %c0_34, %c4] : memref<1x32x32xbf16, #tpu.memory_space<vmem>>, vector<1x32x4xbf16>
    %54 = vector.shape_cast %53 : vector<1x32x4xbf16> to vector<32x4xbf16>
    %cst_35 = arith.constant dense<0.000000e+00> : vector<32x4xf32>
    %55 = tpu.matmul %5, %54, %cst_35 {dimension_numbers = #tpu.dot_dimension_numbers<[1], [0], [0], [1], [0, 0, 1, 1], [], []>} : vector<32x32xbf16>, vector<32x4xbf16>, vector<32x4xf32> -> vector<32x4xf32>
    %c0_36 = arith.constant 0 : index
    %c0_37 = arith.constant 0 : index
    %c4_38 = arith.constant 4 : index
    %56 = vector.load %arg4[%c0_36, %c0_37, %c4_38] : memref<1x1x32xf32, #tpu.memory_space<vmem>>, vector<1x1x4xf32>
    %57 = vector.shape_cast %56 : vector<1x1x4xf32> to vector<1x4xf32>
    %58 = vector.broadcast %57 : vector<1x4xf32> to vector<32x4xf32>
    %59 = arith.addf %55, %58 : vector<32x4xf32>
    %60 = vector.shape_cast %59 : vector<32x4xf32> to vector<2x16x4xf32>
    %c0_39 = arith.constant 0 : index
    %c0_40 = arith.constant 0 : index
    %c4_41 = arith.constant 4 : index
    %61 = vector.load %arg5[%c0_39, %c0_40, %c4_41] : memref<1x32x32xbf16, #tpu.memory_space<vmem>>, vector<1x32x4xbf16>
    %62 = vector.shape_cast %61 : vector<1x32x4xbf16> to vector<32x4xbf16>
    %cst_42 = arith.constant dense<0.000000e+00> : vector<32x4xf32>
    %63 = tpu.matmul %5, %62, %cst_42 {dimension_numbers = #tpu.dot_dimension_numbers<[1], [0], [0], [1], [0, 0, 1, 1], [], []>} : vector<32x32xbf16>, vector<32x4xbf16>, vector<32x4xf32> -> vector<32x4xf32>
    %c0_43 = arith.constant 0 : index
    %c0_44 = arith.constant 0 : index
    %c4_45 = arith.constant 4 : index
    %64 = vector.load %arg6[%c0_43, %c0_44, %c4_45] : memref<1x1x32xf32, #tpu.memory_space<vmem>>, vector<1x1x4xf32>
    %65 = vector.shape_cast %64 : vector<1x1x4xf32> to vector<1x4xf32>
    %66 = vector.broadcast %65 : vector<1x4xf32> to vector<32x4xf32>
    %67 = arith.addf %63, %66 : vector<32x4xf32>
    %68 = vector.shape_cast %67 : vector<32x4xf32> to vector<2x16x4xf32>
    %c0_46 = arith.constant 0 : index
    %c0_47 = arith.constant 0 : index
    %c4_48 = arith.constant 4 : index
    %69 = vector.load %arg7[%c0_46, %c0_47, %c4_48] : memref<1x32x32xbf16, #tpu.memory_space<vmem>>, vector<1x32x4xbf16>
    %70 = vector.shape_cast %69 : vector<1x32x4xbf16> to vector<32x4xbf16>
    %cst_49 = arith.constant dense<0.000000e+00> : vector<32x4xf32>
    %71 = tpu.matmul %5, %70, %cst_49 {dimension_numbers = #tpu.dot_dimension_numbers<[1], [0], [0], [1], [0, 0, 1, 1], [], []>} : vector<32x32xbf16>, vector<32x4xbf16>, vector<32x4xf32> -> vector<32x4xf32>
    %c0_50 = arith.constant 0 : index
    %c0_51 = arith.constant 0 : index
    %c4_52 = arith.constant 4 : index
    %72 = vector.load %arg8[%c0_50, %c0_51, %c4_52] : memref<1x1x32xf32, #tpu.memory_space<vmem>>, vector<1x1x4xf32>
    %73 = vector.shape_cast %72 : vector<1x1x4xf32> to vector<1x4xf32>
    %74 = vector.broadcast %73 : vector<1x4xf32> to vector<32x4xf32>
    %75 = arith.addf %71, %74 : vector<32x4xf32>
    %76 = vector.shape_cast %75 : vector<32x4xf32> to vector<2x16x4xf32>
    "tpu.trace_start"() <{level = 10 : i32, message = "bqd,bkd->bqk"}> : () -> ()
    %cst_53 = arith.constant dense<0.000000e+00> : vector<2x16x16xf32>
    %77 = tpu.matmul %60, %68, %cst_53 {dimension_numbers = #tpu.dot_dimension_numbers<[2], [2], [1], [1], [0, 0, 0, 1, 1, 1], [0], [0]>} : vector<2x16x4xf32>, vector<2x16x4xf32>, vector<2x16x16xf32> -> vector<2x16x16xf32>
    "tpu.trace_stop"() : () -> ()
    %cst_54 = arith.constant 5.000000e-01 : f32
    %78 = vector.broadcast %cst_54 : f32 to vector<2x16x16xf32>
    %79 = arith.mulf %77, %78 : vector<2x16x16xf32>
    %80 = vector.broadcast %11 : vector<1x1x16xf32> to vector<2x16x16xf32>
    %81 = arith.addf %79, %80 : vector<2x16x16xf32>
    %cst_55 = arith.constant dense<0xFF800000> : vector<2x16xf32>
    %82 = vector.multi_reduction <maximumf>, %81, %cst_55 [2] : vector<2x16x16xf32> to vector<2x16xf32>
    %83 = vector.shape_cast %82 : vector<2x16xf32> to vector<2x16x1xf32>
    %84 = vector.broadcast %83 : vector<2x16x1xf32> to vector<2x16x16xf32>
    %85 = arith.subf %81, %84 : vector<2x16x16xf32>
    %86 = math.exp %85 : vector<2x16x16xf32>
    %cst_56 = arith.constant dense<0.000000e+00> : vector<2x16xf32>
    %87 = vector.multi_reduction <add>, %86, %cst_56 [2] : vector<2x16x16xf32> to vector<2x16xf32>
    %88 = vector.shape_cast %87 : vector<2x16xf32> to vector<2x16x1xf32>
    %89 = vector.broadcast %88 : vector<2x16x1xf32> to vector<2x16x16xf32>
    %90 = arith.divf %86, %89 : vector<2x16x16xf32>
    "tpu.trace_start"() <{level = 10 : i32, message = "bqk,bkd->bqd"}> : () -> ()
    %cst_57 = arith.constant dense<0.000000e+00> : vector<2x16x4xf32>
    %91 = tpu.matmul %90, %76, %cst_57 {dimension_numbers = #tpu.dot_dimension_numbers<[2], [1], [1], [2], [0, 0, 0, 1, 1, 2], [0], [0]>} : vector<2x16x16xf32>, vector<2x16x4xf32>, vector<2x16x4xf32> -> vector<2x16x4xf32>
    "tpu.trace_stop"() : () -> ()
    %92 = arith.truncf %91 : vector<2x16x4xf32> to vector<2x16x4xbf16>
    %c0_58 = arith.constant 0 : index
    %c0_59 = arith.constant 0 : index
    %c4_60 = arith.constant 4 : index
    %93 = vector.load %arg23[%c0_58, %c0_59, %c4_60] : memref<2x16x32xbf16, #tpu.memory_space<vmem>>, vector<2x16x4xbf16>
    tpu.vector_store %arg23[%c0_58, %c0_59, %c4_60], %92 {strides = array<i32>} : memref<2x16x32xbf16, #tpu.memory_space<vmem>>, vector<2x16x4xbf16>,
    %c0_61 = arith.constant 0 : index
    %c0_62 = arith.constant 0 : index
    %c8 = arith.constant 8 : index
    %94 = vector.load %arg3[%c0_61, %c0_62, %c8] : memref<1x32x32xbf16, #tpu.memory_space<vmem>>, vector<1x32x4xbf16>
    %95 = vector.shape_cast %94 : vector<1x32x4xbf16> to vector<32x4xbf16>
    %cst_63 = arith.constant dense<0.000000e+00> : vector<32x4xf32>
    %96 = tpu.matmul %5, %95, %cst_63 {dimension_numbers = #tpu.dot_dimension_numbers<[1], [0], [0], [1], [0, 0, 1, 1], [], []>} : vector<32x32xbf16>, vector<32x4xbf16>, vector<32x4xf32> -> vector<32x4xf32>
    %c0_64 = arith.constant 0 : index
    %c0_65 = arith.constant 0 : index
    %c8_66 = arith.constant 8 : index
    %97 = vector.load %arg4[%c0_64, %c0_65, %c8_66] : memref<1x1x32xf32, #tpu.memory_space<vmem>>, vector<1x1x4xf32>
    %98 = vector.shape_cast %97 : vector<1x1x4xf32> to vector<1x4xf32>
    %99 = vector.broadcast %98 : vector<1x4xf32> to vector<32x4xf32>
    %100 = arith.addf %96, %99 : vector<32x4xf32>
    %101 = vector.shape_cast %100 : vector<32x4xf32> to vector<2x16x4xf32>
    %c0_67 = arith.constant 0 : index
    %c0_68 = arith.constant 0 : index
    %c8_69 = arith.constant 8 : index
    %102 = vector.load %arg5[%c0_67, %c0_68, %c8_69] : memref<1x32x32xbf16, #tpu.memory_space<vmem>>, vector<1x32x4xbf16>
    %103 = vector.shape_cast %102 : vector<1x32x4xbf16> to vector<32x4xbf16>
    %cst_70 = arith.constant dense<0.000000e+00> : vector<32x4xf32>
    %104 = tpu.matmul %5, %103, %cst_70 {dimension_numbers = #tpu.dot_dimension_numbers<[1], [0], [0], [1], [0, 0, 1, 1], [], []>} : vector<32x32xbf16>, vector<32x4xbf16>, vector<32x4xf32> -> vector<32x4xf32>
    %c0_71 = arith.constant 0 : index
    %c0_72 = arith.constant 0 : index
    %c8_73 = arith.constant 8 : index
    %105 = vector.load %arg6[%c0_71, %c0_72, %c8_73] : memref<1x1x32xf32, #tpu.memory_space<vmem>>, vector<1x1x4xf32>
    %106 = vector.shape_cast %105 : vector<1x1x4xf32> to vector<1x4xf32>
    %107 = vector.broadcast %106 : vector<1x4xf32> to vector<32x4xf32>
    %108 = arith.addf %104, %107 : vector<32x4xf32>
    %109 = vector.shape_cast %108 : vector<32x4xf32> to vector<2x16x4xf32>
    %c0_74 = arith.constant 0 : index
    %c0_75 = arith.constant 0 : index
    %c8_76 = arith.constant 8 : index
    %110 = vector.load %arg7[%c0_74, %c0_75, %c8_76] : memref<1x32x32xbf16, #tpu.memory_space<vmem>>, vector<1x32x4xbf16>
    %111 = vector.shape_cast %110 : vector<1x32x4xbf16> to vector<32x4xbf16>
    %cst_77 = arith.constant dense<0.000000e+00> : vector<32x4xf32>
    %112 = tpu.matmul %5, %111, %cst_77 {dimension_numbers = #tpu.dot_dimension_numbers<[1], [0], [0], [1], [0, 0, 1, 1], [], []>} : vector<32x32xbf16>, vector<32x4xbf16>, vector<32x4xf32> -> vector<32x4xf32>
    %c0_78 = arith.constant 0 : index
    %c0_79 = arith.constant 0 : index
    %c8_80 = arith.constant 8 : index
    %113 = vector.load %arg8[%c0_78, %c0_79, %c8_80] : memref<1x1x32xf32, #tpu.memory_space<vmem>>, vector<1x1x4xf32>
    %114 = vector.shape_cast %113 : vector<1x1x4xf32> to vector<1x4xf32>
    %115 = vector.broadcast %114 : vector<1x4xf32> to vector<32x4xf32>
    %116 = arith.addf %112, %115 : vector<32x4xf32>
    %117 = vector.shape_cast %116 : vector<32x4xf32> to vector<2x16x4xf32>
    "tpu.trace_start"() <{level = 10 : i32, message = "bqd,bkd->bqk"}> : () -> ()
    %cst_81 = arith.constant dense<0.000000e+00> : vector<2x16x16xf32>
    %118 = tpu.matmul %101, %109, %cst_81 {dimension_numbers = #tpu.dot_dimension_numbers<[2], [2], [1], [1], [0, 0, 0, 1, 1, 1], [0], [0]>} : vector<2x16x4xf32>, vector<2x16x4xf32>, vector<2x16x16xf32> -> vector<2x16x16xf32>
    "tpu.trace_stop"() : () -> ()
    %cst_82 = arith.constant 5.000000e-01 : f32
    %119 = vector.broadcast %cst_82 : f32 to vector<2x16x16xf32>
    %120 = arith.mulf %118, %119 : vector<2x16x16xf32>
    %121 = vector.broadcast %11 : vector<1x1x16xf32> to vector<2x16x16xf32>
    %122 = arith.addf %120, %121 : vector<2x16x16xf32>
    %cst_83 = arith.constant dense<0xFF800000> : vector<2x16xf32>
    %123 = vector.multi_reduction <maximumf>, %122, %cst_83 [2] : vector<2x16x16xf32> to vector<2x16xf32>
    %124 = vector.shape_cast %123 : vector<2x16xf32> to vector<2x16x1xf32>
    %125 = vector.broadcast %124 : vector<2x16x1xf32> to vector<2x16x16xf32>
    %126 = arith.subf %122, %125 : vector<2x16x16xf32>
    %127 = math.exp %126 : vector<2x16x16xf32>
    %cst_84 = arith.constant dense<0.000000e+00> : vector<2x16xf32>
    %128 = vector.multi_reduction <add>, %127, %cst_84 [2] : vector<2x16x16xf32> to vector<2x16xf32>
    %129 = vector.shape_cast %128 : vector<2x16xf32> to vector<2x16x1xf32>
    %130 = vector.broadcast %129 : vector<2x16x1xf32> to vector<2x16x16xf32>
    %131 = arith.divf %127, %130 : vector<2x16x16xf32>
    "tpu.trace_start"() <{level = 10 : i32, message = "bqk,bkd->bqd"}> : () -> ()
    %cst_85 = arith.constant dense<0.000000e+00> : vector<2x16x4xf32>
    %132 = tpu.matmul %131, %117, %cst_85 {dimension_numbers = #tpu.dot_dimension_numbers<[2], [1], [1], [2], [0, 0, 0, 1, 1, 2], [0], [0]>} : vector<2x16x16xf32>, vector<2x16x4xf32>, vector<2x16x4xf32> -> vector<2x16x4xf32>
    "tpu.trace_stop"() : () -> ()
    %133 = arith.truncf %132 : vector<2x16x4xf32> to vector<2x16x4xbf16>
    %c0_86 = arith.constant 0 : index
    %c0_87 = arith.constant 0 : index
    %c8_88 = arith.constant 8 : index
    %134 = vector.load %arg23[%c0_86, %c0_87, %c8_88] : memref<2x16x32xbf16, #tpu.memory_space<vmem>>, vector<2x16x4xbf16>
    tpu.vector_store %arg23[%c0_86, %c0_87, %c8_88], %133 {strides = array<i32>} : memref<2x16x32xbf16, #tpu.memory_space<vmem>>, vector<2x16x4xbf16>,
    %c0_89 = arith.constant 0 : index
    %c0_90 = arith.constant 0 : index
    %c12 = arith.constant 12 : index
    %135 = vector.load %arg3[%c0_89, %c0_90, %c12] : memref<1x32x32xbf16, #tpu.memory_space<vmem>>, vector<1x32x4xbf16>
    %136 = vector.shape_cast %135 : vector<1x32x4xbf16> to vector<32x4xbf16>
    %cst_91 = arith.constant dense<0.000000e+00> : vector<32x4xf32>
    %137 = tpu.matmul %5, %136, %cst_91 {dimension_numbers = #tpu.dot_dimension_numbers<[1], [0], [0], [1], [0, 0, 1, 1], [], []>} : vector<32x32xbf16>, vector<32x4xbf16>, vector<32x4xf32> -> vector<32x4xf32>
    %c0_92 = arith.constant 0 : index
    %c0_93 = arith.constant 0 : index
    %c12_94 = arith.constant 12 : index
    %138 = vector.load %arg4[%c0_92, %c0_93, %c12_94] : memref<1x1x32xf32, #tpu.memory_space<vmem>>, vector<1x1x4xf32>
    %139 = vector.shape_cast %138 : vector<1x1x4xf32> to vector<1x4xf32>
    %140 = vector.broadcast %139 : vector<1x4xf32> to vector<32x4xf32>
    %141 = arith.addf %137, %140 : vector<32x4xf32>
    %142 = vector.shape_cast %141 : vector<32x4xf32> to vector<2x16x4xf32>
    %c0_95 = arith.constant 0 : index
    %c0_96 = arith.constant 0 : index
    %c12_97 = arith.constant 12 : index
    %143 = vector.load %arg5[%c0_95, %c0_96, %c12_97] : memref<1x32x32xbf16, #tpu.memory_space<vmem>>, vector<1x32x4xbf16>
    %144 = vector.shape_cast %143 : vector<1x32x4xbf16> to vector<32x4xbf16>
    %cst_98 = arith.constant dense<0.000000e+00> : vector<32x4xf32>
    %145 = tpu.matmul %5, %144, %cst_98 {dimension_numbers = #tpu.dot_dimension_numbers<[1], [0], [0], [1], [0, 0, 1, 1], [], []>} : vector<32x32xbf16>, vector<32x4xbf16>, vector<32x4xf32> -> vector<32x4xf32>
    %c0_99 = arith.constant 0 : index
    %c0_100 = arith.constant 0 : index
    %c12_101 = arith.constant 12 : index
    %146 = vector.load %arg6[%c0_99, %c0_100, %c12_101] : memref<1x1x32xf32, #tpu.memory_space<vmem>>, vector<1x1x4xf32>
    %147 = vector.shape_cast %146 : vector<1x1x4xf32> to vector<1x4xf32>
    %148 = vector.broadcast %147 : vector<1x4xf32> to vector<32x4xf32>
    %149 = arith.addf %145, %148 : vector<32x4xf32>
    %150 = vector.shape_cast %149 : vector<32x4xf32> to vector<2x16x4xf32>
    %c0_102 = arith.constant 0 : index
    %c0_103 = arith.constant 0 : index
    %c12_104 = arith.constant 12 : index
    %151 = vector.load %arg7[%c0_102, %c0_103, %c12_104] : memref<1x32x32xbf16, #tpu.memory_space<vmem>>, vector<1x32x4xbf16>
    %152 = vector.shape_cast %151 : vector<1x32x4xbf16> to vector<32x4xbf16>
    %cst_105 = arith.constant dense<0.000000e+00> : vector<32x4xf32>
    %153 = tpu.matmul %5, %152, %cst_105 {dimension_numbers = #tpu.dot_dimension_numbers<[1], [0], [0], [1], [0, 0, 1, 1], [], []>} : vector<32x32xbf16>, vector<32x4xbf16>, vector<32x4xf32> -> vector<32x4xf32>
    %c0_106 = arith.constant 0 : index
    %c0_107 = arith.constant 0 : index
    %c12_108 = arith.constant 12 : index
    %154 = vector.load %arg8[%c0_106, %c0_107, %c12_108] : memref<1x1x32xf32, #tpu.memory_space<vmem>>, vector<1x1x4xf32>
    %155 = vector.shape_cast %154 : vector<1x1x4xf32> to vector<1x4xf32>
    %156 = vector.broadcast %155 : vector<1x4xf32> to vector<32x4xf32>
    %157 = arith.addf %153, %156 : vector<32x4xf32>
    %158 = vector.shape_cast %157 : vector<32x4xf32> to vector<2x16x4xf32>
    "tpu.trace_start"() <{level = 10 : i32, message = "bqd,bkd->bqk"}> : () -> ()
    %cst_109 = arith.constant dense<0.000000e+00> : vector<2x16x16xf32>
    %159 = tpu.matmul %142, %150, %cst_109 {dimension_numbers = #tpu.dot_dimension_numbers<[2], [2], [1], [1], [0, 0, 0, 1, 1, 1], [0], [0]>} : vector<2x16x4xf32>, vector<2x16x4xf32>, vector<2x16x16xf32> -> vector<2x16x16xf32>
    "tpu.trace_stop"() : () -> ()
    %cst_110 = arith.constant 5.000000e-01 : f32
    %160 = vector.broadcast %cst_110 : f32 to vector<2x16x16xf32>
    %161 = arith.mulf %159, %160 : vector<2x16x16xf32>
    %162 = vector.broadcast %11 : vector<1x1x16xf32> to vector<2x16x16xf32>
    %163 = arith.addf %161, %162 : vector<2x16x16xf32>
    %cst_111 = arith.constant dense<0xFF800000> : vector<2x16xf32>
    %164 = vector.multi_reduction <maximumf>, %163, %cst_111 [2] : vector<2x16x16xf32> to vector<2x16xf32>
    %165 = vector.shape_cast %164 : vector<2x16xf32> to vector<2x16x1xf32>
    %166 = vector.broadcast %165 : vector<2x16x1xf32> to vector<2x16x16xf32>
    %167 = arith.subf %163, %166 : vector<2x16x16xf32>
    %168 = math.exp %167 : vector<2x16x16xf32>
    %cst_112 = arith.constant dense<0.000000e+00> : vector<2x16xf32>
    %169 = vector.multi_reduction <add>, %168, %cst_112 [2] : vector<2x16x16xf32> to vector<2x16xf32>
    %170 = vector.shape_cast %169 : vector<2x16xf32> to vector<2x16x1xf32>
    %171 = vector.broadcast %170 : vector<2x16x1xf32> to vector<2x16x16xf32>
    %172 = arith.divf %168, %171 : vector<2x16x16xf32>
    "tpu.trace_start"() <{level = 10 : i32, message = "bqk,bkd->bqd"}> : () -> ()
    %cst_113 = arith.constant dense<0.000000e+00> : vector<2x16x4xf32>
    %173 = tpu.matmul %172, %158, %cst_113 {dimension_numbers = #tpu.dot_dimension_numbers<[2], [1], [1], [2], [0, 0, 0, 1, 1, 2], [0], [0]>} : vector<2x16x16xf32>, vector<2x16x4xf32>, vector<2x16x4xf32> -> vector<2x16x4xf32>
    "tpu.trace_stop"() : () -> ()
    %174 = arith.truncf %173 : vector<2x16x4xf32> to vector<2x16x4xbf16>
    %c0_114 = arith.constant 0 : index
    %c0_115 = arith.constant 0 : index
    %c12_116 = arith.constant 12 : index
    %175 = vector.load %arg23[%c0_114, %c0_115, %c12_116] : memref<2x16x32xbf16, #tpu.memory_space<vmem>>, vector<2x16x4xbf16>
    tpu.vector_store %arg23[%c0_114, %c0_115, %c12_116], %174 {strides = array<i32>} : memref<2x16x32xbf16, #tpu.memory_space<vmem>>, vector<2x16x4xbf16>,
    %c0_117 = arith.constant 0 : index
    %c0_118 = arith.constant 0 : index
    %c16 = arith.constant 16 : index
    %176 = vector.load %arg3[%c0_117, %c0_118, %c16] : memref<1x32x32xbf16, #tpu.memory_space<vmem>>, vector<1x32x4xbf16>
    %177 = vector.shape_cast %176 : vector<1x32x4xbf16> to vector<32x4xbf16>
    %cst_119 = arith.constant dense<0.000000e+00> : vector<32x4xf32>
    %178 = tpu.matmul %5, %177, %cst_119 {dimension_numbers = #tpu.dot_dimension_numbers<[1], [0], [0], [1], [0, 0, 1, 1], [], []>} : vector<32x32xbf16>, vector<32x4xbf16>, vector<32x4xf32> -> vector<32x4xf32>
    %c0_120 = arith.constant 0 : index
    %c0_121 = arith.constant 0 : index
    %c16_122 = arith.constant 16 : index
    %179 = vector.load %arg4[%c0_120, %c0_121, %c16_122] : memref<1x1x32xf32, #tpu.memory_space<vmem>>, vector<1x1x4xf32>
    %180 = vector.shape_cast %179 : vector<1x1x4xf32> to vector<1x4xf32>
    %181 = vector.broadcast %180 : vector<1x4xf32> to vector<32x4xf32>
    %182 = arith.addf %178, %181 : vector<32x4xf32>
    %183 = vector.shape_cast %182 : vector<32x4xf32> to vector<2x16x4xf32>
    %c0_123 = arith.constant 0 : index
    %c0_124 = arith.constant 0 : index
    %c16_125 = arith.constant 16 : index
    %184 = vector.load %arg5[%c0_123, %c0_124, %c16_125] : memref<1x32x32xbf16, #tpu.memory_space<vmem>>, vector<1x32x4xbf16>
    %185 = vector.shape_cast %184 : vector<1x32x4xbf16> to vector<32x4xbf16>
    %cst_126 = arith.constant dense<0.000000e+00> : vector<32x4xf32>
    %186 = tpu.matmul %5, %185, %cst_126 {dimension_numbers = #tpu.dot_dimension_numbers<[1], [0], [0], [1], [0, 0, 1, 1], [], []>} : vector<32x32xbf16>, vector<32x4xbf16>, vector<32x4xf32> -> vector<32x4xf32>
    %c0_127 = arith.constant 0 : index
    %c0_128 = arith.constant 0 : index
    %c16_129 = arith.constant 16 : index
    %187 = vector.load %arg6[%c0_127, %c0_128, %c16_129] : memref<1x1x32xf32, #tpu.memory_space<vmem>>, vector<1x1x4xf32>
    %188 = vector.shape_cast %187 : vector<1x1x4xf32> to vector<1x4xf32>
    %189 = vector.broadcast %188 : vector<1x4xf32> to vector<32x4xf32>
    %190 = arith.addf %186, %189 : vector<32x4xf32>
    %191 = vector.shape_cast %190 : vector<32x4xf32> to vector<2x16x4xf32>
    %c0_130 = arith.constant 0 : index
    %c0_131 = arith.constant 0 : index
    %c16_132 = arith.constant 16 : index
    %192 = vector.load %arg7[%c0_130, %c0_131, %c16_132] : memref<1x32x32xbf16, #tpu.memory_space<vmem>>, vector<1x32x4xbf16>
    %193 = vector.shape_cast %192 : vector<1x32x4xbf16> to vector<32x4xbf16>
    %cst_133 = arith.constant dense<0.000000e+00> : vector<32x4xf32>
    %194 = tpu.matmul %5, %193, %cst_133 {dimension_numbers = #tpu.dot_dimension_numbers<[1], [0], [0], [1], [0, 0, 1, 1], [], []>} : vector<32x32xbf16>, vector<32x4xbf16>, vector<32x4xf32> -> vector<32x4xf32>
    %c0_134 = arith.constant 0 : index
    %c0_135 = arith.constant 0 : index
    %c16_136 = arith.constant 16 : index
    %195 = vector.load %arg8[%c0_134, %c0_135, %c16_136] : memref<1x1x32xf32, #tpu.memory_space<vmem>>, vector<1x1x4xf32>
    %196 = vector.shape_cast %195 : vector<1x1x4xf32> to vector<1x4xf32>
    %197 = vector.broadcast %196 : vector<1x4xf32> to vector<32x4xf32>
    %198 = arith.addf %194, %197 : vector<32x4xf32>
    %199 = vector.shape_cast %198 : vector<32x4xf32> to vector<2x16x4xf32>
    "tpu.trace_start"() <{level = 10 : i32, message = "bqd,bkd->bqk"}> : () -> ()
    %cst_137 = arith.constant dense<0.000000e+00> : vector<2x16x16xf32>
    %200 = tpu.matmul %183, %191, %cst_137 {dimension_numbers = #tpu.dot_dimension_numbers<[2], [2], [1], [1], [0, 0, 0, 1, 1, 1], [0], [0]>} : vector<2x16x4xf32>, vector<2x16x4xf32>, vector<2x16x16xf32> -> vector<2x16x16xf32>
    "tpu.trace_stop"() : () -> ()
    %cst_138 = arith.constant 5.000000e-01 : f32
    %201 = vector.broadcast %cst_138 : f32 to vector<2x16x16xf32>
    %202 = arith.mulf %200, %201 : vector<2x16x16xf32>
    %203 = vector.broadcast %11 : vector<1x1x16xf32> to vector<2x16x16xf32>
    %204 = arith.addf %202, %203 : vector<2x16x16xf32>
    %cst_139 = arith.constant dense<0xFF800000> : vector<2x16xf32>
    %205 = vector.multi_reduction <maximumf>, %204, %cst_139 [2] : vector<2x16x16xf32> to vector<2x16xf32>
    %206 = vector.shape_cast %205 : vector<2x16xf32> to vector<2x16x1xf32>
    %207 = vector.broadcast %206 : vector<2x16x1xf32> to vector<2x16x16xf32>
    %208 = arith.subf %204, %207 : vector<2x16x16xf32>
    %209 = math.exp %208 : vector<2x16x16xf32>
    %cst_140 = arith.constant dense<0.000000e+00> : vector<2x16xf32>
    %210 = vector.multi_reduction <add>, %209, %cst_140 [2] : vector<2x16x16xf32> to vector<2x16xf32>
    %211 = vector.shape_cast %210 : vector<2x16xf32> to vector<2x16x1xf32>
    %212 = vector.broadcast %211 : vector<2x16x1xf32> to vector<2x16x16xf32>
    %213 = arith.divf %209, %212 : vector<2x16x16xf32>
    "tpu.trace_start"() <{level = 10 : i32, message = "bqk,bkd->bqd"}> : () -> ()
    %cst_141 = arith.constant dense<0.000000e+00> : vector<2x16x4xf32>
    %214 = tpu.matmul %213, %199, %cst_141 {dimension_numbers = #tpu.dot_dimension_numbers<[2], [1], [1], [2], [0, 0, 0, 1, 1, 2], [0], [0]>} : vector<2x16x16xf32>, vector<2x16x4xf32>, vector<2x16x4xf32> -> vector<2x16x4xf32>
    "tpu.trace_stop"() : () -> ()
    %215 = arith.truncf %214 : vector<2x16x4xf32> to vector<2x16x4xbf16>
    %c0_142 = arith.constant 0 : index
    %c0_143 = arith.constant 0 : index
    %c16_144 = arith.constant 16 : index
    %216 = vector.load %arg23[%c0_142, %c0_143, %c16_144] : memref<2x16x32xbf16, #tpu.memory_space<vmem>>, vector<2x16x4xbf16>
    tpu.vector_store %arg23[%c0_142, %c0_143, %c16_144], %215 {strides = array<i32>} : memref<2x16x32xbf16, #tpu.memory_space<vmem>>, vector<2x16x4xbf16>,
    %c0_145 = arith.constant 0 : index
    %c0_146 = arith.constant 0 : index
    %c20 = arith.constant 20 : index
    %217 = vector.load %arg3[%c0_145, %c0_146, %c20] : memref<1x32x32xbf16, #tpu.memory_space<vmem>>, vector<1x32x4xbf16>
    %218 = vector.shape_cast %217 : vector<1x32x4xbf16> to vector<32x4xbf16>
    %cst_147 = arith.constant dense<0.000000e+00> : vector<32x4xf32>
    %219 = tpu.matmul %5, %218, %cst_147 {dimension_numbers = #tpu.dot_dimension_numbers<[1], [0], [0], [1], [0, 0, 1, 1], [], []>} : vector<32x32xbf16>, vector<32x4xbf16>, vector<32x4xf32> -> vector<32x4xf32>
    %c0_148 = arith.constant 0 : index
    %c0_149 = arith.constant 0 : index
    %c20_150 = arith.constant 20 : index
    %220 = vector.load %arg4[%c0_148, %c0_149, %c20_150] : memref<1x1x32xf32, #tpu.memory_space<vmem>>, vector<1x1x4xf32>
    %221 = vector.shape_cast %220 : vector<1x1x4xf32> to vector<1x4xf32>
    %222 = vector.broadcast %221 : vector<1x4xf32> to vector<32x4xf32>
    %223 = arith.addf %219, %222 : vector<32x4xf32>
    %224 = vector.shape_cast %223 : vector<32x4xf32> to vector<2x16x4xf32>
    %c0_151 = arith.constant 0 : index
    %c0_152 = arith.constant 0 : index
    %c20_153 = arith.constant 20 : index
    %225 = vector.load %arg5[%c0_151, %c0_152, %c20_153] : memref<1x32x32xbf16, #tpu.memory_space<vmem>>, vector<1x32x4xbf16>
    %226 = vector.shape_cast %225 : vector<1x32x4xbf16> to vector<32x4xbf16>
    %cst_154 = arith.constant dense<0.000000e+00> : vector<32x4xf32>
    %227 = tpu.matmul %5, %226, %cst_154 {dimension_numbers = #tpu.dot_dimension_numbers<[1], [0], [0], [1], [0, 0, 1, 1], [], []>} : vector<32x32xbf16>, vector<32x4xbf16>, vector<32x4xf32> -> vector<32x4xf32>
    %c0_155 = arith.constant 0 : index
    %c0_156 = arith.constant 0 : index
    %c20_157 = arith.constant 20 : index
    %228 = vector.load %arg6[%c0_155, %c0_156, %c20_157] : memref<1x1x32xf32, #tpu.memory_space<vmem>>, vector<1x1x4xf32>
    %229 = vector.shape_cast %228 : vector<1x1x4xf32> to vector<1x4xf32>
    %230 = vector.broadcast %229 : vector<1x4xf32> to vector<32x4xf32>
    %231 = arith.addf %227, %230 : vector<32x4xf32>
    %232 = vector.shape_cast %231 : vector<32x4xf32> to vector<2x16x4xf32>
    %c0_158 = arith.constant 0 : index
    %c0_159 = arith.constant 0 : index
    %c20_160 = arith.constant 20 : index
    %233 = vector.load %arg7[%c0_158, %c0_159, %c20_160] : memref<1x32x32xbf16, #tpu.memory_space<vmem>>, vector<1x32x4xbf16>
    %234 = vector.shape_cast %233 : vector<1x32x4xbf16> to vector<32x4xbf16>
    %cst_161 = arith.constant dense<0.000000e+00> : vector<32x4xf32>
    %235 = tpu.matmul %5, %234, %cst_161 {dimension_numbers = #tpu.dot_dimension_numbers<[1], [0], [0], [1], [0, 0, 1, 1], [], []>} : vector<32x32xbf16>, vector<32x4xbf16>, vector<32x4xf32> -> vector<32x4xf32>
    %c0_162 = arith.constant 0 : index
    %c0_163 = arith.constant 0 : index
    %c20_164 = arith.constant 20 : index
    %236 = vector.load %arg8[%c0_162, %c0_163, %c20_164] : memref<1x1x32xf32, #tpu.memory_space<vmem>>, vector<1x1x4xf32>
    %237 = vector.shape_cast %236 : vector<1x1x4xf32> to vector<1x4xf32>
    %238 = vector.broadcast %237 : vector<1x4xf32> to vector<32x4xf32>
    %239 = arith.addf %235, %238 : vector<32x4xf32>
    %240 = vector.shape_cast %239 : vector<32x4xf32> to vector<2x16x4xf32>
    "tpu.trace_start"() <{level = 10 : i32, message = "bqd,bkd->bqk"}> : () -> ()
    %cst_165 = arith.constant dense<0.000000e+00> : vector<2x16x16xf32>
    %241 = tpu.matmul %224, %232, %cst_165 {dimension_numbers = #tpu.dot_dimension_numbers<[2], [2], [1], [1], [0, 0, 0, 1, 1, 1], [0], [0]>} : vector<2x16x4xf32>, vector<2x16x4xf32>, vector<2x16x16xf32> -> vector<2x16x16xf32>
    "tpu.trace_stop"() : () -> ()
    %cst_166 = arith.constant 5.000000e-01 : f32
    %242 = vector.broadcast %cst_166 : f32 to vector<2x16x16xf32>
    %243 = arith.mulf %241, %242 : vector<2x16x16xf32>
    %244 = vector.broadcast %11 : vector<1x1x16xf32> to vector<2x16x16xf32>
    %245 = arith.addf %243, %244 : vector<2x16x16xf32>
    %cst_167 = arith.constant dense<0xFF800000> : vector<2x16xf32>
    %246 = vector.multi_reduction <maximumf>, %245, %cst_167 [2] : vector<2x16x16xf32> to vector<2x16xf32>
    %247 = vector.shape_cast %246 : vector<2x16xf32> to vector<2x16x1xf32>
    %248 = vector.broadcast %247 : vector<2x16x1xf32> to vector<2x16x16xf32>
    %249 = arith.subf %245, %248 : vector<2x16x16xf32>
    %250 = math.exp %249 : vector<2x16x16xf32>
    %cst_168 = arith.constant dense<0.000000e+00> : vector<2x16xf32>
    %251 = vector.multi_reduction <add>, %250, %cst_168 [2] : vector<2x16x16xf32> to vector<2x16xf32>
    %252 = vector.shape_cast %251 : vector<2x16xf32> to vector<2x16x1xf32>
    %253 = vector.broadcast %252 : vector<2x16x1xf32> to vector<2x16x16xf32>
    %254 = arith.divf %250, %253 : vector<2x16x16xf32>
    "tpu.trace_start"() <{level = 10 : i32, message = "bqk,bkd->bqd"}> : () -> ()
    %cst_169 = arith.constant dense<0.000000e+00> : vector<2x16x4xf32>
    %255 = tpu.matmul %254, %240, %cst_169 {dimension_numbers = #tpu.dot_dimension_numbers<[2], [1], [1], [2], [0, 0, 0, 1, 1, 2], [0], [0]>} : vector<2x16x16xf32>, vector<2x16x4xf32>, vector<2x16x4xf32> -> vector<2x16x4xf32>
    "tpu.trace_stop"() : () -> ()
    %256 = arith.truncf %255 : vector<2x16x4xf32> to vector<2x16x4xbf16>
    %c0_170 = arith.constant 0 : index
    %c0_171 = arith.constant 0 : index
    %c20_172 = arith.constant 20 : index
    %257 = vector.load %arg23[%c0_170, %c0_171, %c20_172] : memref<2x16x32xbf16, #tpu.memory_space<vmem>>, vector<2x16x4xbf16>
    tpu.vector_store %arg23[%c0_170, %c0_171, %c20_172], %256 {strides = array<i32>} : memref<2x16x32xbf16, #tpu.memory_space<vmem>>, vector<2x16x4xbf16>,
    %c0_173 = arith.constant 0 : index
    %c0_174 = arith.constant 0 : index
    %c24 = arith.constant 24 : index
    %258 = vector.load %arg3[%c0_173, %c0_174, %c24] : memref<1x32x32xbf16, #tpu.memory_space<vmem>>, vector<1x32x4xbf16>
    %259 = vector.shape_cast %258 : vector<1x32x4xbf16> to vector<32x4xbf16>
    %cst_175 = arith.constant dense<0.000000e+00> : vector<32x4xf32>
    %260 = tpu.matmul %5, %259, %cst_175 {dimension_numbers = #tpu.dot_dimension_numbers<[1], [0], [0], [1], [0, 0, 1, 1], [], []>} : vector<32x32xbf16>, vector<32x4xbf16>, vector<32x4xf32> -> vector<32x4xf32>
    %c0_176 = arith.constant 0 : index
    %c0_177 = arith.constant 0 : index
    %c24_178 = arith.constant 24 : index
    %261 = vector.load %arg4[%c0_176, %c0_177, %c24_178] : memref<1x1x32xf32, #tpu.memory_space<vmem>>, vector<1x1x4xf32>
    %262 = vector.shape_cast %261 : vector<1x1x4xf32> to vector<1x4xf32>
    %263 = vector.broadcast %262 : vector<1x4xf32> to vector<32x4xf32>
    %264 = arith.addf %260, %263 : vector<32x4xf32>
    %265 = vector.shape_cast %264 : vector<32x4xf32> to vector<2x16x4xf32>
    %c0_179 = arith.constant 0 : index
    %c0_180 = arith.constant 0 : index
    %c24_181 = arith.constant 24 : index
    %266 = vector.load %arg5[%c0_179, %c0_180, %c24_181] : memref<1x32x32xbf16, #tpu.memory_space<vmem>>, vector<1x32x4xbf16>
    %267 = vector.shape_cast %266 : vector<1x32x4xbf16> to vector<32x4xbf16>
    %cst_182 = arith.constant dense<0.000000e+00> : vector<32x4xf32>
    %268 = tpu.matmul %5, %267, %cst_182 {dimension_numbers = #tpu.dot_dimension_numbers<[1], [0], [0], [1], [0, 0, 1, 1], [], []>} : vector<32x32xbf16>, vector<32x4xbf16>, vector<32x4xf32> -> vector<32x4xf32>
    %c0_183 = arith.constant 0 : index
    %c0_184 = arith.constant 0 : index
    %c24_185 = arith.constant 24 : index
    %269 = vector.load %arg6[%c0_183, %c0_184, %c24_185] : memref<1x1x32xf32, #tpu.memory_space<vmem>>, vector<1x1x4xf32>
    %270 = vector.shape_cast %269 : vector<1x1x4xf32> to vector<1x4xf32>
    %271 = vector.broadcast %270 : vector<1x4xf32> to vector<32x4xf32>
    %272 = arith.addf %268, %271 : vector<32x4xf32>
    %273 = vector.shape_cast %272 : vector<32x4xf32> to vector<2x16x4xf32>
    %c0_186 = arith.constant 0 : index
    %c0_187 = arith.constant 0 : index
    %c24_188 = arith.constant 24 : index
    %274 = vector.load %arg7[%c0_186, %c0_187, %c24_188] : memref<1x32x32xbf16, #tpu.memory_space<vmem>>, vector<1x32x4xbf16>
    %275 = vector.shape_cast %274 : vector<1x32x4xbf16> to vector<32x4xbf16>
    %cst_189 = arith.constant dense<0.000000e+00> : vector<32x4xf32>
    %276 = tpu.matmul %5, %275, %cst_189 {dimension_numbers = #tpu.dot_dimension_numbers<[1], [0], [0], [1], [0, 0, 1, 1], [], []>} : vector<32x32xbf16>, vector<32x4xbf16>, vector<32x4xf32> -> vector<32x4xf32>
    %c0_190 = arith.constant 0 : index
    %c0_191 = arith.constant 0 : index
    %c24_192 = arith.constant 24 : index
    %277 = vector.load %arg8[%c0_190, %c0_191, %c24_192] : memref<1x1x32xf32, #tpu.memory_space<vmem>>, vector<1x1x4xf32>
    %278 = vector.shape_cast %277 : vector<1x1x4xf32> to vector<1x4xf32>
    %279 = vector.broadcast %278 : vector<1x4xf32> to vector<32x4xf32>
    %280 = arith.addf %276, %279 : vector<32x4xf32>
    %281 = vector.shape_cast %280 : vector<32x4xf32> to vector<2x16x4xf32>
    "tpu.trace_start"() <{level = 10 : i32, message = "bqd,bkd->bqk"}> : () -> ()
    %cst_193 = arith.constant dense<0.000000e+00> : vector<2x16x16xf32>
    %282 = tpu.matmul %265, %273, %cst_193 {dimension_numbers = #tpu.dot_dimension_numbers<[2], [2], [1], [1], [0, 0, 0, 1, 1, 1], [0], [0]>} : vector<2x16x4xf32>, vector<2x16x4xf32>, vector<2x16x16xf32> -> vector<2x16x16xf32>
    "tpu.trace_stop"() : () -> ()
    %cst_194 = arith.constant 5.000000e-01 : f32
    %283 = vector.broadcast %cst_194 : f32 to vector<2x16x16xf32>
    %284 = arith.mulf %282, %283 : vector<2x16x16xf32>
    %285 = vector.broadcast %11 : vector<1x1x16xf32> to vector<2x16x16xf32>
    %286 = arith.addf %284, %285 : vector<2x16x16xf32>
    %cst_195 = arith.constant dense<0xFF800000> : vector<2x16xf32>
    %287 = vector.multi_reduction <maximumf>, %286, %cst_195 [2] : vector<2x16x16xf32> to vector<2x16xf32>
    %288 = vector.shape_cast %287 : vector<2x16xf32> to vector<2x16x1xf32>
    %289 = vector.broadcast %288 : vector<2x16x1xf32> to vector<2x16x16xf32>
    %290 = arith.subf %286, %289 : vector<2x16x16xf32>
    %291 = math.exp %290 : vector<2x16x16xf32>
    %cst_196 = arith.constant dense<0.000000e+00> : vector<2x16xf32>
    %292 = vector.multi_reduction <add>, %291, %cst_196 [2] : vector<2x16x16xf32> to vector<2x16xf32>
    %293 = vector.shape_cast %292 : vector<2x16xf32> to vector<2x16x1xf32>
    %294 = vector.broadcast %293 : vector<2x16x1xf32> to vector<2x16x16xf32>
    %295 = arith.divf %291, %294 : vector<2x16x16xf32>
    "tpu.trace_start"() <{level = 10 : i32, message = "bqk,bkd->bqd"}> : () -> ()
    %cst_197 = arith.constant dense<0.000000e+00> : vector<2x16x4xf32>
    %296 = tpu.matmul %295, %281, %cst_197 {dimension_numbers = #tpu.dot_dimension_numbers<[2], [1], [1], [2], [0, 0, 0, 1, 1, 2], [0], [0]>} : vector<2x16x16xf32>, vector<2x16x4xf32>, vector<2x16x4xf32> -> vector<2x16x4xf32>
    "tpu.trace_stop"() : () -> ()
    %297 = arith.truncf %296 : vector<2x16x4xf32> to vector<2x16x4xbf16>
    %c0_198 = arith.constant 0 : index
    %c0_199 = arith.constant 0 : index
    %c24_200 = arith.constant 24 : index
    %298 = vector.load %arg23[%c0_198, %c0_199, %c24_200] : memref<2x16x32xbf16, #tpu.memory_space<vmem>>, vector<2x16x4xbf16>
    tpu.vector_store %arg23[%c0_198, %c0_199, %c24_200], %297 {strides = array<i32>} : memref<2x16x32xbf16, #tpu.memory_space<vmem>>, vector<2x16x4xbf16>,
    %c0_201 = arith.constant 0 : index
    %c0_202 = arith.constant 0 : index
    %c28 = arith.constant 28 : index
    %299 = vector.load %arg3[%c0_201, %c0_202, %c28] : memref<1x32x32xbf16, #tpu.memory_space<vmem>>, vector<1x32x4xbf16>
    %300 = vector.shape_cast %299 : vector<1x32x4xbf16> to vector<32x4xbf16>
    %cst_203 = arith.constant dense<0.000000e+00> : vector<32x4xf32>
    %301 = tpu.matmul %5, %300, %cst_203 {dimension_numbers = #tpu.dot_dimension_numbers<[1], [0], [0], [1], [0, 0, 1, 1], [], []>} : vector<32x32xbf16>, vector<32x4xbf16>, vector<32x4xf32> -> vector<32x4xf32>
    %c0_204 = arith.constant 0 : index
    %c0_205 = arith.constant 0 : index
    %c28_206 = arith.constant 28 : index
    %302 = vector.load %arg4[%c0_204, %c0_205, %c28_206] : memref<1x1x32xf32, #tpu.memory_space<vmem>>, vector<1x1x4xf32>
    %303 = vector.shape_cast %302 : vector<1x1x4xf32> to vector<1x4xf32>
    %304 = vector.broadcast %303 : vector<1x4xf32> to vector<32x4xf32>
    %305 = arith.addf %301, %304 : vector<32x4xf32>
    %306 = vector.shape_cast %305 : vector<32x4xf32> to vector<2x16x4xf32>
    %c0_207 = arith.constant 0 : index
    %c0_208 = arith.constant 0 : index
    %c28_209 = arith.constant 28 : index
    %307 = vector.load %arg5[%c0_207, %c0_208, %c28_209] : memref<1x32x32xbf16, #tpu.memory_space<vmem>>, vector<1x32x4xbf16>
    %308 = vector.shape_cast %307 : vector<1x32x4xbf16> to vector<32x4xbf16>
    %cst_210 = arith.constant dense<0.000000e+00> : vector<32x4xf32>
    %309 = tpu.matmul %5, %308, %cst_210 {dimension_numbers = #tpu.dot_dimension_numbers<[1], [0], [0], [1], [0, 0, 1, 1], [], []>} : vector<32x32xbf16>, vector<32x4xbf16>, vector<32x4xf32> -> vector<32x4xf32>
    %c0_211 = arith.constant 0 : index
    %c0_212 = arith.constant 0 : index
    %c28_213 = arith.constant 28 : index
    %310 = vector.load %arg6[%c0_211, %c0_212, %c28_213] : memref<1x1x32xf32, #tpu.memory_space<vmem>>, vector<1x1x4xf32>
    %311 = vector.shape_cast %310 : vector<1x1x4xf32> to vector<1x4xf32>
    %312 = vector.broadcast %311 : vector<1x4xf32> to vector<32x4xf32>
    %313 = arith.addf %309, %312 : vector<32x4xf32>
    %314 = vector.shape_cast %313 : vector<32x4xf32> to vector<2x16x4xf32>
    %c0_214 = arith.constant 0 : index
    %c0_215 = arith.constant 0 : index
    %c28_216 = arith.constant 28 : index
    %315 = vector.load %arg7[%c0_214, %c0_215, %c28_216] : memref<1x32x32xbf16, #tpu.memory_space<vmem>>, vector<1x32x4xbf16>
    %316 = vector.shape_cast %315 : vector<1x32x4xbf16> to vector<32x4xbf16>
    %cst_217 = arith.constant dense<0.000000e+00> : vector<32x4xf32>
    %317 = tpu.matmul %5, %316, %cst_217 {dimension_numbers = #tpu.dot_dimension_numbers<[1], [0], [0], [1], [0, 0, 1, 1], [], []>} : vector<32x32xbf16>, vector<32x4xbf16>, vector<32x4xf32> -> vector<32x4xf32>
    %c0_218 = arith.constant 0 : index
    %c0_219 = arith.constant 0 : index
    %c28_220 = arith.constant 28 : index
    %318 = vector.load %arg8[%c0_218, %c0_219, %c28_220] : memref<1x1x32xf32, #tpu.memory_space<vmem>>, vector<1x1x4xf32>
    %319 = vector.shape_cast %318 : vector<1x1x4xf32> to vector<1x4xf32>
    %320 = vector.broadcast %319 : vector<1x4xf32> to vector<32x4xf32>
    %321 = arith.addf %317, %320 : vector<32x4xf32>
    %322 = vector.shape_cast %321 : vector<32x4xf32> to vector<2x16x4xf32>
    "tpu.trace_start"() <{level = 10 : i32, message = "bqd,bkd->bqk"}> : () -> ()
    %cst_221 = arith.constant dense<0.000000e+00> : vector<2x16x16xf32>
    %323 = tpu.matmul %306, %314, %cst_221 {dimension_numbers = #tpu.dot_dimension_numbers<[2], [2], [1], [1], [0, 0, 0, 1, 1, 1], [0], [0]>} : vector<2x16x4xf32>, vector<2x16x4xf32>, vector<2x16x16xf32> -> vector<2x16x16xf32>
    "tpu.trace_stop"() : () -> ()
    %cst_222 = arith.constant 5.000000e-01 : f32
    %324 = vector.broadcast %cst_222 : f32 to vector<2x16x16xf32>
    %325 = arith.mulf %323, %324 : vector<2x16x16xf32>
    %326 = vector.broadcast %11 : vector<1x1x16xf32> to vector<2x16x16xf32>
    %327 = arith.addf %325, %326 : vector<2x16x16xf32>
    %cst_223 = arith.constant dense<0xFF800000> : vector<2x16xf32>
    %328 = vector.multi_reduction <maximumf>, %327, %cst_223 [2] : vector<2x16x16xf32> to vector<2x16xf32>
    %329 = vector.shape_cast %328 : vector<2x16xf32> to vector<2x16x1xf32>
    %330 = vector.broadcast %329 : vector<2x16x1xf32> to vector<2x16x16xf32>
    %331 = arith.subf %327, %330 : vector<2x16x16xf32>
    %332 = math.exp %331 : vector<2x16x16xf32>
    %cst_224 = arith.constant dense<0.000000e+00> : vector<2x16xf32>
    %333 = vector.multi_reduction <add>, %332, %cst_224 [2] : vector<2x16x16xf32> to vector<2x16xf32>
    %334 = vector.shape_cast %333 : vector<2x16xf32> to vector<2x16x1xf32>
    %335 = vector.broadcast %334 : vector<2x16x1xf32> to vector<2x16x16xf32>
    %336 = arith.divf %332, %335 : vector<2x16x16xf32>
    "tpu.trace_start"() <{level = 10 : i32, message = "bqk,bkd->bqd"}> : () -> ()
    %cst_225 = arith.constant dense<0.000000e+00> : vector<2x16x4xf32>
    %337 = tpu.matmul %336, %322, %cst_225 {dimension_numbers = #tpu.dot_dimension_numbers<[2], [1], [1], [2], [0, 0, 0, 1, 1, 2], [0], [0]>} : vector<2x16x16xf32>, vector<2x16x4xf32>, vector<2x16x4xf32> -> vector<2x16x4xf32>
    "tpu.trace_stop"() : () -> ()
    %338 = arith.truncf %337 : vector<2x16x4xf32> to vector<2x16x4xbf16>
    %c0_226 = arith.constant 0 : index
    %c0_227 = arith.constant 0 : index
    %c28_228 = arith.constant 28 : index
    %339 = vector.load %arg23[%c0_226, %c0_227, %c28_228] : memref<2x16x32xbf16, #tpu.memory_space<vmem>>, vector<2x16x4xbf16>
    tpu.vector_store %arg23[%c0_226, %c0_227, %c28_228], %338 {strides = array<i32>} : memref<2x16x32xbf16, #tpu.memory_space<vmem>>, vector<2x16x4xbf16>,
    %c0_229 = arith.constant 0 : index
    %c0_230 = arith.constant 0 : index
    %c0_231 = arith.constant 0 : index
    %340 = vector.load %arg23[%c0_229, %c0_230, %c0_231] : memref<2x16x32xbf16, #tpu.memory_space<vmem>>, vector<2x16x32xbf16>
    %341 = vector.shape_cast %340 : vector<2x16x32xbf16> to vector<32x32xbf16>
    %c0_232 = arith.constant 0 : index
    %c0_233 = arith.constant 0 : index
    %c0_234 = arith.constant 0 : index
    %342 = vector.load %arg9[%c0_232, %c0_233, %c0_234] : memref<1x32x32xbf16, #tpu.memory_space<vmem>>, vector<1x32x32xbf16>
    %343 = vector.shape_cast %342 : vector<1x32x32xbf16> to vector<32x32xbf16>
    %cst_235 = arith.constant dense<0.000000e+00> : vector<32x32xf32>
    %344 = tpu.matmul %341, %343, %cst_235 {dimension_numbers = #tpu.dot_dimension_numbers<[1], [0], [0], [1], [0, 0, 1, 1], [], []>} : vector<32x32xbf16>, vector<32x32xbf16>, vector<32x32xf32> -> vector<32x32xf32>
    %c0_236 = arith.constant 0 : index
    %c0_237 = arith.constant 0 : index
    %c0_238 = arith.constant 0 : index
    %345 = vector.load %arg10[%c0_236, %c0_237, %c0_238] : memref<1x1x32xf32, #tpu.memory_space<vmem>>, vector<1x1x32xf32>
    %346 = vector.shape_cast %345 : vector<1x1x32xf32> to vector<1x32xf32>
    %347 = vector.broadcast %346 : vector<1x32xf32> to vector<32x32xf32>
    %348 = arith.addf %344, %347 : vector<32x32xf32>
    %349 = arith.addf %4, %348 : vector<32x32xf32>
    %c0_239 = arith.constant 0 : index
    %c0_240 = arith.constant 0 : index
    %c0_241 = arith.constant 0 : index
    %350 = vector.load %arg15[%c0_239, %c0_240, %c0_241] : memref<1x1x32xf32, #tpu.memory_space<vmem>>, vector<1x1x32xf32>
    %351 = vector.shape_cast %350 : vector<1x1x32xf32> to vector<1x32xf32>
    %c0_242 = arith.constant 0 : index
    %c0_243 = arith.constant 0 : index
    %c0_244 = arith.constant 0 : index
    %352 = vector.load %arg16[%c0_242, %c0_243, %c0_244] : memref<1x1x32xf32, #tpu.memory_space<vmem>>, vector<1x1x32xf32>
    %353 = vector.shape_cast %352 : vector<1x1x32xf32> to vector<1x32xf32>
    %cst_245 = arith.constant dense<0.000000e+00> : vector<32xf32>
    %354 = vector.multi_reduction <add>, %349, %cst_245 [1] : vector<32x32xf32> to vector<32xf32>
    %355 = vector.shape_cast %354 : vector<32xf32> to vector<32x1xf32>
    %cst_246 = arith.constant 3.200000e+01 : f32
    %356 = vector.broadcast %cst_246 : f32 to vector<32x1xf32>
    %357 = arith.divf %355, %356 : vector<32x1xf32>
    %358 = vector.broadcast %357 : vector<32x1xf32> to vector<32x32xf32>
    %359 = arith.subf %349, %358 : vector<32x32xf32>
    %360 = arith.mulf %359, %359 : vector<32x32xf32>
    %cst_247 = arith.constant dense<0.000000e+00> : vector<32xf32>
    %361 = vector.multi_reduction <add>, %360, %cst_247 [1] : vector<32x32xf32> to vector<32xf32>
    %362 = vector.shape_cast %361 : vector<32xf32> to vector<32x1xf32>
    %cst_248 = arith.constant 3.200000e+01 : f32
    %363 = vector.broadcast %cst_248 : f32 to vector<32x1xf32>
    %364 = arith.divf %362, %363 : vector<32x1xf32>
    %cst_249 = arith.constant 9.99999974E-6 : f32
    %365 = vector.broadcast %cst_249 : f32 to vector<32x1xf32>
    %366 = arith.addf %364, %365 : vector<32x1xf32>
    %367 = math.rsqrt %366 : vector<32x1xf32>
    %368 = vector.broadcast %367 : vector<32x1xf32> to vector<32x32xf32>
    %369 = arith.mulf %359, %368 : vector<32x32xf32>
    %370 = vector.broadcast %351 : vector<1x32xf32> to vector<32x32xf32>
    %371 = arith.mulf %369, %370 : vector<32x32xf32>
    %372 = vector.broadcast %353 : vector<1x32xf32> to vector<32x32xf32>
    %373 = arith.addf %371, %372 : vector<32x32xf32>
    %374 = arith.truncf %373 : vector<32x32xf32> to vector<32x32xbf16>
    %c0_250 = arith.constant 0 : index
    %c0_251 = arith.constant 0 : index
    %c0_252 = arith.constant 0 : index
    %375 = vector.load %arg11[%c0_250, %c0_251, %c0_252] : memref<1x32x64xbf16, #tpu.memory_space<vmem>>, vector<1x32x64xbf16>
    %376 = vector.shape_cast %375 : vector<1x32x64xbf16> to vector<32x64xbf16>
    %cst_253 = arith.constant dense<0.000000e+00> : vector<32x64xf32>
    %377 = tpu.matmul %374, %376, %cst_253 {dimension_numbers = #tpu.dot_dimension_numbers<[1], [0], [0], [1], [0, 0, 1, 1], [], []>} : vector<32x32xbf16>, vector<32x64xbf16>, vector<32x64xf32> -> vector<32x64xf32>
    %c0_254 = arith.constant 0 : index
    %c0_255 = arith.constant 0 : index
    %c0_256 = arith.constant 0 : index
    %378 = vector.load %arg12[%c0_254, %c0_255, %c0_256] : memref<1x1x64xf32, #tpu.memory_space<vmem>>, vector<1x1x64xf32>
    %379 = vector.shape_cast %378 : vector<1x1x64xf32> to vector<1x64xf32>
    %380 = vector.broadcast %379 : vector<1x64xf32> to vector<32x64xf32>
    %381 = arith.addf %377, %380 : vector<32x64xf32>
    %cst_257 = arith.constant 0.000000e+00 : f32
    %382 = vector.broadcast %cst_257 : f32 to vector<32x64xf32>
    %383 = arith.maximumf %381, %382 : vector<32x64xf32>
    %384 = arith.truncf %383 : vector<32x64xf32> to vector<32x64xbf16>
    %c0_258 = arith.constant 0 : index
    %c0_259 = arith.constant 0 : index
    %c0_260 = arith.constant 0 : index
    %385 = vector.load %arg13[%c0_258, %c0_259, %c0_260] : memref<1x64x32xbf16, #tpu.memory_space<vmem>>, vector<1x64x32xbf16>
    %386 = vector.shape_cast %385 : vector<1x64x32xbf16> to vector<64x32xbf16>
    %cst_261 = arith.constant dense<0.000000e+00> : vector<32x32xf32>
    %387 = tpu.matmul %384, %386, %cst_261 {dimension_numbers = #tpu.dot_dimension_numbers<[1], [0], [0], [1], [0, 0, 1, 1], [], []>} : vector<32x64xbf16>, vector<64x32xbf16>, vector<32x32xf32> -> vector<32x32xf32>
    %c0_262 = arith.constant 0 : index
    %c0_263 = arith.constant 0 : index
    %c0_264 = arith.constant 0 : index
    %388 = vector.load %arg14[%c0_262, %c0_263, %c0_264] : memref<1x1x32xf32, #tpu.memory_space<vmem>>, vector<1x1x32xf32>
    %389 = vector.shape_cast %388 : vector<1x1x32xf32> to vector<1x32xf32>
    %390 = vector.broadcast %389 : vector<1x32xf32> to vector<32x32xf32>
    %391 = arith.addf %387, %390 : vector<32x32xf32>
    %392 = arith.addf %373, %391 : vector<32x32xf32>
    %c0_265 = arith.constant 0 : index
    %c0_266 = arith.constant 0 : index
    %c0_267 = arith.constant 0 : index
    %393 = vector.load %arg17[%c0_265, %c0_266, %c0_267] : memref<1x1x32xf32, #tpu.memory_space<vmem>>, vector<1x1x32xf32>
    %394 = vector.shape_cast %393 : vector<1x1x32xf32> to vector<1x32xf32>
    %c0_268 = arith.constant 0 : index
    %c0_269 = arith.constant 0 : index
    %c0_270 = arith.constant 0 : index
    %395 = vector.load %arg18[%c0_268, %c0_269, %c0_270] : memref<1x1x32xf32, #tpu.memory_space<vmem>>, vector<1x1x32xf32>
    %396 = vector.shape_cast %395 : vector<1x1x32xf32> to vector<1x32xf32>
    %cst_271 = arith.constant dense<0.000000e+00> : vector<32xf32>
    %397 = vector.multi_reduction <add>, %392, %cst_271 [1] : vector<32x32xf32> to vector<32xf32>
    %398 = vector.shape_cast %397 : vector<32xf32> to vector<32x1xf32>
    %cst_272 = arith.constant 3.200000e+01 : f32
    %399 = vector.broadcast %cst_272 : f32 to vector<32x1xf32>
    %400 = arith.divf %398, %399 : vector<32x1xf32>
    %401 = vector.broadcast %400 : vector<32x1xf32> to vector<32x32xf32>
    %402 = arith.subf %392, %401 : vector<32x32xf32>
    %403 = arith.mulf %402, %402 : vector<32x32xf32>
    %cst_273 = arith.constant dense<0.000000e+00> : vector<32xf32>
    %404 = vector.multi_reduction <add>, %403, %cst_273 [1] : vector<32x32xf32> to vector<32xf32>
    %405 = vector.shape_cast %404 : vector<32xf32> to vector<32x1xf32>
    %cst_274 = arith.constant 3.200000e+01 : f32
    %406 = vector.broadcast %cst_274 : f32 to vector<32x1xf32>
    %407 = arith.divf %405, %406 : vector<32x1xf32>
    %cst_275 = arith.constant 9.99999974E-6 : f32
    %408 = vector.broadcast %cst_275 : f32 to vector<32x1xf32>
    %409 = arith.addf %407, %408 : vector<32x1xf32>
    %410 = math.rsqrt %409 : vector<32x1xf32>
    %411 = vector.broadcast %410 : vector<32x1xf32> to vector<32x32xf32>
    %412 = arith.mulf %402, %411 : vector<32x32xf32>
    %413 = vector.broadcast %394 : vector<1x32xf32> to vector<32x32xf32>
    %414 = arith.mulf %412, %413 : vector<32x32xf32>
    %415 = vector.broadcast %396 : vector<1x32xf32> to vector<32x32xf32>
    %416 = arith.addf %414, %415 : vector<32x32xf32>
    %417 = vector.shape_cast %416 : vector<32x32xf32> to vector<2x16x32xf32>
    %c0_276 = arith.constant 0 : index
    %c0_277 = arith.constant 0 : index
    %c0_278 = arith.constant 0 : index
    %418 = vector.load %arg22[%c0_276, %c0_277, %c0_278] : memref<2x16x32xf32, #tpu.memory_space<vmem>>, vector<2x16x32xf32>
    tpu.vector_store %arg22[%c0_276, %c0_277, %c0_278], %417 {strides = array<i32>} : memref<2x16x32xf32, #tpu.memory_space<vmem>>, vector<2x16x32xf32>,
    %c1_i32 = arith.constant 1 : i32
    %419 = arith.cmpi eq, %arg1, %c1_i32 : i32
    %420 = arith.extui %419 : i1 to i32
    %c0_i32_279 = arith.constant 0 : i32
    %421 = arith.cmpi ne, %420, %c0_i32_279 : i32
    scf.if %421 {
      %c0_280 = arith.constant 0 : index
      %c0_281 = arith.constant 0 : index
      %c0_282 = arith.constant 0 : index
      %422 = vector.load %arg22[%c0_280, %c0_281, %c0_282] : memref<2x16x32xf32, #tpu.memory_space<vmem>>, vector<2x1x32xf32>
      %423 = vector.shape_cast %422 : vector<2x1x32xf32> to vector<2x32xf32>
      %c0_283 = arith.constant 0 : index
      %c0_284 = arith.constant 0 : index
      %424 = vector.load %arg19[%c0_283, %c0_284] : memref<1x32xf32, #tpu.memory_space<vmem>>, vector<1x32xf32>
      %c0_285 = arith.constant 0 : index
      %c0_286 = arith.constant 0 : index
      %425 = vector.load %arg20[%c0_285, %c0_286] : memref<1x32xf32, #tpu.memory_space<vmem>>, vector<1x32xf32>
      %cst_287 = arith.constant dense<0.000000e+00> : vector<2xf32>
      %426 = vector.multi_reduction <add>, %423, %cst_287 [1] : vector<2x32xf32> to vector<2xf32>
      %427 = vector.shape_cast %426 : vector<2xf32> to vector<2x1xf32>
      %cst_288 = arith.constant 3.200000e+01 : f32
      %428 = vector.broadcast %cst_288 : f32 to vector<2x1xf32>
      %429 = arith.divf %427, %428 : vector<2x1xf32>
      %430 = vector.broadcast %429 : vector<2x1xf32> to vector<2x32xf32>
      %431 = arith.subf %423, %430 : vector<2x32xf32>
      %432 = arith.mulf %431, %431 : vector<2x32xf32>
      %cst_289 = arith.constant dense<0.000000e+00> : vector<2xf32>
      %433 = vector.multi_reduction <add>, %432, %cst_289 [1] : vector<2x32xf32> to vector<2xf32>
      %434 = vector.shape_cast %433 : vector<2xf32> to vector<2x1xf32>
      %cst_290 = arith.constant 3.200000e+01 : f32
      %435 = vector.broadcast %cst_290 : f32 to vector<2x1xf32>
      %436 = arith.divf %434, %435 : vector<2x1xf32>
      %cst_291 = arith.constant 9.99999974E-6 : f32
      %437 = vector.broadcast %cst_291 : f32 to vector<2x1xf32>
      %438 = arith.addf %436, %437 : vector<2x1xf32>
      %439 = math.rsqrt %438 : vector<2x1xf32>
      %440 = vector.broadcast %439 : vector<2x1xf32> to vector<2x32xf32>
      %441 = arith.mulf %431, %440 : vector<2x32xf32>
      %442 = vector.broadcast %424 : vector<1x32xf32> to vector<2x32xf32>
      %443 = arith.mulf %441, %442 : vector<2x32xf32>
      %444 = vector.broadcast %425 : vector<1x32xf32> to vector<2x32xf32>
      %445 = arith.addf %443, %444 : vector<2x32xf32>
      %c0_292 = arith.constant 0 : index
      %c0_293 = arith.constant 0 : index
      %446 = vector.load %arg21[%c0_292, %c0_293] : memref<2x32xf32, #tpu.memory_space<vmem>>, vector<2x32xf32>
      tpu.vector_store %arg21[%c0_292, %c0_293], %445 {strides = array<i32>} : memref<2x32xf32, #tpu.memory_space<vmem>>, vector<2x32xf32>,
    } else {
    }
    return
  }
  func.func @transform_0(%arg0: i32, %arg1: i32) -> (i32, i32, i32) {
    %c0_i32 = arith.constant 0 : i32
    %c0_i32_0 = arith.constant 0 : i32
    %c0_i32_1 = arith.constant 0 : i32
    return %arg0, %c0_i32, %c0_i32_0 : i32, i32, i32
  }
  func.func @transform_1(%arg0: i32, %arg1: i32) -> (i32, i32, i32) {
    %c0_i32 = arith.constant 0 : i32
    %c0_i32_0 = arith.constant 0 : i32
    %c0_i32_1 = arith.constant 0 : i32
    return %arg1, %c0_i32, %c0_i32_0 : i32, i32, i32
  }
  func.func @transform_2(%arg0: i32, %arg1: i32) -> (i32, i32, i32) {
    %c0_i32 = arith.constant 0 : i32
    %c0_i32_0 = arith.constant 0 : i32
    %c0_i32_1 = arith.constant 0 : i32
    return %arg1, %c0_i32, %c0_i32_0 : i32, i32, i32
  }
  func.func @transform_3(%arg0: i32, %arg1: i32) -> (i32, i32, i32) {
    %c0_i32 = arith.constant 0 : i32
    %c0_i32_0 = arith.constant 0 : i32
    %c0_i32_1 = arith.constant 0 : i32
    return %arg1, %c0_i32, %c0_i32_0 : i32, i32, i32
  }
  func.func @transform_4(%arg0: i32, %arg1: i32) -> (i32, i32, i32) {
    %c0_i32 = arith.constant 0 : i32
    %c0_i32_0 = arith.constant 0 : i32
    %c0_i32_1 = arith.constant 0 : i32
    return %arg1, %c0_i32, %c0_i32_0 : i32, i32, i32
  }
  func.func @transform_5(%arg0: i32, %arg1: i32) -> (i32, i32, i32) {
    %c0_i32 = arith.constant 0 : i32
    %c0_i32_0 = arith.constant 0 : i32
    %c0_i32_1 = arith.constant 0 : i32
    return %arg1, %c0_i32, %c0_i32_0 : i32, i32, i32
  }
  func.func @transform_6(%arg0: i32, %arg1: i32) -> (i32, i32, i32) {
    %c0_i32 = arith.constant 0 : i32
    %c0_i32_0 = arith.constant 0 : i32
    %c0_i32_1 = arith.constant 0 : i32
    return %arg1, %c0_i32, %c0_i32_0 : i32, i32, i32
  }
  func.func @transform_7(%arg0: i32, %arg1: i32) -> (i32, i32, i32) {
    %c0_i32 = arith.constant 0 : i32
    %c0_i32_0 = arith.constant 0 : i32
    %c0_i32_1 = arith.constant 0 : i32
    return %arg1, %c0_i32, %c0_i32_0 : i32, i32, i32
  }
  func.func @transform_8(%arg0: i32, %arg1: i32) -> (i32, i32, i32) {
    %c0_i32 = arith.constant 0 : i32
    %c0_i32_0 = arith.constant 0 : i32
    %c0_i32_1 = arith.constant 0 : i32
    return %arg1, %c0_i32, %c0_i32_0 : i32, i32, i32
  }
  func.func @transform_9(%arg0: i32, %arg1: i32) -> (i32, i32, i32) {
    %c0_i32 = arith.constant 0 : i32
    %c0_i32_0 = arith.constant 0 : i32
    %c0_i32_1 = arith.constant 0 : i32
    return %arg1, %c0_i32, %c0_i32_0 : i32, i32, i32
  }
  func.func @transform_10(%arg0: i32, %arg1: i32) -> (i32, i32, i32) {
    %c0_i32 = arith.constant 0 : i32
    %c0_i32_0 = arith.constant 0 : i32
    %c0_i32_1 = arith.constant 0 : i32
    return %arg1, %c0_i32, %c0_i32_0 : i32, i32, i32
  }
  func.func @transform_11(%arg0: i32, %arg1: i32) -> (i32, i32, i32) {
    %c0_i32 = arith.constant 0 : i32
    %c0_i32_0 = arith.constant 0 : i32
    %c0_i32_1 = arith.constant 0 : i32
    return %arg1, %c0_i32, %c0_i32_0 : i32, i32, i32
  }
  func.func @transform_12(%arg0: i32, %arg1: i32) -> (i32, i32, i32) {
    %c0_i32 = arith.constant 0 : i32
    %c0_i32_0 = arith.constant 0 : i32
    %c0_i32_1 = arith.constant 0 : i32
    return %arg1, %c0_i32, %c0_i32_0 : i32, i32, i32
  }
  func.func @transform_13(%arg0: i32, %arg1: i32) -> (i32, i32, i32) {
    %c0_i32 = arith.constant 0 : i32
    %c0_i32_0 = arith.constant 0 : i32
    %c0_i32_1 = arith.constant 0 : i32
    return %arg1, %c0_i32, %c0_i32_0 : i32, i32, i32
  }
  func.func @transform_14(%arg0: i32, %arg1: i32) -> (i32, i32, i32) {
    %c0_i32 = arith.constant 0 : i32
    %c0_i32_0 = arith.constant 0 : i32
    %c0_i32_1 = arith.constant 0 : i32
    return %arg1, %c0_i32, %c0_i32_0 : i32, i32, i32
  }
  func.func @transform_15(%arg0: i32, %arg1: i32) -> (i32, i32, i32) {
    %c0_i32 = arith.constant 0 : i32
    %c0_i32_0 = arith.constant 0 : i32
    %c0_i32_1 = arith.constant 0 : i32
    return %arg1, %c0_i32, %c0_i32_0 : i32, i32, i32
  }
  func.func @transform_16(%arg0: i32, %arg1: i32) -> (i32, i32, i32) {
    %c0_i32 = arith.constant 0 : i32
    %c0_i32_0 = arith.constant 0 : i32
    %c0_i32_1 = arith.constant 0 : i32
    return %arg1, %c0_i32, %c0_i32_0 : i32, i32, i32
  }
  func.func @transform_17(%arg0: i32, %arg1: i32) -> (i32, i32) {
    %c0_i32 = arith.constant 0 : i32
    %c0_i32_0 = arith.constant 0 : i32
    %c0_i32_1 = arith.constant 0 : i32
    return %c0_i32, %c0_i32_0 : i32, i32
  }
  func.func @transform_18(%arg0: i32, %arg1: i32) -> (i32, i32) {
    %c0_i32 = arith.constant 0 : i32
    %c0_i32_0 = arith.constant 0 : i32
    %c0_i32_1 = arith.constant 0 : i32
    return %c0_i32, %c0_i32_0 : i32, i32
  }
  func.func @transform_19(%arg0: i32, %arg1: i32) -> (i32, i32) {
    %c0_i32 = arith.constant 0 : i32
    %c0_i32_0 = arith.constant 0 : i32
    return %arg0, %c0_i32 : i32, i32
  }
}

</mosaic_0001>

<bundles_post_ra>
// kernel: tpu_custom_call.1
= control target key start
LH: loop header
LB: loop body
LE: loop exit
PB: predicated region body
PF: predicated region fallthrough
CT: control target
= control target key end

     0   :  { %s9660_s0 = inlined_call_operand.vmem [shape: f32[2,16,32], index: 0, kind: input, shape index: {}]   ;;  %s9661_s1 = inlined_call_operand.vmem [shape: bf16[2,32,32], index: 1, kind: input, shape index: {}]   ;;  %s9662_s2 = inlined_call_operand.vmem [shape: f32[2,1,32], index: 2, kind: input, shape index: {}]   ;;  %s9663_s3 = inlined_call_operand.vmem [shape: bf16[2,32,32], index: 3, kind: input, shape index: {}]   ;;  %s9664_s4 = inlined_call_operand.vmem [shape: f32[2,1,32], index: 4, kind: input, shape index: {}]   ;;  %s9665_s5 = inlined_call_operand.hbm [shape: bf16[2,32,32], index: 5, kind: input, shape index: {}]   ;;  %s9666_s6 = inlined_call_operand.vmem [shape: f32[2,1,32], index: 6, kind: input, shape index: {}]   ;;  %s9667_s7 = inlined_call_operand.hbm [shape: bf16[2,32,32], index: 7, kind: input, shape index: {}]   ;;  %s9668_s8 = inlined_call_operand.vmem [shape: f32[2,1,32], index: 8, kind: input, shape index: {}]   ;;  %s9669_s9 = inlined_call_operand.hbm [shape: bf16[2,32,64], index: 9, kind: input, shape index: {}]   ;;  %s9670_s10 = inlined_call_operand.hbm [shape: f32[2,1,64], index: 10, kind: input, shape index: {}]   ;;  %s9671_s11 = inlined_call_operand.vmem [shape: bf16[2,64,32], index: 11, kind: input, shape index: {}]   ;;  %s9672_s12 = inlined_call_operand.vmem [shape: f32[2,1,32], index: 12, kind: input, shape index: {}]   ;;  %s9673_s13 = inlined_call_operand.vmem [shape: f32[2,1,32], index: 13, kind: input, shape index: {}]   ;;  %s9674_s14 = inlined_call_operand.vmem [shape: f32[2,1,32], index: 14, kind: input, shape index: {}]   ;;  %s9675_s15 = inlined_call_operand.vmem [shape: f32[2,1,32], index: 15, kind: input, shape index: {}]   ;;  %s9676_s16 = inlined_call_operand.vmem [shape: f32[2,1,32], index: 16, kind: input, shape index: {}]   ;;  %s9677_s17 = inlined_call_operand.vmem [shape: f32[1,32], index: 17, kind: input, shape index: {}]   ;;  %s9678_s18 = inlined_call_operand.vmem [shape: f32[1,32], index: 18, kind: input, shape index: {}]   ;;  %s9679_s19 = inlined_call_operand.hbm [shape: f32[2,32], index: 19, kind: output, shape index: {}]  }
   0x1   :  { %9696 = sst [smem:[#allocation25_spill]] %s9660_s0 }
   0x2   :  { %9697 = sst [smem:[#allocation26_spill]] %s9661_s1 }
   0x3   :  { %9698 = sst [smem:[#allocation27_spill]] %s9662_s2 }
   0x4   :  { %9699 = sst [smem:[#allocation28_spill]] %s9663_s3 }
   0x5   :  { %9700 = sst [smem:[#allocation29_spill]] %s9664_s4 }
   0x6   :  { %9701 = sst [smem:[#allocation30_spill]] %s9665_s5 }
   0x7   :  { %9702 = sst [smem:[#allocation31_spill]] %s9666_s6 }
   0x8   :  { %9703 = sst [smem:[#allocation32_spill]] %s9667_s7 }
   0x9   :  { %9704 = sst [smem:[#allocation33_spill]] %s9668_s8 }
   0xa   :  { %9705 = sst [smem:[#allocation34_spill]] %s9669_s9 }
   0xb   :  { %9706 = sst [smem:[#allocation35_spill]] %s9670_s10 }
   0xc   :  { %9707 = sst [smem:[#allocation36_spill]] %s9673_s13 }
   0xd   :  { %9708 = sst [smem:[#allocation37_spill]] %s9674_s14 }
   0xe   :  { %9709 = sst [smem:[#allocation38_spill]] %s9675_s15 }
   0xf   :  { %9710 = sst [smem:[#allocation39_spill]] %s9676_s16 }
  0x10   :  { %9711 = sst [smem:[#allocation40_spill]] %s9677_s17 }
  0x11   :  { %9712 = sst [smem:[#allocation41_spill]] %s9678_s18 }
  0x12   :  { %9713 = sst [smem:[#allocation42_spill]] %s9679_s19 }
  0x13   :  { %24 = vsyncpa [#allocation5], 0 }
  0x14   :  { %26 = vsyncpa [#allocation5 + $0x1], 0 }
  0x15   :  { %27 = vsyncpa [#allocation8], 0 }
  0x16   :  { %29 = vsyncpa [#allocation8 + $0x1], 0 }
  0x17   :  { %30 = vsyncpa [#allocation11], 0 }
  0x18   :  { %32 = vsyncpa [#allocation11 + $0x1], 0 }
  0x19   :  { %33 = vsyncpa [#allocation6], 0  ;;  %s8536_s0 = smov 0   ;;  %s8538_s30 = smov 0  }
  0x1a   :  { %s8540_s20 = smov 0   ;;  %s8542_s21 = smov 0  }
  0x1b   :  { %s8544_s1 = smov 0   ;;  %s8546_s22 = smov 0  }
  0x1c LB: > { %9714 = sst [smem:[#allocation17_spill]] %s8396_s30  ;;  %s8565_s2 = sadd.s32 4294967295, %s8412_s22   ;;  %s8412_s22 = sphi %s8546_s22, %s39_s22   ;;  %s8408_s1 = sphi %s8544_s1, %s9771_s1   ;;  %s8404_s21 = sphi %s8542_s21, %s9770_s21   ;;  %s8400_s20 = sphi %s8540_s20, %s9769_s20   ;;  %s8396_s30 = sphi %s8538_s30, %s9768_s30   ;;  %s8392_s0 = sphi %s8536_s0, %s9767_s0  }
  0x1d   : > { %9715 = sst [smem:[#allocation18_spill]] %s8400_s20  ;;  %s48_s23 = sadd.s32 1, %s8408_s1 }
  0x1e   : > { %9716 = sst [smem:[#allocation19_spill]] %s8408_s1  ;;  %p49_p0 = scmp.ge.s32.totalorder %s48_s23, 2 }
  0x1f   : > { %9717 = sst [smem:[#allocation20_spill]] %s8412_s22  ;;  %s188_s24 = sadd.s32 1, %s8400_s20 }
  0x20   : > { %9718 = sst [smem:[#allocation21_spill]] %s8565_s2  ;;  %p195_p1 = scmp.ne.s32.totalorder %s8400_s20, %s8396_s30 }
  0x21   : > { %p196_p2 = scmp.eq.s32.totalorder %s8412_s22, 0  ;;  %s9773_s23 = smov (%p49_p0, %s48_s23), 0 }
  0x22   : > { %9719 = sst [smem:[#allocation22_spill]] %s9773_s23  ;;  %p201_p4 = scmp.ne.s32.totalorder %s8396_s30, %s8392_s0 }
  0x23   : > { %p197_p3 = por %p196_p2, %p195_p1  ;;  %s185_s25 = ssub.s32 %s8408_s1, %s9773_s23 }
  0x24   : > { %p202_p5 = scmp.eq.s32.totalorder %s8565_s2, 0  ;;  %p186_p6 = scmp.eq.s32.totalorder %s185_s25, 0 }
  0x25   : > { %p7929_p8 = scmp.lt.s32.totalorder %s8412_s22, 2  ;;  %s8587_s27 = sand.u32 1, %s8400_s20  }
  0x26   : > { %p8578_p7 = por %p202_p5, %p201_p4  ;;  %s8590_s28 = sshll.u32 %s8408_s1, 8 }
  0x27   : > { %s8584_s26 = scalar_select %p186_p6, %s8400_s20, %s188_s24  }
  0x28   : > { %s9720_s3 = scalar_select %p8578_p7, 1, 0 }
  0x29   : > { %9721 = sst [smem:[#allocation23_spill]] %s8584_s26  ;;  %s8593_s29 = sshll.u32 %s8587_s27, 4 }
  0x2a   : > { %p8595_p9 = pnand %p7929_p8, %p197_p3  ;;  %s650_s25 = sand.u32 1, %s8412_s22  }
  0x2b   : > { %s9723_s7 = sld [smem:[#allocation32_spill]]  ;;  %s654_s26 = scalar_lea.vmem [#allocation7], %s8593_s29 }
  0x2c   : > { %s9722_s0 = scalar_select %p8595_p9, 1, 0 }
  0x2d   : > { %s661_s20 = sshll.u32 %s654_s26, 4  ;;  %s8610_s18 = scalar_lea.sflag [#allocation8], %s650_s25  ;;  %s8607_s20 = int_to_ptr.vmem [resolvable:$true] %s661_s20 }
  0x2e   : > { %p8616_p12 = pneg %p8595_p9 }
  0x31   : > { %s8604_s24 = scalar_lea.hbm %s9723_s7, %s8590_s28  ;;  %s8209_s26 = scalar_lea.hbm %s9723_s7, 512 }
  0x32   : > { %s8204_s17 = scalar_lea.hbm %s8604_s24, 256  ;;  %p8210_p1 = scmp.lt.u32.totalorder %s8604_s24, %s9723_s7 }
  0x33   : > { %p8205_p11 = scmp.ne.s32.totalorder %s8604_s24, %s8204_s17  ;;  %p8211_p2 = scmp.lt.u32.totalorder %s8209_s26, %s8204_s17 }
  0x34   : > { %p8213_p4 = scmp.lt.u32.totalorder %s8204_s17, %s8604_s24 }
  0x35   : > { %p8207_p13 = pnand %p8616_p12, %p8205_p11  ;;  %p8212_p3 = por %p8211_p2, %p8210_p1 }
  0x37   : > { %p8208_p0 = pneg %p8207_p13  ;;  %p8214_p5 = por %p8213_p4, %p8212_p3 }
  0x39   : > { %p8215_p6 = pnand %p8214_p5, %p8208_p0 }
  0x3b   : > { %8218 = shalt.err (!%p8215_p6)
}
  0x3c   : > { %s8219_s25 = scalar_lea.vmem %s8607_s20, 256  ;;  %s8414_s19 = smov [#allocation7]  }
  0x3d   : > { %p8220_p8 = scmp.ne.s32.totalorder %s8607_s20, %s8219_s25  ;;  %s8224_s23 = sshll.u32 %s8414_s19, 4  ;;  %s8225_s23 = int_to_ptr.vmem [resolvable:$false] %s8224_s23 }
  0x3e   : > { %s8226_s14 = scalar_lea.vmem %s8225_s23, 512  ;;  %p8227_p10 = scmp.lt.s32.totalorder %s8607_s20, %s8225_s23 }
  0x3f   : > { %p8222_p11 = pnand %p8220_p8, %p8616_p12  ;;  %p8228_p7 = scmp.lt.s32.totalorder %s8226_s14, %s8219_s25 }
  0x41   : > { %p8223_p13 = pneg %p8222_p11  ;;  %p8229_p1 = por %p8228_p7, %p8227_p10 }
  0x43   : > { %p8230_p2 = pnand %p8229_p1, %p8223_p13 }
  0x45   : > { %8233 = shalt.err (!%p8230_p2)
}
  0x46   : > { %s9685_s15 = smov 64   ;;  %s9687_s17 = smov 4  }
  0x47   : > { %7922 = dma.hbm_to_vmem [thread:$0]  (!%p8595_p9), %s8604_s24, 256, %s8607_s20, %s8610_s18, %s9685_s15, %s9685_s15, %s9687_s17  }
  0x48   : > { %p751_p7 = scmp.lt.s32.totalorder %s8412_s22, 3  ;;  %p9725_p10 = scmp.ge.s32.totalorder %s8412_s22, 1 }
  0x49   : > { %s9727_s5 = sld [smem:[#allocation30_spill]]  ;;  %s627_s14 = scalar_lea.vmem [#allocation4], %s8593_s29 }
  0x4a   : > { %p8646_p0 = pnand %p9725_p10, %p751_p7  ;;  %s634_s7 = sshll.u32 %s627_s14, 4  ;;  %s8657_s7 = int_to_ptr.vmem [resolvable:$true] %s634_s7 }
  0x4b   : > { %s624_s20 = scalar_lea.sflag [#allocation5], %s8587_s27 }
  0x4c   : > { %s9726_s26 = scalar_select %p8646_p0, 1, 0 }
  0x4f   : > { %s8654_s23 = scalar_lea.hbm %s9727_s5, %s8590_s28  ;;  %s8239_s25 = scalar_lea.hbm %s9727_s5, 512 }
  0x50   : > { %s8234_s24 = scalar_lea.hbm %s8654_s23, 256  ;;  %p8240_p6 = scmp.lt.u32.totalorder %s8654_s23, %s9727_s5 }
  0x51   : > { %p8235_p3 = scmp.ne.s32.totalorder %s8654_s23, %s8234_s24  ;;  %p8241_p8 = scmp.lt.u32.totalorder %s8239_s25, %s8234_s24 }
  0x52   : > { %p8243_p13 = scmp.lt.u32.totalorder %s8234_s24, %s8654_s23 }
  0x53   : > { %p8237_p4 = pnand %p8235_p3, %p8616_p12  ;;  %p8242_p11 = por %p8241_p8, %p8240_p6 }
  0x55   : > { %p8238_p5 = pneg %p8237_p4  ;;  %p8244_p1 = por %p8243_p13, %p8242_p11 }
  0x57   : > { %p8245_p2 = pnand %p8244_p1, %p8238_p5 }
  0x59   : > { %8248 = shalt.err (!%p8245_p2)
}
  0x5a   : > { %s8249_s14 = scalar_lea.vmem %s8657_s7, 256  ;;  %s8417_s15 = smov [#allocation4]  }
  0x5b   : > { %p8250_p7 = scmp.ne.s32.totalorder %s8657_s7, %s8249_s14  ;;  %s8254_s17 = sshll.u32 %s8417_s15, 4  ;;  %s8255_s17 = int_to_ptr.vmem [resolvable:$false] %s8254_s17 }
  0x5c   : > { %s8256_s22 = scalar_lea.vmem %s8255_s17, 512  ;;  %p8257_p4 = scmp.lt.s32.totalorder %s8657_s7, %s8255_s17 }
  0x5d   : > { %p8252_p10 = pnand %p8250_p7, %p8616_p12  ;;  %p8258_p0 = scmp.lt.s32.totalorder %s8256_s22, %s8249_s14 }
  0x5f   : > { %p8253_p3 = pneg %p8252_p10  ;;  %p8259_p6 = por %p8258_p0, %p8257_p4 }
  0x61   : > { %p8260_p8 = pnand %p8259_p6, %p8253_p3 }
  0x63   : > { %8263 = shalt.err (!%p8260_p8)
}
  0x64   : > { %s9728_s24 = smov 4   ;;  %s9729_s25 = smov 64  }
  0x65   : > { %7919 = dma.hbm_to_vmem [thread:$0]  (!%p8595_p9), %s8654_s23, 256, %s8657_s7, %s624_s20, %s9729_s25, %s9729_s25, %s9728_s24  }
  0x66   : > { %s9730_s9 = sld [smem:[#allocation34_spill]]  ;;  %s681_s17 = scalar_lea.vmem [#allocation9], %s8593_s29 }
  0x67   : > { %s688_s22 = sshll.u32 %s681_s17, 4  ;;  %s8693_s22 = int_to_ptr.vmem [resolvable:$true] %s688_s22 }
  0x6c   : > { %s8690_s14 = scalar_lea.hbm %s9730_s9, %s8590_s28  ;;  %s8269_s23 = scalar_lea.hbm %s9730_s9, 512 }
  0x6d   : > { %s8264_s5 = scalar_lea.hbm %s8690_s14, 256  ;;  %p8270_p13 = scmp.lt.u32.totalorder %s8690_s14, %s9730_s9 }
  0x6e   : > { %p8265_p0 = scmp.ne.s32.totalorder %s8690_s14, %s8264_s5  ;;  %p8271_p1 = scmp.lt.u32.totalorder %s8269_s23, %s8264_s5 }
  0x6f   : > { %p8273_p7 = scmp.lt.u32.totalorder %s8264_s5, %s8690_s14 }
  0x70   : > { %p8267_p5 = pnand %p8265_p0, %p8616_p12  ;;  %p8272_p2 = por %p8271_p1, %p8270_p13 }
  0x72   : > { %p8268_p11 = pneg %p8267_p5  ;;  %p8274_p10 = por %p8273_p7, %p8272_p2 }
  0x74   : > { %p8275_p3 = pnand %p8274_p10, %p8268_p11 }
  0x76   : > { %8278 = shalt.err (!%p8275_p3)
}
  0x77   : > { %s8279_s29 = scalar_lea.vmem %s8693_s22, 256  ;;  %s8418_s13 = smov [#allocation9]  }
  0x78   : > { %p8280_p4 = scmp.ne.s32.totalorder %s8693_s22, %s8279_s29  ;;  %s8284_s19 = sshll.u32 %s8418_s13, 4  ;;  %s8285_s19 = int_to_ptr.vmem [resolvable:$false] %s8284_s19 }
  0x79   : > { %s8286_s15 = scalar_lea.vmem %s8285_s19, 512  ;;  %p8287_p0 = scmp.lt.s32.totalorder %s8693_s22, %s8285_s19 }
  0x7a   : > { %p8282_p6 = pnand %p8280_p4, %p8616_p12  ;;  %p8288_p5 = scmp.lt.s32.totalorder %s8286_s15, %s8279_s29 }
  0x7c   : > { %p8283_p8 = pneg %p8282_p6  ;;  %p8289_p13 = por %p8288_p5, %p8287_p0 }
  0x7e   : > { %p8290_p1 = pnand %p8289_p13, %p8283_p8 }
  0x80   : > { %8293 = shalt.err (!%p8290_p1)
}
  0x81   : > { %7925 = dma.hbm_to_vmem [thread:$0]  (!%p8595_p9), %s8690_s14, 256, %s8693_s22, %s8610_s18, %s9729_s25, %s9729_s25, %s9728_s24  }
  0x82   : > { %s6800_s5 = sshll.u32 %s8408_s1, 4  ;;  %s9731_s10 = sld [smem:[#allocation35_spill]] }
  0x83   : > { %s701_s20 = scalar_lea.vmem [#allocation10], %s8587_s27  ;;  %s699_s29 = scalar_lea.sflag [#allocation11], %s8587_s27 }
  0x84   : > { %s708_s28 = sshll.u32 %s701_s20, 4  ;;  %s709_s28 = int_to_ptr.vmem [resolvable:$true] %s708_s28 }
  0x88   : > { %s8724_s23 = scalar_lea.hbm %s9731_s10, %s6800_s5  ;;  %s8299_s25 = scalar_lea.hbm %s9731_s10, 32 }
  0x89   : > { %s8294_s13 = scalar_lea.hbm %s8724_s23, 16  ;;  %p8300_p10 = scmp.lt.u32.totalorder %s8724_s23, %s9731_s10 }
  0x8a   : > { %p8295_p11 = scmp.ne.s32.totalorder %s8724_s23, %s8294_s13  ;;  %p8301_p3 = scmp.lt.u32.totalorder %s8299_s25, %s8294_s13 }
  0x8b   : > { %p8303_p6 = scmp.lt.u32.totalorder %s8294_s13, %s8724_s23 }
  0x8c   : > { %p8297_p2 = pnand %p8295_p11, %p8616_p12  ;;  %p8302_p4 = por %p8301_p3, %p8300_p10 }
  0x8e   : > { %p8298_p7 = pneg %p8297_p2  ;;  %p8304_p8 = por %p8303_p6, %p8302_p4 }
  0x90   : > { %p8305_p0 = pnand %p8304_p8, %p8298_p7 }
  0x92   : > { %8308 = shalt.err (!%p8305_p0)
}
  0x93   : > { %s8309_s27 = scalar_lea.vmem %s709_s28, 16  ;;  %s8419_s19 = smov [#allocation10]  }
  0x94   : > { %p8310_p5 = scmp.ne.s32.totalorder %s709_s28, %s8309_s27  ;;  %s8314_s15 = sshll.u32 %s8419_s19, 4  ;;  %s8315_s15 = int_to_ptr.vmem [resolvable:$false] %s8314_s15 }
  0x95   : > { %s8316_s5 = scalar_lea.vmem %s8315_s15, 32  ;;  %p8317_p11 = scmp.lt.s32.totalorder %s709_s28, %s8315_s15 }
  0x96   : > { %p8312_p13 = pnand %p8310_p5, %p8616_p12  ;;  %p8318_p2 = scmp.lt.s32.totalorder %s8316_s5, %s8309_s27 }
  0x98   : > { %p8313_p1 = pneg %p8312_p13  ;;  %p8319_p9 = por %p8318_p2, %p8317_p11 }
  0x9a   : > { %p8320_p3 = pnand %p8319_p9, %p8313_p1 }
  0x9c   : > { %8323 = shalt.err (!%p8320_p3)
}
  0x9d   : > { %p9732_p10 = scmp.ne.s32.totalorder %s9722_s0, 0  ;;  %p9733_p7 = scmp.ne.s32.totalorder %s9726_s26, 0 }
  0x9f   : > { %7928 = dma.hbm_to_vmem [thread:$0]  (!%p9732_p10), %s8724_s23, 16, %s709_s28, %s699_s29  }
  0xa0   : > { %755 = sbr.rel (%p9733_p7) target bundleno = 8453 (0x2105), region = 96 }
  0xa7   : > { %s8748_s16 = sand.u32 1, %s8396_s30   ;;  %p9735_p9 = scmp.ne.s32.totalorder %s9720_s3, 0 }
  0xa8   : > { %9734 = sst [smem:[#allocation24_spill]] %s8748_s16  ;;  %s8751_s17 = sshll.u32 %s8748_s16, 4 }
  0xa9   : > { %s758_s7 = scalar_lea.sflag [#allocation5], %s8748_s16  ;;  %s8755_s20 = scalar_lea.vmem [#allocation4], %s8751_s17 }
  0xaa   : > { %8375 = dma.done.wait (%p9735_p9), %s758_s7, 256  }
  0xab   : > { %8377 = vsyncadd (%p9735_p9), %s758_s7, 4294967040  ;;  %s766_s0 = sand.u32 1, %s8565_s2  }
  0xac   : > { %s767_s26 = scalar_lea.sflag [#allocation8], %s766_s0 }
  0xad   : > { %8379 = dma.done.wait (%p9735_p9), %s767_s26, 512  }
  0xae   : > { %8381 = vsyncadd (%p9735_p9), %s767_s26, 4294966784  ;;  %s785_s29 = scalar_lea.sflag [#allocation11], %s8748_s16 }
  0xaf   : > { %8383 = dma.done.wait (%p9735_p9), %s785_s29, 16  }
  0xb0   : > { %8385 = vsyncadd (%p9735_p9), %s785_s29, 4294967280  ;;  %p906_p12 = scmp.lt.s32.totalorder %s8404_s21, 1  ;;  %s9736_s14 = sld [smem:[#allocation27_spill]] }
  0xb1   : > { %s9737_s15 = sld [smem:[#allocation26_spill]]  ;;  %s9738_s26 = sld [smem:[#allocation28_spill]] }
  0xb2   : > { %s8776_s18 = scalar_select %p906_p12, %s8404_s21, 1 }
  0xb3   : > { %s9739_s4 = sld [smem:[#allocation29_spill]]  ;;  %s9740_s6 = sld [smem:[#allocation31_spill]] }
  0xb4   : > { %s7059_s24 = sshll.u32 %s8776_s18, 4  ;;  %s7061_s19 = sshll.u32 %s8776_s18, 5 }
  0xb5   : > { %s9743_s30 = sld [smem:[#allocation37_spill]]  ;;  %s9744_s27 = sld [smem:[#allocation38_spill]] }
  0xb6   : > { %s8783_s22 = scalar_lea.vmem %s9736_s14, %s8776_s18  ;;  %p6811_p4 = scmp.ne.s32.totalorder %s8404_s21, 0 }
  0xb7   : > { %s8788_s5 = scalar_lea.vmem %s9737_s15, %s7059_s24  ;;  %s8793_s29 = scalar_lea.vmem %s9738_s26, %s7059_s24  ;;  %vm957_vm0 = vcmask (!%p6811_p4), 261120  }
  0xb8   : > { %s8815_s24 = scalar_lea.vmem %s9671_s11, %s7061_s19  ;;  %s9745_s19 = sld [smem:[#allocation39_spill]] }
  0xb9   : > { %s8799_s23 = scalar_lea.vmem %s9739_s4, %s8776_s18  ;;  %s8805_s25 = scalar_lea.vmem %s9740_s6, %s8776_s18 }
  0xba   : > { %s9742_s4 = sld [smem:[#allocation36_spill]]  ;;  %952 = sbr.rel (%p6811_p4) target bundleno = 197 (0xc5), region = 116 }
  0xbb   : > { %s941_s2 = scalar_lea.vmem %s9743_s30, %s8776_s18  ;;  %s944_s16 = scalar_lea.vmem %s9744_s27, %s8776_s18 }
  0xbc   : > { %s9746_s28 = sld [smem:[#allocation25_spill]] (!%p6811_p4) }
  0xbe   : > { %s947_s15 = scalar_lea.vmem %s9745_s19, %s8776_s18 }
  0xc0   : > { %s938_s9 = scalar_lea.vmem %s9742_s4, %s8776_s18 }
  0xc2   : > { %v953_v0 = vld [vmem:[%s9746_s28] sm:$0xff]  ;;  %v954_v1 = vld [vmem:[%s9746_s28 + $0x8] sm:$0xff]  ;;  %v955_v2 = vld [vmem:[%s9746_s28 + $0x10] sm:$0xff] }
  0xc3   : > { %958 = vst.msk [vmem:[#allocation2] sm:$0xff] %vm957_vm0, %v953_v0  ;;  %959 = vst.msk [vmem:[#allocation2 + $0x8] sm:$0xff] %vm957_vm0, %v954_v1  ;;  %v956_v3 = vld [vmem:[%s9746_s28 + $0x18] sm:$0xff] }
  0xc4   : > { %960 = vst.msk [vmem:[#allocation2 + $0x10] sm:$0xff] %vm957_vm0, %v955_v2  ;;  %961 = vst.msk [vmem:[#allocation2 + $0x18] sm:$0xff] %vm957_vm0, %v956_v3 }
  0xc5 PF: > { %v7998_v4 = vld [vmem:[%s8788_s5] sm:$0xff]   ;;  %v7999_v5 = vld [vmem:[%s8788_s5 + $0x8] sm:$0xff]   ;;  %vm995_vm1 = vcmask 261120   ;;  %vm1195_vm2 = vcmask 31744   ;;  %v968_v48 = vlaneseq  ;;  %v8420_v53 = vmov -1e+30  }
  0xc6   : > { %7300 = vmatprep.subr.bf16.mxu1 %v7998_v4  ;;  %v8000_v11 = vld [vmem:[%s8793_s29] sm:$0xff]   ;;  %v8001_v13 = vld [vmem:[%s8793_s29 + $0x8] sm:$0xff]   ;;  %vm8897_vm3 = vmpackc.low %vm1195_vm2, %vm1195_vm2  ;;  %vm1378_vm5 = vcmask 130048   ;;  %s8421_s26 = smov 124   ;;  %s8422_s10 = smov 120   ;;  %vm2221_vm6 = vcmask 64544  }
  0xc7   : > { %7301 = vmatpush3.bf16.msra.mxu1 %v7998_v4  ;;  %v8002_v14 = vld [vmem:[%s8755_s20] sm:$0xff]   ;;  %v8003_v15 = vld [vmem:[%s8755_s20 + $0x8] sm:$0xff]   ;;  %v969_v49 = vand.u32 127, %v968_v48  ;;  %s8423_s3 = smov 116   ;;  %s8424_s14 = smov 112   ;;  %vm2856_vm7 = vcmask 97344  }
  0xc8   : > { %7302 = vmatprep.subr.bf16.mxu1 %v7999_v5  ;;  %7316 = vmatprep.subr.bf16.mxu0 %v8002_v14  ;;  %v8873_v16 = vld [vmem:[%s8783_s22] ss:$0 sm:$0xff]  ;;  %s8427_s1 = smov 100   ;;  %s8432_s19 = smov 20   ;;  %vm3491_vm8 = vcmask 130144   ;;  %vm4126_vm9 = vcmask 162944  }
  0xc9   : > { %7317 = vmatpush3.bf16.msra.mxu0 %v8002_v14  ;;  %v8880_v23 = vld [vmem:[%s8805_s25] ss:$0 sm:$0xff]  ;;  %vm970_vm4 = vcmp.lt.s32.totalorder %v969_v49, 9  ;;  %s8433_s7 = smov 24   ;;  %vm4761_vm10 = vcmask 195744   ;;  %vm5396_vm11 = vcmask 228544  }
  0xca   : > { %v962_v6 = vld [vmem:[#allocation2] sm:$0xff]  ;;  %v963_v7 = vld [vmem:[#allocation2 + $0x8] sm:$0xff]  ;;  %7318 = vmatprep.subr.bf16.mxu0 %v8003_v15  ;;  %v8916_v54 = vsel %vm970_vm4, 0.0, %v8420_v53  ;;  %s9749_s0 = scalar_lea.vmem [#allocation7], %s8751_s17  ;;  %s8434_s13 = smov 28   ;;  %vm6031_vm12 = vcmask 261344  }
  0xcb   : > { %v964_v8 = vld [vmem:[#allocation2 + $0x10] sm:$0xff]  ;;  %v8852_v9 = vpack.c.bf16 %v963_v7, %v962_v6  ;;  %v965_v10 = vld [vmem:[#allocation2 + $0x18] sm:$0xff]  ;;  %7303 = vmatpush3.bf16.msra.mxu1 %v7999_v5  ;;  %v8884_v28 = vld [vmem:[%s8799_s23] ss:$0 sm:$0xff]  ;;  %s9750_s4 = smov %s9749_s0  ;;  %s9751_s8 = sld [smem:[#allocation33_spill]]  ;;  %vm6318_vm13 = vcmask 523264  }
  0xcc   : > { %v8859_v12 = vpack.c.bf16 %v965_v10, %v964_v8  ;;  %7308 = vmatprep.subr.bf16.mxu1 %v8000_v11  ;;  %p7049_p6 = scmp.ne.s32.totalorder %s8404_s21, 1 }
  0xcd   : > { %7304 = vmatprep.mubr.msk.bf16.mxu1 %vm995_vm1, %v8852_v9  ;;  %7320 = vmatprep.mubr.msk.bf16.mxu0 %vm995_vm1, %v8852_v9  ;;  %vm6467_vm14 = vcmask (!%p7049_p6), 1041409   ;;  %vm6470_vm15 = vcmask (!%p7049_p6), 254976   ;;  %s9763_s6 = sld [smem:[#allocation41_spill]] (!%p7049_p6) }
  0xce   : > { %7305 = vmatmul.mubr.msk.bf16.vlgmr.msra.gmra.mrb[0].mxu1 %vm995_vm1, %v8859_v12  ;;  %7319 = vmatpush3.bf16.msra.mxu0 %v8003_v15 }
  0xcf   : > { %7309 = vmatpush3.bf16.msra.mxu1 %v8000_v11  ;;  %7312 = vmatprep.mubr.msk.bf16.mxu1 %vm995_vm1, %v8852_v9 }
  0xd0   : > { %7310 = vmatprep.subr.bf16.mxu1 %v8001_v13 }
  0xd1   : > { %7321 = vmatmul.mubr.msk.bf16.vlgmr.msra.gmra.mrb[0].mxu0 %vm995_vm1, %v8859_v12  ;;  %s9752_s27 = scalar_lea.vmem %s9751_s8, %s8776_s18 }
  0xd3   : > { %7311 = vmatpush3.bf16.msra.mxu1 %v8001_v13 }
  0xd6   : > { %7313 = vmatmul.mubr.msk.bf16.vlgmr.msra.gmra.mrb[4].mxu1 %vm995_vm1, %v8859_v12 }
 0x1a1   : > { %v7306_v17 = vpop.f32.mrb[0].mxu1 }
 0x1a2   : > { %v1045_v18 = vadd.f32 %v7306_v17, %v8873_v16  ;;  %v1036_v19 = vpop.f32.mrb[1].mxu1 }
 0x1a3   : > { %v1037_v20 = vadd.f32 %v8873_v16, %v1036_v19  ;;  %v7307_v21 = vpop.f32.mrb[2].mxu1 }
 0x1a4   : > { %v1039_v22 = vpop.f32.mrb[3].mxu1  ;;  %7335 = vmatprep.mubr.msk.f32.mxu0 %vm1195_vm2, %v1045_v18  ;;  %v7322_v24 = vpop.f32.mrb[0].mxu0  ;;  %v1048_v46 = vadd.f32 %v7307_v21, %v8873_v16 }
 0x1a5   : > { %7328 = vmatprep.mubr.msk.f32.mxu1 %vm1195_vm2, %v1037_v20  ;;  %v1189_v25 = vadd.f32 %v7322_v24, %v8880_v23  ;;  %v1180_v26 = vpop.f32.mrb[1].mxu0  ;;  %v1040_v47 = vadd.f32 %v8873_v16, %v1039_v22 }
 0x1a6   : > { %v1181_v29 = vadd.f32 %v8880_v23, %v1180_v26  ;;  %v7323_v30 = vpop.f32.mrb[2].mxu0 }
 0x1a7   : > { %v1192_v32 = vadd.f32 %v7323_v30, %v8880_v23  ;;  %v1183_v33 = vpop.f32.mrb[3].mxu0  ;;  %v8004_v30 = vld [vmem:[%s8793_s29] sm:$0xff]  }
 0x1a8   : > { %v1184_v35 = vadd.f32 %v8880_v23, %v1183_v33  ;;  %v8008_v33 = vld [vmem:[%s8755_s20] sm:$0xff]  }
 0x1a9   : > { %v7314_v27 = vpop.f32.mrb[4].mxu1  ;;  %v8891_v39 = vpack.c.bf16 %v1192_v32, %v1189_v25  ;;  %v8007_v32 = vld [vmem:[%s8788_s5 + $0x8] sm:$0xff]  }
 0x1aa   : > { %v1108_v31 = vpop.f32.mrb[5].mxu1  ;;  %v1117_v36 = vadd.f32 %v7314_v27, %v8884_v28  ;;  %v7756_v43 = vpack.c.bf16 %v1184_v35, %v1181_v29  ;;  %v8005_v29 = vld [vmem:[%s8793_s29 + $0x8] sm:$0xff]  }
 0x1ab   : > { %v7315_v34 = vpop.f32.mrb[6].mxu1  ;;  %v1109_v40 = vadd.f32 %v8884_v28, %v1108_v31  ;;  %v8006_v31 = vld [vmem:[%s8788_s5] sm:$0xff]  }
 0x1ac   : > { %v1120_v37 = vadd.f32 %v7315_v34, %v8884_v28  ;;  %v1111_v38 = vpop.f32.mrb[7].mxu1  ;;  %v8009_v34 = vld [vmem:[%s8755_s20 + $0x8] sm:$0xff]  }
 0x1ad   : > { %v1112_v41 = vadd.f32 %v8884_v28, %v1111_v38 }
 0x1ae   : > { %v7750_v44 = vpack.c.bf16 %v1120_v37, %v1117_v36 }
 0x1af   : > { %v7744_v45 = vpack.c.bf16 %v1112_v41, %v1109_v40 }
 0x1b0   : > { %7752 = vmatprep.subr.msk.bf16.mxu0 %vm8897_vm3, %v7750_v44 }
 0x1b1   : > { %7746 = vmatprep.subr.msk.bf16.mxu1 %vm8897_vm3, %v7744_v45  ;;  %7755 = vmatpush3.bf16.xpose.msk.msra.mxu0 %vm8897_vm3, %v7750_v44 }
 0x1b2   : > { %7749 = vmatpush3.bf16.xpose.msk.msra.mxu1 %vm8897_vm3, %v7744_v45 }
 0x1b3   : > { %7757 = vmatprep.subr.bf16.mxu1 %v7756_v43 }
 0x1b8   : > { %7336 = vmatmul.mubr.msk.f32.vlgmr.msra.gmra.mrb[4].mxu0 %vm1195_vm2, %v1048_v46 }
 0x1b9   : > { %7329 = vmatmul.mubr.msk.f32.vlgmr.msra.gmra.mrb[8].mxu1 %vm1195_vm2, %v1040_v47  ;;  %7356 = vmatprep.mubr.msk.bf16.mxu0 %vm995_vm1, %v8852_v9 }
 0x1ba   : > { %7759 = vmatpush3.bf16.msra.mxu1 %v7756_v43 }
 0x1bb   : > { %7761 = vmatprep.subr.bf16.mxu1 %v8891_v39 }
 0x28b   : > { %v7337_v50 = vpop.f32.mrb[4].mxu0 }
 0x28c   : > { %v7330_v51 = vpop.f32.mrb[8].mxu1  ;;  %v1361_v52 = vpop.f32.mrb[5].mxu0  ;;  %v1373_v55 = vmul.f32 0.5, %v7337_v50 }
 0x28d   : > { %v1372_v56 = vmul.f32 0.5, %v1361_v52  ;;  %v1274_v57 = vpop.f32.mrb[9].mxu1  ;;  %v1371_v58 = vmul.f32 0.5, %v7330_v51 }
 0x28e   : > { %v1370_v59 = vmul.f32 0.5, %v1274_v57  ;;  %v1377_v63 = vadd.f32 %v1373_v55, %v8916_v54 }
 0x28f   : > { %v1376_v60 = vadd.f32 %v1372_v56, %v8916_v54  ;;  %v1375_v1 = vadd.f32 %v1371_v58, %v8916_v54 }
 0x290   : > { %v1374_v61 = vadd.f32 %v1370_v59, %v8916_v54  ;;  %v1388_v2 = vsel %vm1378_vm5, %v1377_v63, -inf }
 0x291   : > { %v1385_v62 = vsel %vm1378_vm5, %v1376_v60, -inf  ;;  %v1382_v3 = vsel %vm1378_vm5, %v1375_v1, -inf }
 0x292   : > { %1386 = vmax.xlane.f32.xlu1 %v1385_v62  ;;  %v1379_v0 = vsel %vm1378_vm5, %v1374_v61, -inf }
 0x293   : > { %1380 = vmax.xlane.f32.xlu0 %v1379_v0 }
 0x296   : > { %1389 = vmax.xlane.f32.xlu1 %v1388_v2 }
 0x297   : > { %1383 = vmax.xlane.f32.xlu0 %v1382_v3 }
 0x31f   : > { %v1387_v4 = vpop.xlane.xlu1 %1386 }
 0x320   : > { %v1393_v5 = vsub.f32 %v1376_v60, %v1387_v4  ;;  %v1381_v6 = vpop.xlane.xlu0 %1380 }
 0x321   : > { %v1391_v7 = vsub.f32 %v1374_v61, %v1381_v6 }
 0x322   : > { %v1399_v8 = vmul.f32 1.442695, %v1393_v5 }
 0x323   : > { %v1395_v10 = vmul.f32 1.442695, %v1391_v7  ;;  %v1390_v11 = vpop.xlane.xlu1 %1389 }
 0x324   : > { %8054 = vpow2.f32 %v1399_v8  ;;  %v1394_v13 = vsub.f32 %v1377_v63, %v1390_v11  ;;  %v1384_v14 = vpop.xlane.xlu0 %1383 }
 0x325   : > { %v1392_v15 = vsub.f32 %v1375_v1, %v1384_v14  ;;  %8056 = vpow2.f32 %v1395_v10 }
 0x326   : > { %v1401_v17 = vmul.f32 1.442695, %v1394_v13 }
 0x327   : > { %v1397_v18 = vmul.f32 1.442695, %v1392_v15 }
 0x328   : > { %8058 = vpow2.f32 %v1401_v17 }
 0x329   : > { %8060 = vpow2.f32 %v1397_v18 }
 0x32e   : > { %v8055_v19 = vpop.eup %8054 }
 0x32f   : > { %v1409_v20 = vsel %vm1378_vm5, %v8055_v19, 0.0  ;;  %v8057_v21 = vpop.eup %8056 }
 0x330   : > { %1410 = vadd.xlane.f32.xlu0 %v1409_v20  ;;  %v1403_v25 = vsel %vm1378_vm5, %v8057_v21, 0.0 }
 0x332   : > { %v8059_v22 = vpop.eup %8058 }
 0x333   : > { %v1412_v24 = vsel %vm1378_vm5, %v8059_v22, 0.0  ;;  %v8061_v26 = vpop.eup %8060 }
 0x334   : > { %1413 = vadd.xlane.f32.xlu1 %v1412_v24  ;;  %1404 = vadd.xlane.f32.xlu0 %v1403_v25  ;;  %v1406_v27 = vsel %vm1378_vm5, %v8061_v26, 0.0 }
 0x338   : > { %1407 = vadd.xlane.f32.xlu1 %v1406_v27 }
 0x349   : > { %1689 = vrot.lane.b32.xlu1 %v8005_v29, %s8421_s26 }
 0x34a   : > { %1687 = vrot.lane.b32.xlu0 %v8004_v30, %s8421_s26 }
 0x34d   : > { %1609 = vrot.lane.b32.xlu1 %v8006_v31, %s8421_s26 }
 0x34e   : > { %1765 = vrot.lane.b32.xlu0 %v8008_v33, %s8421_s26 }
 0x351   : > { %1611 = vrot.lane.b32.xlu1 %v8007_v32, %s8421_s26 }
 0x352   : > { %1693 = vrot.lane.b32.xlu0 %v8884_v28, %s8421_s26 }
 0x355   : > { %1767 = vrot.lane.b32.xlu1 %v8009_v34, %s8421_s26 }
 0x359   : > { %1615 = vrot.lane.b32.xlu1 %v8873_v16, %s8421_s26 }
 0x3bd   : > { %v1411_v35 = vpop.xlane.xlu0 %1410 }
 0x3c1   : > { %v1414_v36 = vpop.xlane.xlu1 %1413  ;;  %v1405_v37 = vpop.xlane.xlu0 %1404 }
 0x3c2   : > { %8062 = vrcp.f32 %v1405_v37 }
 0x3c3   : > { %8064 = vrcp.f32 %v1411_v35 }
 0x3c5   : > { %v1408_v38 = vpop.xlane.xlu1 %1407  ;;  %v1688_v51 = vpop.permute.xlu0 %1687 }
 0x3c6   : > { %8066 = vrcp.f32 %v1408_v38 }
 0x3c7   : > { %8068 = vrcp.f32 %v1414_v36 }
 0x3c9   : > { %v1690_v40 = vpop.permute.xlu1 %1689 }
 0x3cc   : > { %v8063_v41 = vpop.eup %8062 }
 0x3cd   : > { %v1610_v43 = vpop.permute.xlu1 %1609  ;;  %v1416_v44 = vmul.f32 %v8063_v41, %v8057_v21  ;;  %v8065_v45 = vpop.eup %8064 }
 0x3ce   : > { %7352 = vmatprep.subr.bf16.mxu0 %v1610_v43  ;;  %v1420_v50 = vmul.f32 %v8065_v45, %v8055_v19 }
 0x3cf   : > { %7353 = vmatpush3.bf16.msra.mxu0 %v1610_v43  ;;  %7342 = vmatprep.mubr.msk.f32.mxu1 %vm1378_vm5, %v1416_v44 }
 0x3d0   : > { %v8067_v46 = vpop.eup %8066 }
 0x3d1   : > { %v1418_v47 = vmul.f32 %v8067_v46, %v8061_v26  ;;  %v1612_v48 = vpop.permute.xlu1 %1611  ;;  %v8069_v49 = vpop.eup %8068 }
 0x3d2   : > { %7354 = vmatprep.subr.bf16.mxu0 %v1612_v48  ;;  %v1422_v52 = vmul.f32 %v8069_v49, %v8059_v22 }
 0x3d3   : > { %7343 = vmatmul.mubr.msk.f32.vlgmr.msra.gmra.mrb[10].mxu1 %vm1378_vm5, %v1418_v47  ;;  %7355 = vmatpush3.bf16.msra.mxu0 %v1612_v48 }
 0x3d4   : > { %7763 = vmatpush3.bf16.msra.mxu1 %v8891_v39  ;;  %7349 = vmatprep.mubr.msk.f32.mxu1 %vm1378_vm5, %v1420_v50  ;;  %v1766_v39 = vpop.permute.xlu0 %1765 }
 0x3d5   : > { %7360 = vmatprep.subr.bf16.mxu1 %v1688_v51  ;;  %7368 = vmatprep.subr.bf16.mxu0 %v1766_v39  ;;  %v1768_v53 = vpop.permute.xlu1 %1767 }
 0x3d6   : > { %7357 = vmatmul.mubr.msk.bf16.vlgmr.msra.gmra.mrb[8].mxu0 %vm995_vm1, %v8859_v12 }
 0x3d7   : > { %7350 = vmatmul.mubr.msk.f32.vlgmr.msra.gmra.mrb[12].mxu1 %vm1378_vm5, %v1422_v52  ;;  %7372 = vmatprep.mubr.msk.bf16.mxu0 %vm995_vm1, %v8852_v9 }
 0x3d8   : > { %7361 = vmatpush3.bf16.msra.mxu1 %v1688_v51  ;;  %7364 = vmatprep.mubr.msk.bf16.mxu1 %vm995_vm1, %v8852_v9  ;;  %v1694_v5 = vpop.permute.xlu0 %1693 }
 0x3d9   : > { %7362 = vmatprep.subr.bf16.mxu1 %v1690_v40  ;;  %7369 = vmatpush3.bf16.msra.mxu0 %v1766_v39  ;;  %v1616_v57 = vpop.permute.xlu1 %1615 }
 0x3da   : > { %7370 = vmatprep.subr.bf16.mxu0 %v1768_v53 }
 0x3dc   : > { %7363 = vmatpush3.bf16.msra.mxu1 %v1690_v40 }
 0x3dd   : > { %7371 = vmatpush3.bf16.msra.mxu0 %v1768_v53 }
 0x3df   : > { %7365 = vmatmul.mubr.msk.bf16.vlgmr.msra.gmra.mrb[16].mxu1 %vm995_vm1, %v8859_v12 }
 0x3e0   : > { %7373 = vmatmul.mubr.msk.bf16.vlgmr.msra.gmra.mrb[12].mxu0 %vm995_vm1, %v8859_v12 }
 0x4a6   : > { %v7344_v55 = vpop.f32.mrb[10].mxu1 }
 0x4a7   : > { %v1495_v56 = vpop.f32.mrb[11].mxu1 }
 0x4a8   : > { %v1585_v58 = vpack.c.bf16 %v7344_v55, %v1495_v56 }
 0x4a9   : > { %v7358_v59 = vpop.f32.mrb[8].mxu0 }
 0x4aa   : > { %1587 = vst.msk [vmem:[#allocation3] sm:$0xff] %vm1195_vm2, %v1585_v58  ;;  %v7351_v60 = vpop.f32.mrb[12].mxu1  ;;  %v1652_v61 = vpop.f32.mrb[9].mxu0  ;;  %v1661_v62 = vadd.f32 %v7358_v59, %v1616_v57 }
 0x4ab   : > { %v1576_v63 = vpop.f32.mrb[13].mxu1  ;;  %v7359_v0 = vpop.f32.mrb[10].mxu0  ;;  %v1653_v1 = vadd.f32 %v1652_v61, %v1616_v57 }
 0x4ac   : > { %v1586_v2 = vpack.c.bf16 %v7351_v60, %v1576_v63  ;;  %v1655_v3 = vpop.f32.mrb[11].mxu0  ;;  %7387 = vmatprep.mubr.msk.f32.mxu0 %vm1195_vm2, %v1661_v62  ;;  %v1664_v18 = vadd.f32 %v7359_v0, %v1616_v57  ;;  %v8010_v0 = vld [vmem:[%s8793_s29] sm:$0xff]  }
 0x4ad   : > { %7380 = vmatprep.mubr.msk.f32.mxu1 %vm1195_vm2, %v1653_v1  ;;  %v1656_v19 = vadd.f32 %v1655_v3, %v1616_v57  ;;  %v8011_v1 = vld [vmem:[%s8793_s29 + $0x8] sm:$0xff]   ;;  %v8012_v3 = vld [vmem:[%s8788_s5] sm:$0xff]  }
 0x4ae   : > { %1588 = vst.msk [vmem:[#allocation3 + $0x8] sm:$0xff] %vm1195_vm2, %v1586_v2  ;;  %v8013_v2 = vld [vmem:[%s8788_s5 + $0x8] sm:$0xff]  }
 0x4b2   : > { %v7366_v4 = vpop.f32.mrb[16].mxu1 }
 0x4b3   : > { %v1730_v6 = vpop.f32.mrb[17].mxu1  ;;  %v1739_v8 = vadd.f32 %v7366_v4, %v1694_v5  ;;  %v8977_v20 = vpop.f32.mrb[12].mxu0  ;;  %v8014_v4 = vld [vmem:[%s8755_s20] sm:$0xff]  }
 0x4b4   : > { %v7367_v7 = vpop.f32.mrb[18].mxu1  ;;  %v1731_v13 = vadd.f32 %v1730_v6, %v1694_v5  ;;  %v8979_v21 = vpop.f32.mrb[13].mxu0 }
 0x4b5   : > { %v1742_v10 = vadd.f32 %v7367_v7, %v1694_v5  ;;  %v1733_v11 = vpop.f32.mrb[19].mxu1  ;;  %v8981_v22 = vpop.f32.mrb[14].mxu0 }
 0x4b6   : > { %v1734_v14 = vadd.f32 %v1733_v11, %v1694_v5  ;;  %v8983_v24 = vpop.f32.mrb[15].mxu0  ;;  %v8015_v5 = vld [vmem:[%s8755_s20 + $0x8] sm:$0xff]  }
 0x4b7   : > { %v7770_v15 = vpack.c.bf16 %v1742_v10, %v1739_v8 }
 0x4b8   : > { %v7764_v17 = vpack.c.bf16 %v1734_v14, %v1731_v13 }
 0x4b9   : > { %7772 = vmatprep.subr.msk.bf16.mxu0 %vm8897_vm3, %v7770_v15 }
 0x4ba   : > { %7766 = vmatprep.subr.msk.bf16.mxu1 %vm8897_vm3, %v7764_v17  ;;  %7775 = vmatpush3.bf16.xpose.msk.msra.mxu0 %vm8897_vm3, %v7770_v15 }
 0x4bb   : > { %7769 = vmatpush3.bf16.xpose.msk.msra.mxu1 %vm8897_vm3, %v7764_v17 }
 0x4c1   : > { %7388 = vmatmul.mubr.msk.f32.vlgmr.msra.gmra.mrb[6].mxu0 %vm1195_vm2, %v1664_v18 }
 0x4c2   : > { %7381 = vmatmul.mubr.msk.f32.vlgmr.msra.gmra.mrb[14].mxu1 %vm1195_vm2, %v1656_v19  ;;  %7408 = vmatprep.mubr.msk.bf16.mxu0 %vm995_vm1, %v8852_v9 }
 0x594   : > { %v7389_v25 = vpop.f32.mrb[6].mxu0 }
 0x595   : > { %v7382_v26 = vpop.f32.mrb[14].mxu1  ;;  %v1988_v27 = vpop.f32.mrb[7].mxu0  ;;  %v2000_v36 = vmul.f32 0.5, %v7389_v25 }
 0x596   : > { %v1998_v29 = vmul.f32 0.5, %v7382_v26  ;;  %v1901_v30 = vpop.f32.mrb[15].mxu1  ;;  %v1999_v31 = vmul.f32 0.5, %v1988_v27 }
 0x597   : > { %v1997_v32 = vmul.f32 0.5, %v1901_v30  ;;  %v2004_v41 = vadd.f32 %v2000_v36, %v8916_v54 }
 0x598   : > { %v2002_v33 = vadd.f32 %v1998_v29, %v8916_v54  ;;  %v2003_v38 = vadd.f32 %v1999_v31, %v8916_v54 }
 0x599   : > { %v2001_v34 = vadd.f32 %v1997_v32, %v8916_v54  ;;  %v2014_v43 = vsel %vm1378_vm5, %v2004_v41, -inf }
 0x59a   : > { %v2008_v35 = vsel %vm1378_vm5, %v2002_v33, -inf  ;;  %v2011_v40 = vsel %vm1378_vm5, %v2003_v38, -inf }
 0x59b   : > { %2009 = vmax.xlane.f32.xlu1 %v2008_v35  ;;  %v2005_v37 = vsel %vm1378_vm5, %v2001_v34, -inf }
 0x59c   : > { %2006 = vmax.xlane.f32.xlu0 %v2005_v37 }
 0x5a0   : > { %2012 = vmax.xlane.f32.xlu0 %v2011_v40 }
 0x5a4   : > { %2015 = vmax.xlane.f32.xlu0 %v2014_v43 }
 0x628   : > { %v2010_v46 = vpop.xlane.xlu1 %2009 }
 0x629   : > { %v2007_v44 = vpop.xlane.xlu0 %2006  ;;  %v2018_v49 = vsub.f32 %v2002_v33, %v2010_v46 }
 0x62a   : > { %v2017_v45 = vsub.f32 %v2001_v34, %v2007_v44 }
 0x62b   : > { %v2023_v53 = vmul.f32 1.442695, %v2018_v49 }
 0x62c   : > { %v2021_v50 = vmul.f32 1.442695, %v2017_v45 }
 0x62d   : > { %v2013_v47 = vpop.xlane.xlu0 %2012 }
 0x62e   : > { %v2019_v48 = vsub.f32 %v2003_v38, %v2013_v47 }
 0x630   : > { %v2025_v51 = vmul.f32 1.442695, %v2019_v48 }
 0x631   : > { %v2016_v52 = vpop.xlane.xlu0 %2015 }
 0x632   : > { %8070 = vpow2.f32 %v2025_v51  ;;  %v2020_v39 = vsub.f32 %v2004_v41, %v2016_v52 }
 0x633   : > { %8072 = vpow2.f32 %v2021_v50 }
 0x634   : > { %v2027_v55 = vmul.f32 1.442695, %v2020_v39 }
 0x636   : > { %8074 = vpow2.f32 %v2027_v55 }
 0x637   : > { %8076 = vpow2.f32 %v2023_v53 }
 0x63c   : > { %v8071_v56 = vpop.eup %8070 }
 0x63d   : > { %v2035_v57 = vsel %vm1378_vm5, %v8071_v56, 0.0  ;;  %v8073_v58 = vpop.eup %8072 }
 0x63e   : > { %2036 = vadd.xlane.f32.xlu0 %v2035_v57  ;;  %v2029_v60 = vsel %vm1378_vm5, %v8073_v58, 0.0 }
 0x640   : > { %v8075_v59 = vpop.eup %8074 }
 0x641   : > { %v2038_v61 = vsel %vm1378_vm5, %v8075_v59, 0.0  ;;  %v8077_v62 = vpop.eup %8076 }
 0x642   : > { %2030 = vadd.xlane.f32.xlu0 %v2029_v60  ;;  %2039 = vadd.xlane.f32.xlu1 %v2038_v61  ;;  %v2032_v63 = vsel %vm1378_vm5, %v8077_v62, 0.0 }
 0x646   : > { %2033 = vadd.xlane.f32.xlu1 %v2032_v63 }
 0x657   : > { %2322 = vrot.lane.b32.xlu1 %v8010_v0, %s8422_s10 }
 0x658   : > { %1771 = vrot.lane.b32.xlu0 %v8880_v23, %s8421_s26  ;;  %s9753_s26 = scalar_lea.vmem [#allocation9], %s8751_s17 }
 0x65b   : > { %2324 = vrot.lane.b32.xlu1 %v8011_v1, %s8422_s10 }
 0x65c   : > { %2246 = vrot.lane.b32.xlu0 %v8013_v2, %s8422_s10 }
 0x65f   : > { %2244 = vrot.lane.b32.xlu1 %v8012_v3, %s8422_s10 }
 0x660   : > { %2402 = vrot.lane.b32.xlu0 %v8015_v5, %s8422_s10 }
 0x663   : > { %2400 = vrot.lane.b32.xlu1 %v8014_v4, %s8422_s10 }
 0x664   : > { %2250 = vrot.lane.b32.xlu0 %v8873_v16, %s8422_s10 }
 0x667   : > { %2328 = vrot.lane.b32.xlu1 %v8884_v28, %s8422_s10 }
 0x6cb   : > { %v2037_v6 = vpop.xlane.xlu0 %2036 }
 0x6cf   : > { %v2040_v7 = vpop.xlane.xlu1 %2039  ;;  %v2031_v8 = vpop.xlane.xlu0 %2030 }
 0x6d0   : > { %8078 = vrcp.f32 %v2031_v8 }
 0x6d1   : > { %8080 = vrcp.f32 %v2037_v6 }
 0x6d3   : > { %v2034_v10 = vpop.xlane.xlu1 %2033  ;;  %v1772_v11 = vpop.permute.xlu0 %1771 }
 0x6d4   : > { %8082 = vrcp.f32 %v2034_v10  ;;  %v1809_v13 = vadd.f32 %v8979_v21, %v1772_v11  ;;  %v1812_v14 = vadd.f32 %v8983_v24, %v1772_v11  ;;  %v1817_v15 = vadd.f32 %v8977_v20, %v1772_v11 }
 0x6d5   : > { %v1820_v17 = vadd.f32 %v8981_v22, %v1772_v11  ;;  %8084 = vrcp.f32 %v2040_v7 }
 0x6d6   : > { %v7776_v18 = vpack.c.bf16 %v1812_v14, %v1809_v13 }
 0x6d7   : > { %v7780_v19 = vpack.c.bf16 %v1820_v17, %v1817_v15  ;;  %v2323_v25 = vpop.permute.xlu1 %2322  ;;  %v2247_v22 = vpop.permute.xlu0 %2246 }
 0x6d8   : > { %7777 = vmatprep.subr.bf16.mxu1 %v7776_v18 }
 0x6d9   : > { %7779 = vmatpush3.bf16.msra.mxu1 %v7776_v18 }
 0x6da   : > { %7781 = vmatprep.subr.bf16.mxu1 %v7780_v19  ;;  %v8079_v26 = vpop.eup %8078 }
 0x6db   : > { %v2325_v27 = vpop.permute.xlu1 %2324  ;;  %v2042_v29 = vmul.f32 %v8079_v26, %v8073_v58  ;;  %v8081_v30 = vpop.eup %8080 }
 0x6dc   : > { %v2046_v20 = vmul.f32 %v8081_v30, %v8071_v56  ;;  %v2403_v35 = vpop.permute.xlu0 %2402 }
 0x6dd   : > { %7394 = vmatprep.mubr.msk.f32.mxu1 %vm1378_vm5, %v2042_v29 }
 0x6de   : > { %v8083_v31 = vpop.eup %8082 }
 0x6df   : > { %v2044_v21 = vmul.f32 %v8083_v31, %v8077_v62  ;;  %v2245_v24 = vpop.permute.xlu1 %2244  ;;  %v8085_v32 = vpop.eup %8084 }
 0x6e0   : > { %7404 = vmatprep.subr.bf16.mxu0 %v2245_v24  ;;  %v2048_v33 = vmul.f32 %v8085_v32, %v8075_v59  ;;  %v2251_v43 = vpop.permute.xlu0 %2250 }
 0x6e1   : > { %7395 = vmatmul.mubr.msk.f32.vlgmr.msra.gmra.mrb[20].mxu1 %vm1378_vm5, %v2044_v21  ;;  %7405 = vmatpush3.bf16.msra.mxu0 %v2245_v24 }
 0x6e2   : > { %7783 = vmatpush3.bf16.msra.mxu1 %v7780_v19  ;;  %7401 = vmatprep.mubr.msk.f32.mxu1 %vm1378_vm5, %v2046_v20 }
 0x6e3   : > { %7412 = vmatprep.subr.bf16.mxu1 %v2323_v25  ;;  %7406 = vmatprep.subr.bf16.mxu0 %v2247_v22  ;;  %v2401_v34 = vpop.permute.xlu1 %2400 }
 0x6e5   : > { %7402 = vmatmul.mubr.msk.f32.vlgmr.msra.gmra.mrb[22].mxu1 %vm1378_vm5, %v2048_v33  ;;  %7407 = vmatpush3.bf16.msra.mxu0 %v2247_v22 }
 0x6e6   : > { %7413 = vmatpush3.bf16.msra.mxu1 %v2323_v25  ;;  %7416 = vmatprep.mubr.msk.bf16.mxu1 %vm995_vm1, %v8852_v9 }
 0x6e7   : > { %7414 = vmatprep.subr.bf16.mxu1 %v2325_v27  ;;  %7420 = vmatprep.subr.bf16.mxu0 %v2401_v34  ;;  %v2329_v51 = vpop.permute.xlu1 %2328 }
 0x6e8   : > { %7409 = vmatmul.mubr.msk.bf16.vlgmr.msra.gmra.mrb[16].mxu0 %vm995_vm1, %v8859_v12 }
 0x6e9   : > { %7424 = vmatprep.mubr.msk.bf16.mxu0 %vm995_vm1, %v8852_v9  ;;  %7421 = vmatpush3.bf16.msra.mxu0 %v2401_v34 }
 0x6ea   : > { %7415 = vmatpush3.bf16.msra.mxu1 %v2325_v27  ;;  %7422 = vmatprep.subr.bf16.mxu0 %v2403_v35 }
 0x6ed   : > { %7417 = vmatmul.mubr.msk.bf16.vlgmr.msra.gmra.mrb[24].mxu1 %vm995_vm1, %v8859_v12  ;;  %7423 = vmatpush3.bf16.msra.mxu0 %v2403_v35 }
 0x6f0   : > { %7425 = vmatmul.mubr.msk.bf16.vlgmr.msra.gmra.mrb[20].mxu0 %vm995_vm1, %v8859_v12 }
 0x7b4   : > { %v9033_v36 = vpop.f32.mrb[20].mxu1 }
 0x7b5   : > { %v9035_v37 = vpop.f32.mrb[21].mxu1 }
 0x7b6   : > { %v2211_v38 = vpack.c.bf16 %v9033_v36, %v9035_v37 }
 0x7b8   : > { %v9039_v40 = vpop.f32.mrb[22].mxu1 }
 0x7b9   : > { %v9041_v41 = vpop.f32.mrb[23].mxu1 }
 0x7ba   : > { %v2212_v44 = vpack.c.bf16 %v9039_v40, %v9041_v41 }
 0x7bb   : > { %v7410_v45 = vpop.f32.mrb[16].mxu0 }
 0x7bc   : > { %v2287_v46 = vpop.f32.mrb[17].mxu0  ;;  %v2296_v47 = vadd.f32 %v7410_v45, %v2251_v43 }
 0x7bd   : > { %v7411_v48 = vpop.f32.mrb[18].mxu0  ;;  %v2288_v49 = vadd.f32 %v2287_v46, %v2251_v43 }
 0x7be   : > { %v2290_v50 = vpop.f32.mrb[19].mxu0  ;;  %7439 = vmatprep.mubr.msk.f32.mxu0 %vm1195_vm2, %v2296_v47  ;;  %v2299_v62 = vadd.f32 %v7411_v48, %v2251_v43 }
 0x7bf   : > { %7432 = vmatprep.mubr.msk.f32.mxu1 %vm1195_vm2, %v2288_v49  ;;  %v2291_v63 = vadd.f32 %v2290_v50, %v2251_v43 }
 0x7c0   : > { %v7418_v52 = vpop.f32.mrb[24].mxu1 }
 0x7c1   : > { %v2365_v39 = vpop.f32.mrb[25].mxu1  ;;  %v2374_v55 = vadd.f32 %v7418_v52, %v2329_v51 }
 0x7c2   : > { %v7419_v53 = vpop.f32.mrb[26].mxu1  ;;  %v2366_v58 = vadd.f32 %v2365_v39, %v2329_v51 }
 0x7c3   : > { %v2377_v56 = vadd.f32 %v7419_v53, %v2329_v51  ;;  %v2368_v57 = vpop.f32.mrb[27].mxu1  ;;  %v7426_v0 = vpop.f32.mrb[20].mxu0 }
 0x7c4   : > { %v2369_v59 = vadd.f32 %v2368_v57, %v2329_v51  ;;  %v2443_v1 = vpop.f32.mrb[21].mxu0 }
 0x7c5   : > { %v7790_v60 = vpack.c.bf16 %v2377_v56, %v2374_v55  ;;  %v7427_v2 = vpop.f32.mrb[22].mxu0 }
 0x7c6   : > { %v7784_v61 = vpack.c.bf16 %v2369_v59, %v2366_v58  ;;  %v2446_v3 = vpop.f32.mrb[23].mxu0  ;;  %v8017_v59 = vld [vmem:[%s8793_s29 + $0x8] sm:$0xff]  }
 0x7c7   : > { %7792 = vmatprep.subr.msk.bf16.mxu0 %vm8897_vm3, %v7790_v60 }
 0x7c8   : > { %7786 = vmatprep.subr.msk.bf16.mxu1 %vm8897_vm3, %v7784_v61  ;;  %7795 = vmatpush3.bf16.xpose.msk.msra.mxu0 %vm8897_vm3, %v7790_v60  ;;  %v8018_v60 = vld [vmem:[%s8788_s5] sm:$0xff]  }
 0x7c9   : > { %7789 = vmatpush3.bf16.xpose.msk.msra.mxu1 %vm8897_vm3, %v7784_v61  ;;  %v8019_v61 = vld [vmem:[%s8788_s5 + $0x8] sm:$0xff]  }
 0x7cf   : > { %7440 = vmatmul.mubr.msk.f32.vlgmr.msra.gmra.mrb[24].mxu0 %vm1195_vm2, %v2299_v62  ;;  %v8016_v62 = vld [vmem:[%s8793_s29] sm:$0xff]  }
 0x7d0   : > { %7433 = vmatmul.mubr.msk.f32.vlgmr.msra.gmra.mrb[28].mxu1 %vm1195_vm2, %v2291_v63  ;;  %7460 = vmatprep.mubr.msk.bf16.mxu0 %vm995_vm1, %v8852_v9  ;;  %v8020_v63 = vld [vmem:[%s8755_s20] sm:$0xff]  }
 0x8a2   : > { %v7441_v4 = vpop.f32.mrb[24].mxu0 }
 0x8a3   : > { %v7434_v5 = vpop.f32.mrb[28].mxu1  ;;  %v2623_v6 = vpop.f32.mrb[25].mxu0  ;;  %v2635_v15 = vmul.f32 0.5, %v7441_v4 }
 0x8a4   : > { %v2633_v7 = vmul.f32 0.5, %v7434_v5  ;;  %v2634_v8 = vmul.f32 0.5, %v2623_v6  ;;  %v2536_v10 = vpop.f32.mrb[29].mxu1 }
 0x8a5   : > { %v2632_v11 = vmul.f32 0.5, %v2536_v10  ;;  %v2639_v26 = vadd.f32 %v2635_v15, %v8916_v54 }
 0x8a6   : > { %v2637_v13 = vadd.f32 %v2633_v7, %v8916_v54  ;;  %v2638_v18 = vadd.f32 %v2634_v8, %v8916_v54 }
 0x8a7   : > { %v2636_v14 = vadd.f32 %v2632_v11, %v8916_v54  ;;  %v2649_v27 = vsel %vm1378_vm5, %v2639_v26, -inf }
 0x8a8   : > { %v2643_v17 = vsel %vm1378_vm5, %v2637_v13, -inf  ;;  %v2646_v25 = vsel %vm1378_vm5, %v2638_v18, -inf }
 0x8a9   : > { %2644 = vmax.xlane.f32.xlu0 %v2643_v17  ;;  %v2640_v19 = vsel %vm1378_vm5, %v2636_v14, -inf }
 0x8aa   : > { %2641 = vmax.xlane.f32.xlu1 %v2640_v19 }
 0x8ad   : > { %2647 = vmax.xlane.f32.xlu0 %v2646_v25 }
 0x8b1   : > { %2650 = vmax.xlane.f32.xlu0 %v2649_v27 }
 0x8bb   : > { %2406 = vrot.lane.b32.xlu1 %v8880_v23, %s8422_s10  ;;  %s9754_s10 = smov %s9753_s26 }
 0x936   : > { %v2645_v29 = vpop.xlane.xlu0 %2644 }
 0x937   : > { %v2642_v30 = vpop.xlane.xlu1 %2641  ;;  %v2653_v34 = vsub.f32 %v2637_v13, %v2645_v29 }
 0x938   : > { %v2652_v31 = vsub.f32 %v2636_v14, %v2642_v30 }
 0x939   : > { %v2658_v23 = vmul.f32 1.442695, %v2653_v34 }
 0x93a   : > { %v2648_v21 = vpop.xlane.xlu0 %2647  ;;  %v2656_v35 = vmul.f32 1.442695, %v2652_v31 }
 0x93b   : > { %v2654_v24 = vsub.f32 %v2638_v18, %v2648_v21  ;;  %v2407_v32 = vpop.permute.xlu1 %2406 }
 0x93c   : > { %v2444_v20 = vadd.f32 %v2443_v1, %v2407_v32  ;;  %v2447_v22 = vadd.f32 %v2446_v3, %v2407_v32  ;;  %v2452_v33 = vadd.f32 %v7426_v0, %v2407_v32  ;;  %v2455_v45 = vadd.f32 %v7427_v2, %v2407_v32  ;;  %v8021_v0 = vld [vmem:[%s8755_s20 + $0x8] sm:$0xff]  }
 0x93d   : > { %v2660_v43 = vmul.f32 1.442695, %v2654_v24 }
 0x93e   : > { %v2651_v46 = vpop.xlane.xlu0 %2650  ;;  %v7796_v47 = vpack.c.bf16 %v2447_v22, %v2444_v20  ;;  %v9069_v49 = vpack.c.bf16 %v2455_v45, %v2452_v33 }
 0x93f   : > { %8086 = vpow2.f32 %v2660_v43  ;;  %v2655_v48 = vsub.f32 %v2639_v26, %v2651_v46 }
 0x940   : > { %7797 = vmatprep.subr.bf16.mxu1 %v7796_v47  ;;  %8088 = vpow2.f32 %v2656_v35 }
 0x941   : > { %v2662_v50 = vmul.f32 1.442695, %v2655_v48  ;;  %7799 = vmatpush3.bf16.msra.mxu1 %v7796_v47 }
 0x942   : > { %7801 = vmatprep.subr.bf16.mxu1 %v9069_v49 }
 0x943   : > { %8090 = vpow2.f32 %v2662_v50 }
 0x944   : > { %8092 = vpow2.f32 %v2658_v23 }
 0x949   : > { %v8087_v51 = vpop.eup %8086 }
 0x94a   : > { %v2670_v52 = vsel %vm1378_vm5, %v8087_v51, 0.0  ;;  %v8089_v39 = vpop.eup %8088 }
 0x94b   : > { %2671 = vadd.xlane.f32.xlu1 %v2670_v52  ;;  %v2664_v56 = vsel %vm1378_vm5, %v8089_v39, 0.0 }
 0x94d   : > { %v8091_v53 = vpop.eup %8090 }
 0x94e   : > { %v2673_v55 = vsel %vm1378_vm5, %v8091_v53, 0.0  ;;  %v8093_v57 = vpop.eup %8092 }
 0x94f   : > { %2674 = vadd.xlane.f32.xlu0 %v2673_v55  ;;  %2665 = vadd.xlane.f32.xlu1 %v2664_v56  ;;  %v2667_v58 = vsel %vm1378_vm5, %v8093_v57, 0.0 }
 0x953   : > { %2668 = vadd.xlane.f32.xlu0 %v2667_v58 }
 0x960   : > { %2959 = vrot.lane.b32.xlu1 %v8017_v59, %s8423_s3 }
 0x964   : > { %2879 = vrot.lane.b32.xlu1 %v8018_v60, %s8423_s3 }
 0x968   : > { %2881 = vrot.lane.b32.xlu1 %v8019_v61, %s8423_s3 }
 0x969   : > { %2957 = vrot.lane.b32.xlu0 %v8016_v62, %s8423_s3 }
 0x96c   : > { %3037 = vrot.lane.b32.xlu1 %v8021_v0, %s8423_s3 }
 0x96d   : > { %3035 = vrot.lane.b32.xlu0 %v8020_v63, %s8423_s3 }
 0x970   : > { %2885 = vrot.lane.b32.xlu1 %v8873_v16, %s8423_s3 }
 0x971   : > { %2963 = vrot.lane.b32.xlu0 %v8884_v28, %s8423_s3 }
 0x9d8   : > { %v2672_v1 = vpop.xlane.xlu1 %2671 }
 0x9dc   : > { %v2675_v2 = vpop.xlane.xlu0 %2674  ;;  %v2666_v3 = vpop.xlane.xlu1 %2665 }
 0x9dd   : > { %8094 = vrcp.f32 %v2666_v3 }
 0x9de   : > { %8096 = vrcp.f32 %v2672_v1 }
 0x9e0   : > { %v2669_v4 = vpop.xlane.xlu0 %2668  ;;  %v2960_v5 = vpop.permute.xlu1 %2959 }
 0x9e1   : > { %8098 = vrcp.f32 %v2669_v4 }
 0x9e2   : > { %8100 = vrcp.f32 %v2675_v2 }
 0x9e4   : > { %v2880_v6 = vpop.permute.xlu1 %2879  ;;  %v2958_v15 = vpop.permute.xlu0 %2957 }
 0x9e5   : > { %7456 = vmatprep.subr.bf16.mxu0 %v2880_v6 }
 0x9e6   : > { %7457 = vmatpush3.bf16.msra.mxu0 %v2880_v6 }
 0x9e7   : > { %v8095_v7 = vpop.eup %8094 }
 0x9e8   : > { %v2882_v8 = vpop.permute.xlu1 %2881  ;;  %v2677_v10 = vmul.f32 %v8095_v7, %v8089_v39  ;;  %v8097_v28 = vpop.eup %8096 }
 0x9e9   : > { %7458 = vmatprep.subr.bf16.mxu0 %v2882_v8  ;;  %v2681_v14 = vmul.f32 %v8097_v28, %v8087_v51  ;;  %v3036_v18 = vpop.permute.xlu0 %3035 }
 0x9ea   : > { %7459 = vmatpush3.bf16.msra.mxu0 %v2882_v8  ;;  %7446 = vmatprep.mubr.msk.f32.mxu1 %vm1378_vm5, %v2677_v10 }
 0x9eb   : > { %v8099_v11 = vpop.eup %8098  ;;  %7472 = vmatprep.subr.bf16.mxu0 %v3036_v18 }
 0x9ec   : > { %v2679_v16 = vmul.f32 %v8099_v11, %v8093_v57  ;;  %v8101_v13 = vpop.eup %8100  ;;  %v3038_v19 = vpop.permute.xlu1 %3037 }
 0x9ed   : > { %7461 = vmatmul.mubr.msk.bf16.vlgmr.msra.gmra.mrb[28].mxu0 %vm995_vm1, %v8859_v12  ;;  %v2683_v17 = vmul.f32 %v8101_v13, %v8091_v53  ;;  %v2964_v35 = vpop.permute.xlu0 %2963 }
 0x9ee   : > { %7447 = vmatmul.mubr.msk.f32.vlgmr.msra.gmra.mrb[30].mxu1 %vm1378_vm5, %v2679_v16  ;;  %7476 = vmatprep.mubr.msk.bf16.mxu0 %vm995_vm1, %v8852_v9 }
 0x9ef   : > { %7803 = vmatpush3.bf16.msra.mxu1 %v9069_v49  ;;  %7453 = vmatprep.mubr.msk.f32.mxu1 %vm1378_vm5, %v2681_v14 }
 0x9f0   : > { %7464 = vmatprep.subr.bf16.mxu1 %v2958_v15  ;;  %7473 = vmatpush3.bf16.msra.mxu0 %v3036_v18  ;;  %v2886_v25 = vpop.permute.xlu1 %2885 }
 0x9f1   : > { %7474 = vmatprep.subr.bf16.mxu0 %v3038_v19 }
 0x9f2   : > { %7454 = vmatmul.mubr.msk.f32.vlgmr.msra.gmra.mrb[32].mxu1 %vm1378_vm5, %v2683_v17 }
 0x9f3   : > { %7465 = vmatpush3.bf16.msra.mxu1 %v2958_v15  ;;  %7468 = vmatprep.mubr.msk.bf16.mxu1 %vm995_vm1, %v8852_v9 }
 0x9f4   : > { %7466 = vmatprep.subr.bf16.mxu1 %v2960_v5  ;;  %7475 = vmatpush3.bf16.msra.mxu0 %v3038_v19 }
 0x9f7   : > { %7467 = vmatpush3.bf16.msra.mxu1 %v2960_v5  ;;  %7477 = vmatmul.mubr.msk.bf16.vlgmr.msra.gmra.mrb[32].mxu0 %vm995_vm1, %v8859_v12 }
 0x9fa   : > { %7469 = vmatmul.mubr.msk.bf16.vlgmr.msra.gmra.mrb[36].mxu1 %vm995_vm1, %v8859_v12 }
 0xac0   : > { %v7462_v26 = vpop.f32.mrb[28].mxu0 }
 0xac1   : > { %v9107_v27 = vpop.f32.mrb[30].mxu1  ;;  %v2922_v29 = vpop.f32.mrb[29].mxu0  ;;  %v2931_v30 = vadd.f32 %v7462_v26, %v2886_v25 }
 0xac2   : > { %v9109_v31 = vpop.f32.mrb[31].mxu1  ;;  %v7463_v21 = vpop.f32.mrb[30].mxu0  ;;  %v2923_v24 = vadd.f32 %v2922_v29, %v2886_v25 }
 0xac3   : > { %v2846_v32 = vpack.c.bf16 %v9107_v27, %v9109_v31  ;;  %v2925_v20 = vpop.f32.mrb[31].mxu0  ;;  %7491 = vmatprep.mubr.msk.f32.mxu0 %vm1195_vm2, %v2931_v30  ;;  %v2934_v39 = vadd.f32 %v7463_v21, %v2886_v25 }
 0xac4   : > { %7484 = vmatprep.mubr.msk.f32.mxu1 %vm1195_vm2, %v2923_v24  ;;  %v2926_v53 = vadd.f32 %v2925_v20, %v2886_v25 }
 0xac5   : > { %v9115_v22 = vpop.f32.mrb[32].mxu1 }
 0xac6   : > { %v9117_v33 = vpop.f32.mrb[33].mxu1 }
 0xac7   : > { %v2847_v34 = vpack.c.bf16 %v9115_v22, %v9117_v33 }
 0xaca   : > { %v9133_v55 = vpop.f32.mrb[32].mxu0 }
 0xacb   : > { %v9135_v56 = vpop.f32.mrb[33].mxu0 }
 0xacc   : > { %v9137_v57 = vpop.f32.mrb[34].mxu0 }
 0xacd   : > { %v7470_v43 = vpop.f32.mrb[36].mxu1  ;;  %v9139_v58 = vpop.f32.mrb[35].mxu0 }
 0xace   : > { %v3000_v45 = vpop.f32.mrb[37].mxu1  ;;  %v3009_v47 = vadd.f32 %v7470_v43, %v2964_v35 }
 0xacf   : > { %v7471_v46 = vpop.f32.mrb[38].mxu1  ;;  %v3001_v23 = vadd.f32 %v3000_v45, %v2964_v35 }
 0xad0   : > { %v3012_v48 = vadd.f32 %v7471_v46, %v2964_v35  ;;  %v3003_v49 = vpop.f32.mrb[39].mxu1 }
 0xad1   : > { %v3004_v50 = vadd.f32 %v3003_v49, %v2964_v35  ;;  %v9158_v49 = vld [vmem:[%s8805_s25] ss:$0 sm:$0xff] }
 0xad2   : > { %v7810_v51 = vpack.c.bf16 %v3012_v48, %v3009_v47  ;;  %v8022_v48 = vld [vmem:[%s8793_s29] sm:$0xff]  }
 0xad3   : > { %v7804_v52 = vpack.c.bf16 %v3004_v50, %v3001_v23  ;;  %v8023_v23 = vld [vmem:[%s8793_s29 + $0x8] sm:$0xff]  }
 0xad4   : > { %7812 = vmatprep.subr.msk.bf16.mxu0 %vm8897_vm3, %v7810_v51  ;;  %v8025_v50 = vld [vmem:[%s8788_s5 + $0x8] sm:$0xff]  }
 0xad5   : > { %7806 = vmatprep.subr.msk.bf16.mxu1 %vm8897_vm3, %v7804_v52  ;;  %7815 = vmatpush3.bf16.xpose.msk.msra.mxu0 %vm8897_vm3, %v7810_v51  ;;  %v8024_v51 = vld [vmem:[%s8788_s5] sm:$0xff]  }
 0xad6   : > { %7809 = vmatpush3.bf16.xpose.msk.msra.mxu1 %vm8897_vm3, %v7804_v52  ;;  %v8026_v52 = vld [vmem:[%s8755_s20] sm:$0xff]  }
 0xadc   : > { %7492 = vmatmul.mubr.msk.f32.vlgmr.msra.gmra.mrb[26].mxu0 %vm1195_vm2, %v2934_v39  ;;  %v8027_v39 = vld [vmem:[%s8755_s20 + $0x8] sm:$0xff]  }
 0xadd   : > { %7485 = vmatmul.mubr.msk.f32.vlgmr.msra.gmra.mrb[34].mxu1 %vm1195_vm2, %v2926_v53  ;;  %7512 = vmatprep.mubr.msk.bf16.mxu0 %vm995_vm1, %v8852_v9  ;;  %v9174_v53 = vld [vmem:[%s8799_s23] ss:$0 sm:$0xff]  ;;  %s8425_s23 = smov 108  }
 0xbaf   : > { %v7493_v59 = vpop.f32.mrb[26].mxu0 }
 0xbb0   : > { %v7486_v60 = vpop.f32.mrb[34].mxu1  ;;  %v3258_v61 = vpop.f32.mrb[27].mxu0  ;;  %v3270_v5 = vmul.f32 0.5, %v7493_v59  ;;  %v9177_v59 = vld [vmem:[%s8783_s22] ss:$0 sm:$0xff]  ;;  %s8426_s22 = smov 104  }
 0xbb1   : > { %v3268_v62 = vmul.f32 0.5, %v7486_v60  ;;  %v3171_v63 = vpop.f32.mrb[35].mxu1  ;;  %v3269_v0 = vmul.f32 0.5, %v3258_v61 }
 0xbb2   : > { %v3267_v1 = vmul.f32 0.5, %v3171_v63  ;;  %v3274_v10 = vadd.f32 %v3270_v5, %v8916_v54 }
 0xbb3   : > { %v3272_v2 = vadd.f32 %v3268_v62, %v8916_v54  ;;  %v3273_v7 = vadd.f32 %v3269_v0, %v8916_v54 }
 0xbb4   : > { %v3271_v3 = vadd.f32 %v3267_v1, %v8916_v54  ;;  %v3284_v28 = vsel %vm1378_vm5, %v3274_v10, -inf }
 0xbb5   : > { %v3278_v4 = vsel %vm1378_vm5, %v3272_v2, -inf  ;;  %v3281_v8 = vsel %vm1378_vm5, %v3273_v7, -inf }
 0xbb6   : > { %3279 = vmax.xlane.f32.xlu1 %v3278_v4  ;;  %v3275_v6 = vsel %vm1378_vm5, %v3271_v3, -inf }
 0xbb7   : > { %3276 = vmax.xlane.f32.xlu0 %v3275_v6 }
 0xbbb   : > { %3282 = vmax.xlane.f32.xlu0 %v3281_v8 }
 0xbbf   : > { %3285 = vmax.xlane.f32.xlu0 %v3284_v28 }
 0xc43   : > { %v3280_v13 = vpop.xlane.xlu1 %3279 }
 0xc44   : > { %v3277_v11 = vpop.xlane.xlu0 %3276  ;;  %v3288_v17 = vsub.f32 %v3272_v2, %v3280_v13 }
 0xc45   : > { %v3287_v16 = vsub.f32 %v3271_v3, %v3277_v11 }
 0xc46   : > { %v3293_v29 = vmul.f32 1.442695, %v3288_v17 }
 0xc47   : > { %v3291_v18 = vmul.f32 1.442695, %v3287_v16 }
 0xc48   : > { %v3283_v14 = vpop.xlane.xlu0 %3282 }
 0xc49   : > { %v3289_v15 = vsub.f32 %v3273_v7, %v3283_v14 }
 0xc4b   : > { %v3295_v19 = vmul.f32 1.442695, %v3289_v15 }
 0xc4c   : > { %v3286_v25 = vpop.xlane.xlu0 %3285 }
 0xc4d   : > { %8102 = vpow2.f32 %v3295_v19  ;;  %v3290_v26 = vsub.f32 %v3274_v10, %v3286_v25 }
 0xc4e   : > { %8104 = vpow2.f32 %v3291_v18 }
 0xc4f   : > { %v3297_v30 = vmul.f32 1.442695, %v3290_v26 }
 0xc51   : > { %8106 = vpow2.f32 %v3297_v30 }
 0xc52   : > { %8108 = vpow2.f32 %v3293_v29 }
 0xc57   : > { %v8103_v21 = vpop.eup %8102 }
 0xc58   : > { %v3305_v24 = vsel %vm1378_vm5, %v8103_v21, 0.0  ;;  %v8105_v20 = vpop.eup %8104 }
 0xc59   : > { %3306 = vadd.xlane.f32.xlu0 %v3305_v24  ;;  %v3299_v43 = vsel %vm1378_vm5, %v8105_v20, 0.0 }
 0xc5b   : > { %v9150_v35 = vpop.eup %8106 }
 0xc5c   : > { %v3308_v45 = vsel %vm1378_vm5, %v9150_v35, 0.0  ;;  %v8109_v46 = vpop.eup %8108 }
 0xc5d   : > { %3300 = vadd.xlane.f32.xlu0 %v3299_v43  ;;  %3309 = vadd.xlane.f32.xlu1 %v3308_v45  ;;  %v3302_v47 = vsel %vm1378_vm5, %v8109_v46, 0.0 }
 0xc61   : > { %3303 = vadd.xlane.f32.xlu1 %v3302_v47 }
 0xc72   : > { %3592 = vrot.lane.b32.xlu1 %v8022_v48, %s8424_s14 }
 0xc73   : > { %3041 = vrot.lane.b32.xlu0 %v9158_v49, %s8423_s3 }
 0xc76   : > { %3594 = vrot.lane.b32.xlu1 %v8023_v23, %s8424_s14 }
 0xc77   : > { %3516 = vrot.lane.b32.xlu0 %v8025_v50, %s8424_s14 }
 0xc7a   : > { %3514 = vrot.lane.b32.xlu1 %v8024_v51, %s8424_s14 }
 0xc7b   : > { %3672 = vrot.lane.b32.xlu0 %v8027_v39, %s8424_s14 }
 0xc7e   : > { %3670 = vrot.lane.b32.xlu1 %v8026_v52, %s8424_s14 }
 0xc7f   : > { %3520 = vrot.lane.b32.xlu0 %v9177_v59, %s8424_s14 }
 0xc82   : > { %3598 = vrot.lane.b32.xlu1 %v9174_v53, %s8424_s14 }
 0xce6   : > { %v3307_v60 = vpop.xlane.xlu0 %3306 }
 0xcea   : > { %v3310_v61 = vpop.xlane.xlu1 %3309  ;;  %v3301_v62 = vpop.xlane.xlu0 %3300 }
 0xceb   : > { %8110 = vrcp.f32 %v3301_v62 }
 0xcec   : > { %8112 = vrcp.f32 %v3307_v60 }
 0xcee   : > { %v3304_v63 = vpop.xlane.xlu1 %3303  ;;  %v3042_v0 = vpop.permute.xlu0 %3041 }
 0xcef   : > { %8114 = vrcp.f32 %v3304_v63  ;;  %v3079_v1 = vadd.f32 %v9135_v56, %v3042_v0  ;;  %v3082_v2 = vadd.f32 %v9139_v58, %v3042_v0  ;;  %v3087_v3 = vadd.f32 %v9133_v55, %v3042_v0 }
 0xcf0   : > { %v3090_v4 = vadd.f32 %v9137_v57, %v3042_v0  ;;  %8116 = vrcp.f32 %v3310_v61 }
 0xcf1   : > { %v7816_v5 = vpack.c.bf16 %v3082_v2, %v3079_v1 }
 0xcf2   : > { %v7820_v6 = vpack.c.bf16 %v3090_v4, %v3087_v3  ;;  %v3593_v7 = vpop.permute.xlu1 %3592  ;;  %v3517_v57 = vpop.permute.xlu0 %3516 }
 0xcf3   : > { %7817 = vmatprep.subr.bf16.mxu1 %v7816_v5 }
 0xcf4   : > { %7819 = vmatpush3.bf16.msra.mxu1 %v7816_v5 }
 0xcf5   : > { %7821 = vmatprep.subr.bf16.mxu1 %v7820_v6  ;;  %v8111_v8 = vpop.eup %8110 }
 0xcf6   : > { %v3595_v10 = vpop.permute.xlu1 %3594  ;;  %v3312_v28 = vmul.f32 %v8111_v8, %v8105_v20  ;;  %v8113_v11 = vpop.eup %8112 }
 0xcf7   : > { %v3316_v55 = vmul.f32 %v8113_v11, %v8103_v21  ;;  %v3673_v17 = vpop.permute.xlu0 %3672 }
 0xcf8   : > { %7498 = vmatprep.mubr.msk.f32.mxu1 %vm1378_vm5, %v3312_v28 }
 0xcf9   : > { %v8115_v16 = vpop.eup %8114 }
 0xcfa   : > { %v3314_v56 = vmul.f32 %v8115_v16, %v8109_v46  ;;  %v3515_v58 = vpop.permute.xlu1 %3514  ;;  %v8117_v13 = vpop.eup %8116 }
 0xcfb   : > { %7508 = vmatprep.subr.bf16.mxu0 %v3515_v58  ;;  %v3318_v14 = vmul.f32 %v8117_v13, %v9150_v35  ;;  %v3521_v30 = vpop.permute.xlu0 %3520 }
 0xcfc   : > { %7499 = vmatmul.mubr.msk.f32.vlgmr.msra.gmra.mrb[40].mxu1 %vm1378_vm5, %v3314_v56  ;;  %7509 = vmatpush3.bf16.msra.mxu0 %v3515_v58 }
 0xcfd   : > { %7823 = vmatpush3.bf16.msra.mxu1 %v7820_v6  ;;  %7505 = vmatprep.mubr.msk.f32.mxu1 %vm1378_vm5, %v3316_v55 }
 0xcfe   : > { %7516 = vmatprep.subr.bf16.mxu1 %v3593_v7  ;;  %7510 = vmatprep.subr.bf16.mxu0 %v3517_v57  ;;  %v3671_v15 = vpop.permute.xlu1 %3670 }
 0xd00   : > { %7506 = vmatmul.mubr.msk.f32.vlgmr.msra.gmra.mrb[42].mxu1 %vm1378_vm5, %v3318_v14  ;;  %7511 = vmatpush3.bf16.msra.mxu0 %v3517_v57 }
 0xd01   : > { %7517 = vmatpush3.bf16.msra.mxu1 %v3593_v7  ;;  %7520 = vmatprep.mubr.msk.bf16.mxu1 %vm995_vm1, %v8852_v9 }
 0xd02   : > { %7518 = vmatprep.subr.bf16.mxu1 %v3595_v10  ;;  %7524 = vmatprep.subr.bf16.mxu0 %v3671_v15  ;;  %v3599_v47 = vpop.permute.xlu1 %3598 }
 0xd03   : > { %7513 = vmatmul.mubr.msk.bf16.vlgmr.msra.gmra.mrb[36].mxu0 %vm995_vm1, %v8859_v12 }
 0xd04   : > { %7528 = vmatprep.mubr.msk.bf16.mxu0 %vm995_vm1, %v8852_v9  ;;  %7525 = vmatpush3.bf16.msra.mxu0 %v3671_v15 }
 0xd05   : > { %7519 = vmatpush3.bf16.msra.mxu1 %v3595_v10  ;;  %7526 = vmatprep.subr.bf16.mxu0 %v3673_v17 }
 0xd08   : > { %7521 = vmatmul.mubr.msk.bf16.vlgmr.msra.gmra.mrb[44].mxu1 %vm995_vm1, %v8859_v12  ;;  %7527 = vmatpush3.bf16.msra.mxu0 %v3673_v17 }
 0xd0b   : > { %7529 = vmatmul.mubr.msk.bf16.vlgmr.msra.gmra.mrb[40].mxu0 %vm995_vm1, %v8859_v12 }
 0xdcf   : > { %v9202_v18 = vpop.f32.mrb[40].mxu1 }
 0xdd0   : > { %v9204_v19 = vpop.f32.mrb[41].mxu1 }
 0xdd1   : > { %v3481_v25 = vpack.c.bf16 %v9202_v18, %v9204_v19 }
 0xdd3   : > { %v9208_v26 = vpop.f32.mrb[42].mxu1 }
 0xdd4   : > { %v9210_v29 = vpop.f32.mrb[43].mxu1 }
 0xdd5   : > { %v3482_v21 = vpack.c.bf16 %v9208_v26, %v9210_v29 }
 0xdd6   : > { %v7514_v24 = vpop.f32.mrb[36].mxu0 }
 0xdd7   : > { %v3557_v20 = vpop.f32.mrb[37].mxu0  ;;  %v3566_v35 = vadd.f32 %v7514_v24, %v3521_v30 }
 0xdd8   : > { %v7515_v43 = vpop.f32.mrb[38].mxu0  ;;  %v3558_v45 = vadd.f32 %v3557_v20, %v3521_v30 }
 0xdd9   : > { %v3560_v46 = vpop.f32.mrb[39].mxu0  ;;  %7543 = vmatprep.mubr.msk.f32.mxu0 %vm1195_vm2, %v3566_v35  ;;  %v3569_v0 = vadd.f32 %v7515_v43, %v3521_v30 }
 0xdda   : > { %7536 = vmatprep.mubr.msk.f32.mxu1 %vm1195_vm2, %v3558_v45  ;;  %v3561_v1 = vadd.f32 %v3560_v46, %v3521_v30 }
 0xddb   : > { %v7522_v48 = vpop.f32.mrb[44].mxu1 }
 0xddc   : > { %v3635_v23 = vpop.f32.mrb[45].mxu1  ;;  %v3644_v51 = vadd.f32 %v7522_v48, %v3599_v47 }
 0xddd   : > { %v7523_v50 = vpop.f32.mrb[46].mxu1  ;;  %v3636_v60 = vadd.f32 %v3635_v23, %v3599_v47 }
 0xdde   : > { %v3647_v52 = vadd.f32 %v7523_v50, %v3599_v47  ;;  %v3638_v39 = vpop.f32.mrb[47].mxu1  ;;  %v7530_v2 = vpop.f32.mrb[40].mxu0 }
 0xddf   : > { %v3639_v61 = vadd.f32 %v3638_v39, %v3599_v47  ;;  %v3713_v3 = vpop.f32.mrb[41].mxu0 }
 0xde0   : > { %v7830_v62 = vpack.c.bf16 %v3647_v52, %v3644_v51  ;;  %v7531_v4 = vpop.f32.mrb[42].mxu0 }
 0xde1   : > { %v7824_v63 = vpack.c.bf16 %v3639_v61, %v3636_v60  ;;  %v3716_v5 = vpop.f32.mrb[43].mxu0 }
 0xde2   : > { %7832 = vmatprep.subr.msk.bf16.mxu0 %vm8897_vm3, %v7830_v62 }
 0xde3   : > { %7826 = vmatprep.subr.msk.bf16.mxu1 %vm8897_vm3, %v7824_v63  ;;  %7835 = vmatpush3.bf16.xpose.msk.msra.mxu0 %vm8897_vm3, %v7830_v62 }
 0xde4   : > { %7829 = vmatpush3.bf16.xpose.msk.msra.mxu1 %vm8897_vm3, %v7824_v63 }
 0xdea   : > { %7544 = vmatmul.mubr.msk.f32.vlgmr.msra.gmra.mrb[44].mxu0 %vm1195_vm2, %v3569_v0 }
 0xdeb   : > { %7537 = vmatmul.mubr.msk.f32.vlgmr.msra.gmra.mrb[48].mxu1 %vm1195_vm2, %v3561_v1  ;;  %7564 = vmatprep.mubr.msk.bf16.mxu0 %vm995_vm1, %v8852_v9 }
 0xebd   : > { %v7545_v6 = vpop.f32.mrb[44].mxu0 }
 0xebe   : > { %v7538_v7 = vpop.f32.mrb[48].mxu1  ;;  %v3893_v8 = vpop.f32.mrb[45].mxu0  ;;  %v3905_v13 = vmul.f32 0.5, %v7545_v6 }
 0xebf   : > { %v3903_v10 = vmul.f32 0.5, %v7538_v7  ;;  %v3904_v28 = vmul.f32 0.5, %v3893_v8  ;;  %v3806_v11 = vpop.f32.mrb[49].mxu1 }
 0xec0   : > { %v3902_v16 = vmul.f32 0.5, %v3806_v11  ;;  %v3909_v17 = vadd.f32 %v3905_v13, %v8916_v54  ;;  %v8030_v11 = vld [vmem:[%s8788_s5] sm:$0xff]   ;;  %v8033_v13 = vld [vmem:[%s8755_s20 + $0x8] sm:$0xff]  }
 0xec1   : > { %v3907_v56 = vadd.f32 %v3903_v10, %v8916_v54  ;;  %v3908_v57 = vadd.f32 %v3904_v28, %v8916_v54  ;;  %v8029_v28 = vld [vmem:[%s8793_s29 + $0x8] sm:$0xff]  }
 0xec2   : > { %v3906_v58 = vadd.f32 %v3902_v16, %v8916_v54  ;;  %v3919_v30 = vsel %vm1378_vm5, %v3909_v17, -inf  ;;  %v8031_v16 = vld [vmem:[%s8788_s5 + $0x8] sm:$0xff]  }
 0xec3   : > { %v3913_v55 = vsel %vm1378_vm5, %v3907_v56, -inf  ;;  %v3916_v15 = vsel %vm1378_vm5, %v3908_v57, -inf }
 0xec4   : > { %3914 = vmax.xlane.f32.xlu0 %v3913_v55  ;;  %v3910_v14 = vsel %vm1378_vm5, %v3906_v58, -inf }
 0xec5   : > { %3911 = vmax.xlane.f32.xlu1 %v3910_v14 }
 0xec8   : > { %3917 = vmax.xlane.f32.xlu0 %v3916_v15 }
 0xecc   : > { %3920 = vmax.xlane.f32.xlu0 %v3919_v30 }
 0xed6   : > { %3676 = vrot.lane.b32.xlu1 %v9158_v49, %s8424_s14 }
 0xf51   : > { %v3915_v24 = vpop.xlane.xlu0 %3914 }
 0xf52   : > { %v3912_v20 = vpop.xlane.xlu1 %3911  ;;  %v3923_v50 = vsub.f32 %v3907_v56, %v3915_v24  ;;  %v8028_v56 = vld [vmem:[%s8793_s29] sm:$0xff]  }
 0xf53   : > { %v3922_v35 = vsub.f32 %v3906_v58, %v3912_v20  ;;  %v8032_v58 = vld [vmem:[%s8755_s20] sm:$0xff]  }
 0xf54   : > { %v3928_v0 = vmul.f32 1.442695, %v3923_v50 }
 0xf55   : > { %v3918_v43 = vpop.xlane.xlu0 %3917  ;;  %v3926_v51 = vmul.f32 1.442695, %v3922_v35 }
 0xf56   : > { %v3924_v45 = vsub.f32 %v3908_v57, %v3918_v43  ;;  %v3677_v46 = vpop.permute.xlu1 %3676 }
 0xf57   : > { %v3714_v47 = vadd.f32 %v3713_v3, %v3677_v46  ;;  %v3722_v48 = vadd.f32 %v7530_v2, %v3677_v46  ;;  %v3717_v23 = vadd.f32 %v3716_v5, %v3677_v46  ;;  %v3725_v39 = vadd.f32 %v7531_v4, %v3677_v46 }
 0xf58   : > { %v3930_v52 = vmul.f32 1.442695, %v3924_v45 }
 0xf59   : > { %v3921_v60 = vpop.xlane.xlu0 %3920  ;;  %v7836_v61 = vpack.c.bf16 %v3717_v23, %v3714_v47  ;;  %v9238_v63 = vpack.c.bf16 %v3725_v39, %v3722_v48 }
 0xf5a   : > { %8118 = vpow2.f32 %v3930_v52  ;;  %v3925_v62 = vsub.f32 %v3909_v17, %v3921_v60 }
 0xf5b   : > { %7837 = vmatprep.subr.bf16.mxu1 %v7836_v61  ;;  %8120 = vpow2.f32 %v3926_v51 }
 0xf5c   : > { %v3932_v1 = vmul.f32 1.442695, %v3925_v62  ;;  %7839 = vmatpush3.bf16.msra.mxu1 %v7836_v61 }
 0xf5d   : > { %7841 = vmatprep.subr.bf16.mxu1 %v9238_v63 }
 0xf5e   : > { %8122 = vpow2.f32 %v3932_v1 }
 0xf5f   : > { %8124 = vpow2.f32 %v3928_v0 }
 0xf64   : > { %v8119_v2 = vpop.eup %8118 }
 0xf65   : > { %v3940_v3 = vsel %vm1378_vm5, %v8119_v2, 0.0  ;;  %v8121_v4 = vpop.eup %8120 }
 0xf66   : > { %3941 = vadd.xlane.f32.xlu1 %v3940_v3  ;;  %v3934_v7 = vsel %vm1378_vm5, %v8121_v4, 0.0 }
 0xf68   : > { %v8123_v5 = vpop.eup %8122 }
 0xf69   : > { %v3943_v6 = vsel %vm1378_vm5, %v8123_v5, 0.0  ;;  %v8125_v8 = vpop.eup %8124 }
 0xf6a   : > { %3944 = vadd.xlane.f32.xlu0 %v3943_v6  ;;  %3935 = vadd.xlane.f32.xlu1 %v3934_v7  ;;  %v3937_v10 = vsel %vm1378_vm5, %v8125_v8, 0.0 }
 0xf6e   : > { %3938 = vadd.xlane.f32.xlu0 %v3937_v10 }
 0xf7b   : > { %4229 = vrot.lane.b32.xlu1 %v8029_v28, %s8425_s23 }
 0xf7f   : > { %4149 = vrot.lane.b32.xlu1 %v8030_v11, %s8425_s23 }
 0xf83   : > { %4151 = vrot.lane.b32.xlu1 %v8031_v16, %s8425_s23 }
 0xf84   : > { %4227 = vrot.lane.b32.xlu0 %v8028_v56, %s8425_s23 }
 0xf87   : > { %4307 = vrot.lane.b32.xlu1 %v8033_v13, %s8425_s23 }
 0xf88   : > { %4305 = vrot.lane.b32.xlu0 %v8032_v58, %s8425_s23 }
 0xf8b   : > { %4155 = vrot.lane.b32.xlu1 %v9177_v59, %s8425_s23 }
 0xf8c   : > { %4233 = vrot.lane.b32.xlu0 %v9174_v53, %s8425_s23 }
 0xff3   : > { %v3942_v55 = vpop.xlane.xlu1 %3941 }
 0xff7   : > { %v3945_v57 = vpop.xlane.xlu0 %3944  ;;  %v3936_v14 = vpop.xlane.xlu1 %3935 }
 0xff8   : > { %8126 = vrcp.f32 %v3936_v14 }
 0xff9   : > { %8128 = vrcp.f32 %v3942_v55 }
 0xffb   : > { %v3939_v15 = vpop.xlane.xlu0 %3938  ;;  %v4230_v17 = vpop.permute.xlu1 %4229 }
 0xffc   : > { %8130 = vrcp.f32 %v3939_v15 }
 0xffd   : > { %8132 = vrcp.f32 %v3945_v57 }
 0xfff   : > { %v4150_v30 = vpop.permute.xlu1 %4149  ;;  %v4228_v23 = vpop.permute.xlu0 %4227 }
0x1000   : > { %7560 = vmatprep.subr.bf16.mxu0 %v4150_v30 }
0x1001   : > { %7561 = vmatpush3.bf16.msra.mxu0 %v4150_v30 }
0x1002   : > { %v8127_v24 = vpop.eup %8126 }
0x1003   : > { %v4152_v20 = vpop.permute.xlu1 %4151  ;;  %v3947_v35 = vmul.f32 %v8127_v24, %v8121_v4  ;;  %v8129_v43 = vpop.eup %8128 }
0x1004   : > { %7562 = vmatprep.subr.bf16.mxu0 %v4152_v20  ;;  %v3951_v48 = vmul.f32 %v8129_v43, %v8119_v2  ;;  %v4306_v51 = vpop.permute.xlu0 %4305 }
0x1005   : > { %7563 = vmatpush3.bf16.msra.mxu0 %v4152_v20  ;;  %7550 = vmatprep.mubr.msk.f32.mxu1 %vm1378_vm5, %v3947_v35 }
0x1006   : > { %v8131_v45 = vpop.eup %8130  ;;  %7576 = vmatprep.subr.bf16.mxu0 %v4306_v51 }
0x1007   : > { %v3949_v46 = vmul.f32 %v8131_v45, %v8125_v8  ;;  %v8133_v47 = vpop.eup %8132  ;;  %v4308_v52 = vpop.permute.xlu1 %4307 }
0x1008   : > { %7565 = vmatmul.mubr.msk.bf16.vlgmr.msra.gmra.mrb[48].mxu0 %vm995_vm1, %v8859_v12  ;;  %v3953_v50 = vmul.f32 %v8133_v47, %v8123_v5  ;;  %v4234_v8 = vpop.permute.xlu0 %4233 }
0x1009   : > { %7551 = vmatmul.mubr.msk.f32.vlgmr.msra.gmra.mrb[50].mxu1 %vm1378_vm5, %v3949_v46  ;;  %7580 = vmatprep.mubr.msk.bf16.mxu0 %vm995_vm1, %v8852_v9 }
0x100a   : > { %7843 = vmatpush3.bf16.msra.mxu1 %v9238_v63  ;;  %7557 = vmatprep.mubr.msk.f32.mxu1 %vm1378_vm5, %v3951_v48 }
0x100b   : > { %7568 = vmatprep.subr.bf16.mxu1 %v4228_v23  ;;  %7577 = vmatpush3.bf16.msra.mxu0 %v4306_v51  ;;  %v4156_v39 = vpop.permute.xlu1 %4155 }
0x100c   : > { %7578 = vmatprep.subr.bf16.mxu0 %v4308_v52 }
0x100d   : > { %7558 = vmatmul.mubr.msk.f32.vlgmr.msra.gmra.mrb[52].mxu1 %vm1378_vm5, %v3953_v50 }
0x100e   : > { %7569 = vmatpush3.bf16.msra.mxu1 %v4228_v23  ;;  %7572 = vmatprep.mubr.msk.bf16.mxu1 %vm995_vm1, %v8852_v9 }
0x100f   : > { %7570 = vmatprep.subr.bf16.mxu1 %v4230_v17  ;;  %7579 = vmatpush3.bf16.msra.mxu0 %v4308_v52 }
0x1012   : > { %7571 = vmatpush3.bf16.msra.mxu1 %v4230_v17  ;;  %7581 = vmatmul.mubr.msk.bf16.vlgmr.msra.gmra.mrb[52].mxu0 %vm995_vm1, %v8859_v12 }
0x1015   : > { %7573 = vmatmul.mubr.msk.bf16.vlgmr.msra.gmra.mrb[56].mxu1 %vm995_vm1, %v8859_v12 }
0x10db   : > { %v7566_v60 = vpop.f32.mrb[48].mxu0 }
0x10dc   : > { %v9276_v61 = vpop.f32.mrb[50].mxu1  ;;  %v4192_v62 = vpop.f32.mrb[49].mxu0  ;;  %v4201_v63 = vadd.f32 %v7566_v60, %v4156_v39 }
0x10dd   : > { %v9278_v0 = vpop.f32.mrb[51].mxu1  ;;  %v7567_v1 = vpop.f32.mrb[50].mxu0  ;;  %v4193_v2 = vadd.f32 %v4192_v62, %v4156_v39 }
0x10de   : > { %v4116_v3 = vpack.c.bf16 %v9276_v61, %v9278_v0  ;;  %v4195_v4 = vpop.f32.mrb[51].mxu0  ;;  %7595 = vmatprep.mubr.msk.f32.mxu0 %vm1195_vm2, %v4201_v63  ;;  %v4204_v15 = vadd.f32 %v7567_v1, %v4156_v39 }
0x10df   : > { %7588 = vmatprep.mubr.msk.f32.mxu1 %vm1195_vm2, %v4193_v2  ;;  %v4196_v17 = vadd.f32 %v4195_v4, %v4156_v39 }
0x10e0   : > { %v9284_v5 = vpop.f32.mrb[52].mxu1 }
0x10e1   : > { %v9286_v6 = vpop.f32.mrb[53].mxu1 }
0x10e2   : > { %v4117_v7 = vpack.c.bf16 %v9284_v5, %v9286_v6 }
0x10e5   : > { %v9302_v30 = vpop.f32.mrb[52].mxu0 }
0x10e6   : > { %v9304_v24 = vpop.f32.mrb[53].mxu0 }
0x10e7   : > { %v9306_v20 = vpop.f32.mrb[54].mxu0 }
0x10e8   : > { %v7574_v10 = vpop.f32.mrb[56].mxu1  ;;  %v9308_v35 = vpop.f32.mrb[55].mxu0 }
0x10e9   : > { %v4270_v28 = vpop.f32.mrb[57].mxu1  ;;  %v4279_v16 = vadd.f32 %v7574_v10, %v4234_v8 }
0x10ea   : > { %v7575_v11 = vpop.f32.mrb[58].mxu1  ;;  %v4271_v13 = vadd.f32 %v4270_v28, %v4234_v8 }
0x10eb   : > { %v4282_v56 = vadd.f32 %v7575_v11, %v4234_v8  ;;  %v4273_v58 = vpop.f32.mrb[59].mxu1 }
0x10ec   : > { %v4274_v55 = vadd.f32 %v4273_v58, %v4234_v8 }
0x10ed   : > { %v7850_v57 = vpack.c.bf16 %v4282_v56, %v4279_v16 }
0x10ee   : > { %v7844_v14 = vpack.c.bf16 %v4274_v55, %v4271_v13 }
0x10ef   : > { %7852 = vmatprep.subr.msk.bf16.mxu0 %vm8897_vm3, %v7850_v57 }
0x10f0   : > { %7846 = vmatprep.subr.msk.bf16.mxu1 %vm8897_vm3, %v7844_v14  ;;  %7855 = vmatpush3.bf16.xpose.msk.msra.mxu0 %vm8897_vm3, %v7850_v57 }
0x10f1   : > { %7849 = vmatpush3.bf16.xpose.msk.msra.mxu1 %vm8897_vm3, %v7844_v14 }
0x10f7   : > { %7596 = vmatmul.mubr.msk.f32.vlgmr.msra.gmra.mrb[46].mxu0 %vm1195_vm2, %v4204_v15 }
0x10f8   : > { %7589 = vmatmul.mubr.msk.f32.vlgmr.msra.gmra.mrb[54].mxu1 %vm1195_vm2, %v4196_v17  ;;  %7616 = vmatprep.mubr.msk.bf16.mxu0 %vm995_vm1, %v8852_v9 }
0x11ca   : > { %v7597_v43 = vpop.f32.mrb[46].mxu0 }
0x11cb   : > { %v7590_v45 = vpop.f32.mrb[54].mxu1  ;;  %v4528_v46 = vpop.f32.mrb[47].mxu0  ;;  %v4540_v60 = vmul.f32 0.5, %v7597_v43 }
0x11cc   : > { %v4538_v47 = vmul.f32 0.5, %v7590_v45  ;;  %v4441_v48 = vpop.f32.mrb[55].mxu1  ;;  %v4539_v23 = vmul.f32 0.5, %v4528_v46 }
0x11cd   : > { %v4537_v50 = vmul.f32 0.5, %v4441_v48  ;;  %v4544_v2 = vadd.f32 %v4540_v60, %v8916_v54  ;;  %v8036_v60 = vld [vmem:[%s8788_s5] sm:$0xff]  }
0x11ce   : > { %v4542_v51 = vadd.f32 %v4538_v47, %v8916_v54  ;;  %v4543_v63 = vadd.f32 %v4539_v23, %v8916_v54 }
0x11cf   : > { %v4541_v52 = vadd.f32 %v4537_v50, %v8916_v54  ;;  %v4554_v4 = vsel %vm1378_vm5, %v4544_v2, -inf }
0x11d0   : > { %v4548_v39 = vsel %vm1378_vm5, %v4542_v51, -inf  ;;  %v4551_v1 = vsel %vm1378_vm5, %v4543_v63, -inf }
0x11d1   : > { %4549 = vmax.xlane.f32.xlu1 %v4548_v39  ;;  %v4545_v62 = vsel %vm1378_vm5, %v4541_v52, -inf  ;;  %v8037_v39 = vld [vmem:[%s8788_s5 + $0x8] sm:$0xff]  }
0x11d2   : > { %4546 = vmax.xlane.f32.xlu0 %v4545_v62  ;;  %v8038_v62 = vld [vmem:[%s8755_s20] sm:$0xff]  }
0x11d6   : > { %4552 = vmax.xlane.f32.xlu0 %v4551_v1 }
0x11da   : > { %4555 = vmax.xlane.f32.xlu0 %v4554_v4 }
0x125e   : > { %v4550_v28 = vpop.xlane.xlu1 %4549 }
0x125f   : > { %v4547_v8 = vpop.xlane.xlu0 %4546  ;;  %v4558_v56 = vsub.f32 %v4542_v51, %v4550_v28  ;;  %v8034_v51 = vld [vmem:[%s8793_s29] sm:$0xff]  }
0x1260   : > { %v4557_v10 = vsub.f32 %v4541_v52, %v4547_v8  ;;  %v8035_v52 = vld [vmem:[%s8793_s29 + $0x8] sm:$0xff]  }
0x1261   : > { %v4563_v14 = vmul.f32 1.442695, %v4558_v56 }
0x1262   : > { %v4561_v58 = vmul.f32 1.442695, %v4557_v10 }
0x1263   : > { %v4553_v11 = vpop.xlane.xlu0 %4552 }
0x1264   : > { %v4559_v16 = vsub.f32 %v4543_v63, %v4553_v11  ;;  %v8039_v63 = vld [vmem:[%s8755_s20 + $0x8] sm:$0xff]  }
0x1266   : > { %v4565_v13 = vmul.f32 1.442695, %v4559_v16 }
0x1267   : > { %v4556_v55 = vpop.xlane.xlu0 %4555 }
0x1268   : > { %8134 = vpow2.f32 %v4565_v13  ;;  %v4560_v57 = vsub.f32 %v4544_v2, %v4556_v55 }
0x1269   : > { %8136 = vpow2.f32 %v4561_v58 }
0x126a   : > { %v4567_v15 = vmul.f32 1.442695, %v4560_v57 }
0x126c   : > { %8138 = vpow2.f32 %v4567_v15 }
0x126d   : > { %8140 = vpow2.f32 %v4563_v14 }
0x1272   : > { %v8135_v17 = vpop.eup %8134 }
0x1273   : > { %v4575_v43 = vsel %vm1378_vm5, %v8135_v17, 0.0  ;;  %v8137_v45 = vpop.eup %8136 }
0x1274   : > { %4576 = vadd.xlane.f32.xlu0 %v4575_v43  ;;  %v4569_v47 = vsel %vm1378_vm5, %v8137_v45, 0.0 }
0x1276   : > { %v8139_v46 = vpop.eup %8138 }
0x1277   : > { %v4578_v48 = vsel %vm1378_vm5, %v8139_v46, 0.0  ;;  %v8141_v23 = vpop.eup %8140 }
0x1278   : > { %4570 = vadd.xlane.f32.xlu0 %v4569_v47  ;;  %4579 = vadd.xlane.f32.xlu1 %v4578_v48  ;;  %v4572_v50 = vsel %vm1378_vm5, %v8141_v23, 0.0 }
0x127c   : > { %4573 = vadd.xlane.f32.xlu1 %v4572_v50 }
0x128d   : > { %4862 = vrot.lane.b32.xlu1 %v8034_v51, %s8426_s22 }
0x128e   : > { %4311 = vrot.lane.b32.xlu0 %v9158_v49, %s8425_s23 }
0x1291   : > { %4864 = vrot.lane.b32.xlu1 %v8035_v52, %s8426_s22 }
0x1292   : > { %4786 = vrot.lane.b32.xlu0 %v8037_v39, %s8426_s22 }
0x1295   : > { %4784 = vrot.lane.b32.xlu1 %v8036_v60, %s8426_s22 }
0x1296   : > { %4942 = vrot.lane.b32.xlu0 %v8039_v63, %s8426_s22 }
0x1299   : > { %4940 = vrot.lane.b32.xlu1 %v8038_v62, %s8426_s22 }
0x129a   : > { %4790 = vrot.lane.b32.xlu0 %v9177_v59, %s8426_s22 }
0x129d   : > { %4868 = vrot.lane.b32.xlu1 %v9174_v53, %s8426_s22 }
0x1301   : > { %v4577_v1 = vpop.xlane.xlu0 %4576 }
0x1305   : > { %v4580_v2 = vpop.xlane.xlu1 %4579  ;;  %v4571_v4 = vpop.xlane.xlu0 %4570 }
0x1306   : > { %8142 = vrcp.f32 %v4571_v4 }
0x1307   : > { %8144 = vrcp.f32 %v4577_v1 }
0x1309   : > { %v4574_v8 = vpop.xlane.xlu1 %4573  ;;  %v4312_v10 = vpop.permute.xlu0 %4311 }
0x130a   : > { %8146 = vrcp.f32 %v4574_v8  ;;  %v4349_v28 = vadd.f32 %v9304_v24, %v4312_v10  ;;  %v4357_v11 = vadd.f32 %v9302_v30, %v4312_v10  ;;  %v4352_v16 = vadd.f32 %v9308_v35, %v4312_v10 }
0x130b   : > { %v4360_v56 = vadd.f32 %v9306_v20, %v4312_v10  ;;  %8148 = vrcp.f32 %v4580_v2 }
0x130c   : > { %v7856_v58 = vpack.c.bf16 %v4352_v16, %v4349_v28 }
0x130d   : > { %v7860_v13 = vpack.c.bf16 %v4360_v56, %v4357_v11  ;;  %v4863_v55 = vpop.permute.xlu1 %4862  ;;  %v4787_v20 = vpop.permute.xlu0 %4786 }
0x130e   : > { %7857 = vmatprep.subr.bf16.mxu1 %v7856_v58 }
0x130f   : > { %7859 = vmatpush3.bf16.msra.mxu1 %v7856_v58 }
0x1310   : > { %7861 = vmatprep.subr.bf16.mxu1 %v7860_v13  ;;  %v8143_v57 = vpop.eup %8142 }
0x1311   : > { %v4865_v14 = vpop.permute.xlu1 %4864  ;;  %v4582_v15 = vmul.f32 %v8143_v57, %v8137_v45  ;;  %v8145_v43 = vpop.eup %8144 }
0x1312   : > { %v4586_v35 = vmul.f32 %v8145_v43, %v8135_v17  ;;  %v4943_v45 = vpop.permute.xlu0 %4942 }
0x1313   : > { %7602 = vmatprep.mubr.msk.f32.mxu1 %vm1378_vm5, %v4582_v15 }
0x1314   : > { %v8147_v47 = vpop.eup %8146 }
0x1315   : > { %v4584_v24 = vmul.f32 %v8147_v47, %v8141_v23  ;;  %v4785_v30 = vpop.permute.xlu1 %4784  ;;  %v8149_v48 = vpop.eup %8148 }
0x1316   : > { %7612 = vmatprep.subr.bf16.mxu0 %v4785_v30  ;;  %v4588_v50 = vmul.f32 %v8149_v48, %v8139_v46  ;;  %v4791_v60 = vpop.permute.xlu0 %4790 }
0x1317   : > { %7603 = vmatmul.mubr.msk.f32.vlgmr.msra.gmra.mrb[60].mxu1 %vm1378_vm5, %v4584_v24  ;;  %7613 = vmatpush3.bf16.msra.mxu0 %v4785_v30 }
0x1318   : > { %7863 = vmatpush3.bf16.msra.mxu1 %v7860_v13  ;;  %7609 = vmatprep.mubr.msk.f32.mxu1 %vm1378_vm5, %v4586_v35 }
0x1319   : > { %7620 = vmatprep.subr.bf16.mxu1 %v4863_v55  ;;  %7614 = vmatprep.subr.bf16.mxu0 %v4787_v20  ;;  %v4941_v17 = vpop.permute.xlu1 %4940 }
0x131b   : > { %7610 = vmatmul.mubr.msk.f32.vlgmr.msra.gmra.mrb[62].mxu1 %vm1378_vm5, %v4588_v50  ;;  %7615 = vmatpush3.bf16.msra.mxu0 %v4787_v20 }
0x131c   : > { %7621 = vmatpush3.bf16.msra.mxu1 %v4863_v55  ;;  %7624 = vmatprep.mubr.msk.bf16.mxu1 %vm995_vm1, %v8852_v9 }
0x131d   : > { %7622 = vmatprep.subr.bf16.mxu1 %v4865_v14  ;;  %7628 = vmatprep.subr.bf16.mxu0 %v4941_v17  ;;  %v4869_v28 = vpop.permute.xlu1 %4868 }
0x131e   : > { %7617 = vmatmul.mubr.msk.bf16.vlgmr.msra.gmra.mrb[56].mxu0 %vm995_vm1, %v8859_v12 }
0x131f   : > { %7632 = vmatprep.mubr.msk.bf16.mxu0 %vm995_vm1, %v8852_v9  ;;  %7629 = vmatpush3.bf16.msra.mxu0 %v4941_v17 }
0x1320   : > { %7623 = vmatpush3.bf16.msra.mxu1 %v4865_v14  ;;  %7630 = vmatprep.subr.bf16.mxu0 %v4943_v45 }
0x1323   : > { %7625 = vmatmul.mubr.msk.bf16.vlgmr.msra.gmra.mrb[64].mxu1 %vm995_vm1, %v8859_v12  ;;  %7631 = vmatpush3.bf16.msra.mxu0 %v4943_v45 }
0x1326   : > { %7633 = vmatmul.mubr.msk.bf16.vlgmr.msra.gmra.mrb[60].mxu0 %vm995_vm1, %v8859_v12 }
0x13ea   : > { %v9358_v46 = vpop.f32.mrb[60].mxu1 }
0x13eb   : > { %v9360_v23 = vpop.f32.mrb[61].mxu1 }
0x13ec   : > { %v4751_v51 = vpack.c.bf16 %v9358_v46, %v9360_v23 }
0x13ee   : > { %v9364_v52 = vpop.f32.mrb[62].mxu1 }
0x13ef   : > { %v9366_v39 = vpop.f32.mrb[63].mxu1 }
0x13f0   : > { %v4752_v62 = vpack.c.bf16 %v9364_v52, %v9366_v39 }
0x13f1   : > { %v7618_v63 = vpop.f32.mrb[56].mxu0 }
0x13f2   : > { %v4827_v1 = vpop.f32.mrb[57].mxu0  ;;  %v4836_v2 = vadd.f32 %v7618_v63, %v4791_v60 }
0x13f3   : > { %v7619_v4 = vpop.f32.mrb[58].mxu0  ;;  %v4828_v8 = vadd.f32 %v4827_v1, %v4791_v60 }
0x13f4   : > { %v4830_v10 = vpop.f32.mrb[59].mxu0  ;;  %7647 = vmatprep.mubr.msk.f32.mxu0 %vm1195_vm2, %v4836_v2  ;;  %v4839_v47 = vadd.f32 %v7619_v4, %v4791_v60 }
0x13f5   : > { %7640 = vmatprep.mubr.msk.f32.mxu1 %vm1195_vm2, %v4828_v8  ;;  %v4831_v24 = vadd.f32 %v4830_v10, %v4791_v60 }
0x13f6   : > { %v7626_v11 = vpop.f32.mrb[64].mxu1 }
0x13f7   : > { %v4905_v16 = vpop.f32.mrb[65].mxu1  ;;  %v4914_v58 = vadd.f32 %v7626_v11, %v4869_v28 }
0x13f8   : > { %v7627_v56 = vpop.f32.mrb[66].mxu1  ;;  %v4906_v57 = vadd.f32 %v4905_v16, %v4869_v28 }
0x13f9   : > { %v4917_v13 = vadd.f32 %v7627_v56, %v4869_v28  ;;  %v4908_v55 = vpop.f32.mrb[67].mxu1  ;;  %v7634_v30 = vpop.f32.mrb[60].mxu0 }
0x13fa   : > { %v4909_v14 = vadd.f32 %v4908_v55, %v4869_v28  ;;  %v4983_v48 = vpop.f32.mrb[61].mxu0 }
0x13fb   : > { %v7870_v15 = vpack.c.bf16 %v4917_v13, %v4914_v58  ;;  %v7635_v35 = vpop.f32.mrb[62].mxu0 }
0x13fc   : > { %v7864_v43 = vpack.c.bf16 %v4909_v14, %v4906_v57  ;;  %v4986_v20 = vpop.f32.mrb[63].mxu0 }
0x13fd   : > { %7872 = vmatprep.subr.msk.bf16.mxu0 %vm8897_vm3, %v7870_v15 }
0x13fe   : > { %7866 = vmatprep.subr.msk.bf16.mxu1 %vm8897_vm3, %v7864_v43  ;;  %7875 = vmatpush3.bf16.xpose.msk.msra.mxu0 %vm8897_vm3, %v7870_v15 }
0x13ff   : > { %7869 = vmatpush3.bf16.xpose.msk.msra.mxu1 %vm8897_vm3, %v7864_v43 }
0x1405   : > { %7648 = vmatmul.mubr.msk.f32.vlgmr.msra.gmra.mrb[64].mxu0 %vm1195_vm2, %v4839_v47 }
0x1406   : > { %7641 = vmatmul.mubr.msk.f32.vlgmr.msra.gmra.mrb[68].mxu1 %vm1195_vm2, %v4831_v24  ;;  %7668 = vmatprep.mubr.msk.bf16.mxu0 %vm995_vm1, %v8852_v9 }
0x14d8   : > { %v7649_v50 = vpop.f32.mrb[64].mxu0 }
0x14d9   : > { %v7642_v17 = vpop.f32.mrb[68].mxu1  ;;  %v5163_v45 = vpop.f32.mrb[65].mxu0  ;;  %v5175_v10 = vmul.f32 0.5, %v7649_v50 }
0x14da   : > { %v5173_v63 = vmul.f32 0.5, %v7642_v17  ;;  %v5174_v1 = vmul.f32 0.5, %v5163_v45  ;;  %v5076_v2 = vpop.f32.mrb[69].mxu1 }
0x14db   : > { %v5172_v8 = vmul.f32 0.5, %v5076_v2  ;;  %v5179_v56 = vadd.f32 %v5175_v10, %v8916_v54 }
0x14dc   : > { %v5177_v60 = vadd.f32 %v5173_v63, %v8916_v54  ;;  %v5178_v28 = vadd.f32 %v5174_v1, %v8916_v54 }
0x14dd   : > { %v5176_v4 = vadd.f32 %v5172_v8, %v8916_v54  ;;  %v5189_v13 = vsel %vm1378_vm5, %v5179_v56, -inf }
0x14de   : > { %v5183_v11 = vsel %vm1378_vm5, %v5177_v60, -inf  ;;  %v5186_v58 = vsel %vm1378_vm5, %v5178_v28, -inf }
0x14df   : > { %5184 = vmax.xlane.f32.xlu0 %v5183_v11  ;;  %v5180_v16 = vsel %vm1378_vm5, %v5176_v4, -inf }
0x14e0   : > { %5181 = vmax.xlane.f32.xlu1 %v5180_v16 }
0x14e3   : > { %5187 = vmax.xlane.f32.xlu0 %v5186_v58 }
0x14e7   : > { %5190 = vmax.xlane.f32.xlu0 %v5189_v13  ;;  %v8041_v13 = vld [vmem:[%s8793_s29 + $0x8] sm:$0xff]  }
0x14f1   : > { %4946 = vrot.lane.b32.xlu1 %v9158_v49, %s8426_s22 }
0x156c   : > { %v5185_v55 = vpop.xlane.xlu0 %5184 }
0x156d   : > { %v5182_v57 = vpop.xlane.xlu1 %5181  ;;  %v5193_v45 = vsub.f32 %v5177_v60, %v5185_v55  ;;  %v8042_v55 = vld [vmem:[%s8788_s5] sm:$0xff]  }
0x156e   : > { %v5192_v14 = vsub.f32 %v5176_v4, %v5182_v57  ;;  %v8043_v57 = vld [vmem:[%s8788_s5 + $0x8] sm:$0xff]   ;;  %s8429_s5 = smov 8  }
0x156f   : > { %v5198_v49 = vmul.f32 1.442695, %v5193_v45 }
0x1570   : > { %v5188_v15 = vpop.xlane.xlu0 %5187  ;;  %v5196_v63 = vmul.f32 1.442695, %v5192_v14  ;;  %v8040_v14 = vld [vmem:[%s8793_s29] sm:$0xff]   ;;  %s8430_s29 = smov 12  }
0x1571   : > { %v5194_v43 = vsub.f32 %v5178_v28, %v5188_v15  ;;  %v4947_v47 = vpop.permute.xlu1 %4946  ;;  %v8044_v15 = vld [vmem:[%s8755_s20] sm:$0xff]  }
0x1572   : > { %v4984_v24 = vadd.f32 %v4983_v48, %v4947_v47  ;;  %v4992_v50 = vadd.f32 %v7634_v30, %v4947_v47  ;;  %v4987_v17 = vadd.f32 %v4986_v20, %v4947_v47  ;;  %v4995_v2 = vadd.f32 %v7635_v35, %v4947_v47 }
0x1573   : > { %v5200_v1 = vmul.f32 1.442695, %v5194_v43  ;;  %v8045_v43 = vld [vmem:[%s8755_s20 + $0x8] sm:$0xff]   ;;  %s8428_s20 = smov 4  }
0x1574   : > { %v5191_v8 = vpop.xlane.xlu0 %5190  ;;  %v7876_v10 = vpack.c.bf16 %v4987_v17, %v4984_v24  ;;  %v9394_v16 = vpack.c.bf16 %v4995_v2, %v4992_v50 }
0x1575   : > { %8150 = vpow2.f32 %v5200_v1  ;;  %v5195_v11 = vsub.f32 %v5179_v56, %v5191_v8 }
0x1576   : > { %7877 = vmatprep.subr.bf16.mxu1 %v7876_v10  ;;  %8152 = vpow2.f32 %v5196_v63 }
0x1577   : > { %v5202_v4 = vmul.f32 1.442695, %v5195_v11  ;;  %7879 = vmatpush3.bf16.msra.mxu1 %v7876_v10 }
0x1578   : > { %7881 = vmatprep.subr.bf16.mxu1 %v9394_v16 }
0x1579   : > { %8154 = vpow2.f32 %v5202_v4 }
0x157a   : > { %8156 = vpow2.f32 %v5198_v49 }
0x157f   : > { %v8151_v30 = vpop.eup %8150 }
0x1580   : > { %v5210_v48 = vsel %vm1378_vm5, %v8151_v30, 0.0  ;;  %v8153_v35 = vpop.eup %8152 }
0x1581   : > { %5211 = vadd.xlane.f32.xlu1 %v5210_v48  ;;  %v5204_v28 = vsel %vm1378_vm5, %v8153_v35, 0.0 }
0x1583   : > { %v8155_v20 = vpop.eup %8154 }
0x1584   : > { %v5213_v60 = vsel %vm1378_vm5, %v8155_v20, 0.0  ;;  %v8157_v56 = vpop.eup %8156 }
0x1585   : > { %5214 = vadd.xlane.f32.xlu0 %v5213_v60  ;;  %5205 = vadd.xlane.f32.xlu1 %v5204_v28  ;;  %v5207_v58 = vsel %vm1378_vm5, %v8157_v56, 0.0 }
0x1589   : > { %5208 = vadd.xlane.f32.xlu0 %v5207_v58 }
0x1596   : > { %5499 = vrot.lane.b32.xlu1 %v8041_v13, %s8427_s1 }
0x159a   : > { %5419 = vrot.lane.b32.xlu1 %v8042_v55, %s8427_s1 }
0x159e   : > { %5421 = vrot.lane.b32.xlu1 %v8043_v57, %s8427_s1 }
0x159f   : > { %5497 = vrot.lane.b32.xlu0 %v8040_v14, %s8427_s1 }
0x15a2   : > { %5577 = vrot.lane.b32.xlu1 %v8045_v43, %s8427_s1 }
0x15a3   : > { %5575 = vrot.lane.b32.xlu0 %v8044_v15, %s8427_s1 }
0x15a6   : > { %5425 = vrot.lane.b32.xlu1 %v9177_v59, %s8427_s1 }
0x15a7   : > { %5503 = vrot.lane.b32.xlu0 %v9174_v53, %s8427_s1 }
0x160e   : > { %v5212_v47 = vpop.xlane.xlu1 %5211 }
0x1612   : > { %v5215_v24 = vpop.xlane.xlu0 %5214  ;;  %v5206_v50 = vpop.xlane.xlu1 %5205 }
0x1613   : > { %8158 = vrcp.f32 %v5206_v50 }
0x1614   : > { %8160 = vrcp.f32 %v5212_v47 }
0x1616   : > { %v5209_v17 = vpop.xlane.xlu0 %5208  ;;  %v5500_v45 = vpop.permute.xlu1 %5499 }
0x1617   : > { %8162 = vrcp.f32 %v5209_v17 }
0x1618   : > { %8164 = vrcp.f32 %v5215_v24 }
0x161a   : > { %v5420_v63 = vpop.permute.xlu1 %5419  ;;  %v5498_v4 = vpop.permute.xlu0 %5497 }
0x161b   : > { %7664 = vmatprep.subr.bf16.mxu0 %v5420_v63 }
0x161c   : > { %7665 = vmatpush3.bf16.msra.mxu0 %v5420_v63 }
0x161d   : > { %v8159_v1 = vpop.eup %8158 }
0x161e   : > { %v5422_v2 = vpop.permute.xlu1 %5421  ;;  %v5217_v8 = vmul.f32 %v8159_v1, %v8153_v35  ;;  %v8161_v53 = vpop.eup %8160 }
0x161f   : > { %7666 = vmatprep.subr.bf16.mxu0 %v5422_v2  ;;  %v5221_v49 = vmul.f32 %v8161_v53, %v8151_v30  ;;  %v5576_v30 = vpop.permute.xlu0 %5575 }
0x1620   : > { %7667 = vmatpush3.bf16.msra.mxu0 %v5422_v2  ;;  %7654 = vmatprep.mubr.msk.f32.mxu1 %vm1378_vm5, %v5217_v8 }
0x1621   : > { %v8163_v10 = vpop.eup %8162  ;;  %7680 = vmatprep.subr.bf16.mxu0 %v5576_v30 }
0x1622   : > { %v5219_v59 = vmul.f32 %v8163_v10, %v8157_v56  ;;  %v8165_v11 = vpop.eup %8164  ;;  %v5578_v35 = vpop.permute.xlu1 %5577 }
0x1623   : > { %7669 = vmatmul.mubr.msk.bf16.vlgmr.msra.gmra.mrb[68].mxu0 %vm995_vm1, %v8859_v12  ;;  %v5223_v48 = vmul.f32 %v8165_v11, %v8155_v20  ;;  %v5504_v43 = vpop.permute.xlu0 %5503 }
0x1624   : > { %7655 = vmatmul.mubr.msk.f32.vlgmr.msra.gmra.mrb[70].mxu1 %vm1378_vm5, %v5219_v59  ;;  %7684 = vmatprep.mubr.msk.bf16.mxu0 %vm995_vm1, %v8852_v9 }
0x1625   : > { %7883 = vmatpush3.bf16.msra.mxu1 %v9394_v16  ;;  %7661 = vmatprep.mubr.msk.f32.mxu1 %vm1378_vm5, %v5221_v49 }
0x1626   : > { %7672 = vmatprep.subr.bf16.mxu1 %v5498_v4  ;;  %7681 = vmatpush3.bf16.msra.mxu0 %v5576_v30  ;;  %v5426_v16 = vpop.permute.xlu1 %5425 }
0x1627   : > { %7682 = vmatprep.subr.bf16.mxu0 %v5578_v35 }
0x1628   : > { %7662 = vmatmul.mubr.msk.f32.vlgmr.msra.gmra.mrb[72].mxu1 %vm1378_vm5, %v5223_v48 }
0x1629   : > { %7673 = vmatpush3.bf16.msra.mxu1 %v5498_v4  ;;  %7676 = vmatprep.mubr.msk.bf16.mxu1 %vm995_vm1, %v8852_v9 }
0x162a   : > { %7674 = vmatprep.subr.bf16.mxu1 %v5500_v45  ;;  %7683 = vmatpush3.bf16.msra.mxu0 %v5578_v35 }
0x162d   : > { %7675 = vmatpush3.bf16.msra.mxu1 %v5500_v45  ;;  %7685 = vmatmul.mubr.msk.bf16.vlgmr.msra.gmra.mrb[72].mxu0 %vm995_vm1, %v8859_v12 }
0x1630   : > { %7677 = vmatmul.mubr.msk.bf16.vlgmr.msra.gmra.mrb[76].mxu1 %vm995_vm1, %v8859_v12 }
0x16f6   : > { %v7670_v20 = vpop.f32.mrb[68].mxu0 }
0x16f7   : > { %v9432_v60 = vpop.f32.mrb[70].mxu1  ;;  %v5462_v28 = vpop.f32.mrb[69].mxu0  ;;  %v5471_v9 = vadd.f32 %v7670_v20, %v5426_v16 }
0x16f8   : > { %v9434_v56 = vpop.f32.mrb[71].mxu1  ;;  %v7671_v58 = vpop.f32.mrb[70].mxu0  ;;  %v5463_v13 = vadd.f32 %v5462_v28, %v5426_v16 }
0x16f9   : > { %v5386_v55 = vpack.c.bf16 %v9432_v60, %v9434_v56  ;;  %v5465_v57 = vpop.f32.mrb[71].mxu0  ;;  %7699 = vmatprep.mubr.msk.f32.mxu0 %vm1195_vm2, %v5471_v9  ;;  %v5474_v10 = vadd.f32 %v7671_v58, %v5426_v16  ;;  %v8046_v56 = vld [vmem:[%s9749_s0] sm:$0xff]  }
0x16fa   : > { %7692 = vmatprep.mubr.msk.f32.mxu1 %vm1195_vm2, %v5463_v13  ;;  %v5466_v59 = vadd.f32 %v5465_v57, %v5426_v16 }
0x16fb   : > { %v9440_v14 = vpop.f32.mrb[72].mxu1 }
0x16fc   : > { %v9442_v12 = vpop.f32.mrb[73].mxu1 }
0x16fd   : > { %v5387_v15 = vpack.c.bf16 %v9440_v14, %v9442_v12 }
0x1700   : > { %v9456_v11 = vpop.f32.mrb[72].mxu0 }
0x1701   : > { %v9458_v49 = vpop.f32.mrb[73].mxu0 }
0x1702   : > { %v9460_v4 = vpop.f32.mrb[74].mxu0 }
0x1703   : > { %v7678_v47 = vpop.f32.mrb[76].mxu1  ;;  %v9462_v48 = vpop.f32.mrb[75].mxu0 }
0x1704   : > { %v5540_v24 = vpop.f32.mrb[77].mxu1  ;;  %v5549_v17 = vadd.f32 %v7678_v47, %v5504_v43 }
0x1705   : > { %v7679_v50 = vpop.f32.mrb[78].mxu1  ;;  %v5541_v1 = vadd.f32 %v5540_v24, %v5504_v43 }
0x1706   : > { %v5552_v45 = vadd.f32 %v7679_v50, %v5504_v43  ;;  %v5543_v63 = vpop.f32.mrb[79].mxu1 }
0x1707   : > { %v5544_v2 = vadd.f32 %v5543_v63, %v5504_v43 }
0x1708   : > { %v7890_v8 = vpack.c.bf16 %v5552_v45, %v5549_v17 }
0x1709   : > { %v7884_v53 = vpack.c.bf16 %v5544_v2, %v5541_v1 }
0x170a   : > { %7892 = vmatprep.subr.msk.bf16.mxu0 %vm8897_vm3, %v7890_v8 }
0x170b   : > { %7886 = vmatprep.subr.msk.bf16.mxu1 %vm8897_vm3, %v7884_v53  ;;  %7895 = vmatpush3.bf16.xpose.msk.msra.mxu0 %vm8897_vm3, %v7890_v8 }
0x170c   : > { %7889 = vmatpush3.bf16.xpose.msk.msra.mxu1 %vm8897_vm3, %v7884_v53  ;;  %7716 = vmatprep.subr.bf16.mxu0 %v8046_v56 }
0x1712   : > { %7700 = vmatmul.mubr.msk.f32.vlgmr.msra.gmra.mrb[66].mxu0 %vm1195_vm2, %v5474_v10 }
0x1713   : > { %7693 = vmatmul.mubr.msk.f32.vlgmr.msra.gmra.mrb[74].mxu1 %vm1195_vm2, %v5466_v59  ;;  %7717 = vmatpush3.bf16.msra.mxu0 %v8046_v56 }
0x17e5   : > { %v7701_v30 = vpop.f32.mrb[66].mxu0 }
0x17e6   : > { %v7694_v35 = vpop.f32.mrb[74].mxu1  ;;  %v5798_v20 = vpop.f32.mrb[67].mxu0  ;;  %v5810_v43 = vmul.f32 0.5, %v7701_v30 }
0x17e7   : > { %v5808_v28 = vmul.f32 0.5, %v7694_v35  ;;  %v5711_v42 = vpop.f32.mrb[75].mxu1  ;;  %v5809_v9 = vmul.f32 0.5, %v5798_v20 }
0x17e8   : > { %v5807_v58 = vmul.f32 0.5, %v5711_v42  ;;  %v5814_v50 = vadd.f32 %v5810_v43, %v8916_v54 }
0x17e9   : > { %v5812_v16 = vadd.f32 %v5808_v28, %v8916_v54  ;;  %v5813_v47 = vadd.f32 %v5809_v9, %v8916_v54 }
0x17ea   : > { %v5811_v13 = vadd.f32 %v5807_v58, %v8916_v54  ;;  %v5824_v45 = vsel %vm1378_vm5, %v5814_v50, -inf }
0x17eb   : > { %v5818_v57 = vsel %vm1378_vm5, %v5812_v16, -inf  ;;  %v5821_v17 = vsel %vm1378_vm5, %v5813_v47, -inf }
0x17ec   : > { %5819 = vmax.xlane.f32.xlu1 %v5818_v57  ;;  %v5815_v24 = vsel %vm1378_vm5, %v5811_v13, -inf }
0x17ed   : > { %5816 = vmax.xlane.f32.xlu0 %v5815_v24  ;;  %v7011_v24 = vld [vmem:[%s8805_s25] ss:$0 sm:$0xff]  ;;  %s8431_s25 = smov 16  }
0x17f1   : > { %5822 = vmax.xlane.f32.xlu0 %v5821_v17 }
0x17f5   : > { %5825 = vmax.xlane.f32.xlu0 %v5824_v45 }
0x1879   : > { %v5820_v63 = vpop.xlane.xlu1 %5819 }
0x187a   : > { %v5828_v1 = vsub.f32 %v5812_v16, %v5820_v63  ;;  %v5817_v2 = vpop.xlane.xlu0 %5816  ;;  %v7028_v63 = vld [vmem:[%s9752_s27] ss:$0 sm:$0xff] }
0x187b   : > { %v5827_v53 = vsub.f32 %v5811_v13, %v5817_v2 }
0x187c   : > { %v5833_v8 = vmul.f32 1.442695, %v5828_v1 }
0x187d   : > { %v5831_v30 = vmul.f32 1.442695, %v5827_v53 }
0x187e   : > { %8166 = vpow2.f32 %v5833_v8  ;;  %v5823_v10 = vpop.xlane.xlu0 %5822 }
0x187f   : > { %v5829_v59 = vsub.f32 %v5813_v47, %v5823_v10 }
0x1881   : > { %v5835_v35 = vmul.f32 1.442695, %v5829_v59  ;;  %v8198_v59 = vld [vmem:[#allocation2 + $0x10] sm:$0xff] }
0x1882   : > { %v5826_v20 = vpop.xlane.xlu0 %5825 }
0x1883   : > { %8168 = vpow2.f32 %v5835_v35  ;;  %v5830_v28 = vsub.f32 %v5814_v50, %v5826_v20  ;;  %v8199_v20 = vld [vmem:[#allocation2] sm:$0xff] }
0x1884   : > { %8170 = vpow2.f32 %v5831_v30 }
0x1885   : > { %v5837_v54 = vmul.f32 1.442695, %v5830_v28 }
0x1887   : > { %8172 = vpow2.f32 %v5837_v54 }
0x1888   : > { %v9472_v42 = vpop.eup %8166 }
0x1889   : > { %v5842_v9 = vsel %vm1378_vm5, %v9472_v42, 0.0 }
0x188a   : > { %5843 = vadd.xlane.f32.xlu1 %v5842_v9 }
0x188d   : > { %v9476_v58 = vpop.eup %8168 }
0x188e   : > { %v5845_v16 = vsel %vm1378_vm5, %v9476_v58, 0.0  ;;  %v8171_v13 = vpop.eup %8170 }
0x188f   : > { %5846 = vadd.xlane.f32.xlu0 %v5845_v16  ;;  %v5839_v43 = vsel %vm1378_vm5, %v8171_v13, 0.0 }
0x1891   : > { %v9480_v57 = vpop.eup %8172 }
0x1892   : > { %v5848_v47 = vsel %vm1378_vm5, %v9480_v57, 0.0 }
0x1893   : > { %5840 = vadd.xlane.f32.xlu0 %v5839_v43  ;;  %5849 = vadd.xlane.f32.xlu1 %v5848_v47  ;;  %v8201_v43 = vld [vmem:[#allocation2 + $0x18] sm:$0xff] }
0x18a4   : > { %2215 = vrot.lane.b32.xlu1 %v2211_v38, %s8428_s20 }
0x18a8   : > { %2217 = vrot.lane.b32.xlu1 %v2212_v44, %s8428_s20  ;;  %s9757_s20 = sld [smem:[#allocation24_spill]] }
0x18a9   : > { %5581 = vrot.lane.b32.xlu0 %v7011_v24, %s8427_s1 }
0x18ac   : > { %2850 = vrot.lane.b32.xlu1 %v2846_v32, %s8429_s5 }
0x18ad   : > { %2852 = vrot.lane.b32.xlu0 %v2847_v34, %s8429_s5  ;;  %s9759_s5 = scalar_lea.vmem %s9672_s12, %s8776_s18  ;;  %s9762_s18 = sld [smem:[#allocation40_spill]] (!%p7049_p6) }
0x18b0   : > { %3485 = vrot.lane.b32.xlu1 %v3481_v25, %s8430_s29 }
0x18b1   : > { %3487 = vrot.lane.b32.xlu0 %v3482_v21, %s8430_s29 }
0x18b4   : > { %4120 = vrot.lane.b32.xlu1 %v4116_v3, %s8431_s25 }
0x18b5   : > { %4122 = vrot.lane.b32.xlu0 %v4117_v7, %s8431_s25 }
0x18b8   : > { %4755 = vrot.lane.b32.xlu1 %v4751_v51, %s8432_s19 }
0x18b9   : > { %4757 = vrot.lane.b32.xlu0 %v4752_v62, %s8432_s19 }
0x18bc   : > { %5390 = vrot.lane.b32.xlu1 %v5386_v55, %s8433_s7  ;;  %v8047_v55 = vld [vmem:[%s9750_s4 + $0x8] sm:$0xff]  }
0x18bd   : > { %5392 = vrot.lane.b32.xlu0 %v5387_v15, %s8433_s7  ;;  %7718 = vmatprep.subr.bf16.mxu0 %v8047_v55 }
0x18be   : > { %7719 = vmatpush3.bf16.msra.mxu0 %v8047_v55 }
0x1917   : > { %v5844_v36 = vpop.xlane.xlu1 %5843 }
0x1918   : > { %8174 = vrcp.f32 %v5844_v36 }
0x191c   : > { %v5847_v37 = vpop.xlane.xlu0 %5846 }
0x191d   : > { %8176 = vrcp.f32 %v5847_v37 }
0x1920   : > { %v5850_v38 = vpop.xlane.xlu1 %5849  ;;  %v5841_v40 = vpop.xlane.xlu0 %5840 }
0x1921   : > { %8178 = vrcp.f32 %v5841_v40 }
0x1922   : > { %8180 = vrcp.f32 %v5850_v38  ;;  %v8175_v25 = vpop.eup %8174 }
0x1923   : > { %v5854_v5 = vmul.f32 %v8175_v25, %v9472_v42 }
0x1924   : > { %v2216_v41 = vpop.permute.xlu1 %2215  ;;  %v5582_v44 = vpop.permute.xlu0 %5581 }
0x1925   : > { %2222 = vst.msk [vmem:[#allocation3] sm:$0xff] %vm2221_vm6, %v2216_v41  ;;  %v5619_v27 = vadd.f32 %v9458_v49, %v5582_v44  ;;  %v5627_v31 = vadd.f32 %v9456_v11, %v5582_v44  ;;  %v5622_v32 = vadd.f32 %v9462_v48, %v5582_v44  ;;  %v5630_v22 = vadd.f32 %v9460_v4, %v5582_v44 }
0x1927   : > { %v7896_v33 = vpack.c.bf16 %v5622_v32, %v5619_v27  ;;  %v7900_v34 = vpack.c.bf16 %v5630_v22, %v5627_v31  ;;  %v8177_v26 = vpop.eup %8176 }
0x1928   : > { %v2218_v18 = vpop.permute.xlu1 %2217  ;;  %v2853_v19 = vpop.permute.xlu0 %2852  ;;  %v5856_v6 = vmul.f32 %v8177_v26, %v9476_v58  ;;  %v8200_v58 = vld [vmem:[#allocation2 + $0x8] sm:$0xff] }
0x1929   : > { %2223 = vst.msk [vmem:[#allocation3 + $0x8] sm:$0xff] %vm2221_vm6, %v2218_v18  ;;  %7897 = vmatprep.subr.bf16.mxu1 %v7896_v33 }
0x192a   : > { %2858 = vst.msk [vmem:[#allocation3 + $0x8] sm:$0xff] %vm2856_vm7, %v2853_v19  ;;  %7899 = vmatpush3.bf16.msra.mxu1 %v7896_v33 }
0x192b   : > { %7901 = vmatprep.subr.bf16.mxu1 %v7900_v34  ;;  %v8179_v29 = vpop.eup %8178 }
0x192c   : > { %v2851_v21 = vpop.permute.xlu1 %2850  ;;  %v3488_v61 = vpop.permute.xlu0 %3487  ;;  %v5852_v0 = vmul.f32 %v8179_v29, %v8171_v13 }
0x192d   : > { %2857 = vst.msk [vmem:[#allocation3] sm:$0xff] %vm2856_vm7, %v2851_v21  ;;  %v8181_v3 = vpop.eup %8180 }
0x192e   : > { %3493 = vst.msk [vmem:[#allocation3 + $0x8] sm:$0xff] %vm3491_vm8, %v3488_v61  ;;  %7706 = vmatprep.mubr.msk.f32.mxu1 %vm1378_vm5, %v5852_v0  ;;  %v5858_v23 = vmul.f32 %v8181_v3, %v9480_v57  ;;  %v8048_v3 = vld [vmem:[%s9753_s26] sm:$0xff]  }
0x192f   : > { %7707 = vmatmul.mubr.msk.f32.vlgmr.msra.gmra.mrb[80].mxu1 %vm1378_vm5, %v5854_v5  ;;  %v8049_v5 = vld [vmem:[%s9754_s10 + $0x8] sm:$0xff]  }
0x1930   : > { %v3486_v7 = vpop.permute.xlu1 %3485  ;;  %v4123_v46 = vpop.permute.xlu0 %4122  ;;  %7903 = vmatpush3.bf16.msra.mxu1 %v7900_v34  ;;  %7713 = vmatprep.mubr.msk.f32.mxu1 %vm1378_vm5, %v5856_v6  ;;  %v8050_v6 = vld [vmem:[%s8815_s24] sm:$0xff]  }
0x1931   : > { %3492 = vst.msk [vmem:[#allocation3] sm:$0xff] %vm3491_vm8, %v3486_v7  ;;  %7724 = vmatprep.subr.bf16.mxu1 %v8048_v3  ;;  %v8051_v7 = vld [vmem:[%s8815_s24 + $0x8] sm:$0xff]   ;;  %7732 = vmatprep.subr.bf16.mxu0 %v8050_v6 }
0x1932   : > { %4128 = vst.msk [vmem:[#allocation3 + $0x8] sm:$0xff] %vm4126_vm9, %v4123_v46 }
0x1933   : > { %7714 = vmatmul.mubr.msk.f32.vlgmr.msra.gmra.mrb[82].mxu1 %vm1378_vm5, %v5858_v23 }
0x1934   : > { %v4121_v51 = vpop.permute.xlu1 %4120  ;;  %v4758_v52 = vpop.permute.xlu0 %4757  ;;  %7725 = vmatpush3.bf16.msra.mxu1 %v8048_v3 }
0x1935   : > { %4127 = vst.msk [vmem:[#allocation3] sm:$0xff] %vm4126_vm9, %v4121_v51  ;;  %7726 = vmatprep.subr.bf16.mxu1 %v8049_v5 }
0x1936   : > { %4763 = vst.msk [vmem:[#allocation3 + $0x8] sm:$0xff] %vm4761_vm10, %v4758_v52 }
0x1938   : > { %v4756_v39 = vpop.permute.xlu1 %4755  ;;  %v5393_v62 = vpop.permute.xlu0 %5392  ;;  %7727 = vmatpush3.bf16.msra.mxu1 %v8049_v5 }
0x1939   : > { %4762 = vst.msk [vmem:[#allocation3] sm:$0xff] %vm4761_vm10, %v4756_v39 }
0x193a   : > { %5398 = vst.msk [vmem:[#allocation3 + $0x8] sm:$0xff] %vm5396_vm11, %v5393_v62 }
0x193c   : > { %v5391_v60 = vpop.permute.xlu1 %5390 }
0x193d   : > { %5397 = vst.msk [vmem:[#allocation3] sm:$0xff] %vm5396_vm11, %v5391_v60 }
0x1a02   : > { %v7708_v14 = vpop.f32.mrb[80].mxu1 }
0x1a03   : > { %v5931_v12 = vpop.f32.mrb[81].mxu1 }
0x1a04   : > { %v6021_v15 = vpack.c.bf16 %v7708_v14, %v5931_v12 }
0x1a06   : > { %6025 = vrot.lane.b32.xlu1 %v6021_v15, %s8434_s13  ;;  %v7715_v11 = vpop.f32.mrb[82].mxu1 }
0x1a07   : > { %v6012_v49 = vpop.f32.mrb[83].mxu1 }
0x1a08   : > { %v6022_v4 = vpack.c.bf16 %v7715_v11, %v6012_v49 }
0x1a0a   : > { %6027 = vrot.lane.b32.xlu0 %v6022_v4, %s8434_s13  ;;  %v7033_v4 = vld [vmem:[%s938_s9] ss:$0 sm:$0xff] }
0x1a78   : > { %v6026_v48 = vpop.permute.xlu1 %6025 }
0x1a79   : > { %6032 = vst.msk [vmem:[#allocation3] sm:$0xff] %vm6031_vm12, %v6026_v48 }
0x1a7c   : > { %v6028_v50 = vpop.permute.xlu0 %6027 }
0x1a7d   : > { %6033 = vst.msk [vmem:[#allocation3 + $0x8] sm:$0xff] %vm6031_vm12, %v6028_v50 }
0x1a80   : > { %v6034_v17 = vld [vmem:[#allocation3] sm:$0xff] }
0x1a81   : > { %7720 = vmatprep.mubr.msk.bf16.mxu0 %vm995_vm1, %v6034_v17 }
0x1a84   : > { %v6035_v45 = vld [vmem:[#allocation3 + $0x8] sm:$0xff] }
0x1a85   : > { %7721 = vmatmul.mubr.msk.bf16.vlgmr.msra.gmra.mrb[76].mxu0 %vm995_vm1, %v6035_v45 }
0x1a86   : > { %7733 = vmatpush3.bf16.msra.mxu0 %v8050_v6 }
0x1a87   : > { %7734 = vmatprep.subr.bf16.mxu0 %v8051_v7 }
0x1a8a   : > { %7735 = vmatpush3.bf16.msra.mxu0 %v8051_v7 }
0x1b58   : > { %v7722_v1 = vpop.f32.mrb[76].mxu0 }
0x1b59   : > { %v6108_v2 = vadd.f32 %v7722_v1, %v7028_v63  ;;  %v6099_v8 = vpop.f32.mrb[77].mxu0  ;;  %v7034_v1 = vld [vmem:[%s941_s2] ss:$0 sm:$0xff]  ;;  %s9758_s2 = scalar_lea.vmem [#allocation10], %s9757_s20 }
0x1b5a   : > { %v6100_v53 = vadd.f32 %v7028_v63, %v6099_v8  ;;  %v7723_v10 = vpop.f32.mrb[78].mxu0 }
0x1b5b   : > { %v6116_v30 = vadd.f32 %v8198_v59, %v6108_v2  ;;  %v6102_v35 = vpop.f32.mrb[79].mxu0  ;;  %v6111_v42 = vadd.f32 %v7723_v10, %v7028_v63 }
0x1b5c   : > { %v6114_v28 = vadd.f32 %v8199_v20, %v6100_v53  ;;  %v6103_v54 = vadd.f32 %v7028_v63, %v6102_v35 }
0x1b5d   : > { %v6126_v9 = vsel %vm995_vm1, %v6116_v30, 0.0  ;;  %v6117_v47 = vadd.f32 %v8201_v43, %v6111_v42 }
0x1b5e   : > { %v6115_v16 = vadd.f32 %v8200_v58, %v6103_v54  ;;  %6127 = vadd.xlane.f32.xlu0 %v6126_v9  ;;  %v6120_v13 = vsel %vm995_vm1, %v6114_v28, 0.0  ;;  %v8052_v9 = vld [vmem:[%s8815_s24 + $0x10] sm:$0xff]   ;;  %v8053_v58 = vld [vmem:[%s8815_s24 + $0x18] sm:$0xff]  }
0x1b5f   : > { %6121 = vadd.xlane.f32.xlu1 %v6120_v13  ;;  %v6129_v24 = vsel %vm995_vm1, %v6117_v47, 0.0  ;;  %7736 = vmatprep.subr.bf16.mxu0 %v8052_v9 }
0x1b60   : > { %v6123_v57 = vsel %vm995_vm1, %v6115_v16, 0.0  ;;  %7737 = vmatpush3.bf16.msra.mxu0 %v8052_v9 }
0x1b61   : > { %7738 = vmatprep.subr.bf16.mxu0 %v8053_v58 }
0x1b62   : > { %6124 = vadd.xlane.f32.xlu0 %v6123_v57 }
0x1b64   : > { %7739 = vmatpush3.bf16.msra.mxu0 %v8053_v58 }
0x1b66   : > { %6130 = vadd.xlane.f32.xlu0 %v6129_v24 }
0x1beb   : > { %v6128_v36 = vpop.xlane.xlu0 %6127 }
0x1bec   : > { %v6135_v37 = vmul.f32 0.03125, %v6128_v36  ;;  %v6122_v38 = vpop.xlane.xlu1 %6121 }
0x1bed   : > { %v6133_v40 = vmul.f32 0.03125, %v6122_v38 }
0x1bee   : > { %v6139_v41 = vsub.f32 %v6116_v30, %v6135_v37 }
0x1bef   : > { %v6137_v44 = vsub.f32 %v6114_v28, %v6133_v40  ;;  %v6125_v27 = vpop.xlane.xlu0 %6124 }
0x1bf0   : > { %v6134_v31 = vmul.f32 0.03125, %v6125_v27  ;;  %v6143_v18 = vmul.f32 %v6139_v41, %v6139_v41 }
0x1bf1   : > { %v6141_v32 = vmul.f32 %v6137_v44, %v6137_v44 }
0x1bf2   : > { %v6138_v22 = vsub.f32 %v6115_v16, %v6134_v31  ;;  %v6151_v21 = vsel %vm995_vm1, %v6143_v18, 0.0  ;;  %v7035_v16 = vld [vmem:[%s9758_s2] ss:$0 sm:$0xff] }
0x1bf3   : > { %v6131_v33 = vpop.xlane.xlu0 %6130  ;;  %v6145_v34 = vsel %vm995_vm1, %v6141_v32, 0.0 }
0x1bf4   : > { %v6136_v19 = vmul.f32 0.03125, %v6131_v33  ;;  %6146 = vadd.xlane.f32.xlu1 %v6145_v34  ;;  %v6142_v25 = vmul.f32 %v6138_v22, %v6138_v22 }
0x1bf6   : > { %v6140_v26 = vsub.f32 %v6117_v47, %v6136_v19  ;;  %v6148_v29 = vsel %vm995_vm1, %v6142_v25, 0.0 }
0x1bf7   : > { %6149 = vadd.xlane.f32.xlu0 %v6148_v29 }
0x1bf8   : > { %6152 = vadd.xlane.f32.xlu1 %v6151_v21  ;;  %v6144_v61 = vmul.f32 %v6140_v26, %v6140_v26 }
0x1bfa   : > { %v6154_v0 = vsel %vm995_vm1, %v6144_v61, 0.0 }
0x1bfb   : > { %6155 = vadd.xlane.f32.xlu0 %v6154_v0 }
0x1c81   : > { %v6147_v46 = vpop.xlane.xlu1 %6146 }
0x1c82   : > { %v6157_v23 = vmul.f32 0.03125, %v6147_v46 }
0x1c84   : > { %v6161_v51 = vadd.f32 1e-05, %v6157_v23  ;;  %v6150_v52 = vpop.xlane.xlu0 %6149 }
0x1c85   : > { %v6158_v39 = vmul.f32 0.03125, %v6150_v52  ;;  %v6153_v62 = vpop.xlane.xlu1 %6152 }
0x1c86   : > { %8182 = vrsqrt.f32 %v6161_v51  ;;  %v6159_v60 = vmul.f32 0.03125, %v6153_v62 }
0x1c87   : > { %v6162_v56 = vadd.f32 1e-05, %v6158_v39 }
0x1c88   : > { %v6163_v55 = vadd.f32 1e-05, %v6159_v60  ;;  %v6156_v14 = vpop.xlane.xlu0 %6155 }
0x1c89   : > { %8184 = vrsqrt.f32 %v6162_v56  ;;  %v6160_v12 = vmul.f32 0.03125, %v6156_v14 }
0x1c8a   : > { %8186 = vrsqrt.f32 %v6163_v55 }
0x1c8b   : > { %v6164_v15 = vadd.f32 1e-05, %v6160_v12 }
0x1c8d   : > { %8188 = vrsqrt.f32 %v6164_v15 }
0x1c90   : > { %v8183_v11 = vpop.eup %8182 }
0x1c91   : > { %v6169_v49 = vmul.f32 %v8183_v11, %v6137_v44 }
0x1c93   : > { %v8185_v48 = vpop.eup %8184  ;;  %v6179_v45 = vmul.f32 %v7033_v4, %v6169_v49 }
0x1c94   : > { %v8187_v50 = vpop.eup %8186  ;;  %v6170_v17 = vmul.f32 %v8185_v48, %v6138_v22  ;;  %v7040_v22 = vld [vmem:[%s9759_s5] ss:$0 sm:$0xff] }
0x1c95   : > { %v6171_v63 = vmul.f32 %v8187_v50, %v6139_v41  ;;  %v6189_v59 = vadd.f32 %v7034_v1, %v6179_v45 }
0x1c96   : > { %v6180_v2 = vmul.f32 %v7033_v4, %v6170_v17 }
0x1c97   : > { %v8189_v8 = vpop.eup %8188  ;;  %v6181_v53 = vmul.f32 %v7033_v4, %v6171_v63 }
0x1c98   : > { %v6172_v10 = vmul.f32 %v8189_v8, %v6140_v26  ;;  %v6190_v30 = vadd.f32 %v7034_v1, %v6180_v2 }
0x1c99   : > { %v6191_v28 = vadd.f32 %v7034_v1, %v6181_v53 }
0x1c9a   : > { %v6182_v35 = vmul.f32 %v7033_v4, %v6172_v10  ;;  %v6193_v20 = vpack.c.bf16 %v6190_v30, %v6189_v59 }
0x1c9c   : > { %7728 = vmatprep.mubr.msk.bf16.mxu1 %vm995_vm1, %v6193_v20  ;;  %v6192_v54 = vadd.f32 %v7034_v1, %v6182_v35 }
0x1c9e   : > { %v6194_v42 = vpack.c.bf16 %v6192_v54, %v6191_v28 }
0x1ca0   : > { %7729 = vmatmul.mubr.msk.bf16.vlgmr.msra.gmra.mrb[84].mxu1 %vm995_vm1, %v6194_v42 }
0x1d73   : > { %v7730_v13 = vpop.f32.mrb[84].mxu1 }
0x1d74   : > { %v6267_v57 = vadd.f32 %v7730_v13, %v7035_v16  ;;  %v6258_v43 = vpop.f32.mrb[85].mxu1  ;;  %v7047_v13 = vld [vmem:[%s944_s16] ss:$0 sm:$0xff] }
0x1d75   : > { %v6259_v47 = vadd.f32 %v7035_v16, %v6258_v43  ;;  %v7731_v24 = vpop.f32.mrb[86].mxu1 }
0x1d76   : > { %v6270_v36 = vadd.f32 %v7731_v24, %v7035_v16  ;;  %v6261_v37 = vpop.f32.mrb[87].mxu1  ;;  %v6275_v40 = vmax.f32 %v6267_v57, 0.0 }
0x1d77   : > { %v6262_v38 = vadd.f32 %v7035_v16, %v6261_v37  ;;  %v6273_v44 = vmax.f32 %v6259_v47, 0.0  ;;  %v7048_v47 = vld [vmem:[%s947_s15] ss:$0 sm:$0xff] }
0x1d78   : > { %v6276_v41 = vmax.f32 %v6270_v36, 0.0 }
0x1d79   : > { %v6274_v27 = vmax.f32 %v6262_v38, 0.0 }
0x1d7a   : > { %v6278_v31 = vpack.c.bf16 %v6276_v41, %v6275_v40 }
0x1d7b   : > { %v6277_v32 = vpack.c.bf16 %v6274_v27, %v6273_v44 }
0x1d7d   : > { %7740 = vmatprep.mubr.msk.bf16.mxu0 %vm6318_vm13, %v6277_v32 }
0x1d7e   : > { %7741 = vmatmul.mubr.msk.bf16.vlgmr.msra.gmra.mrb[80].mxu0 %vm6318_vm13, %v6278_v31 }
0x1e51   : > { %v7742_v33 = vpop.f32.mrb[80].mxu0 }
0x1e52   : > { %v6359_v34 = vpop.f32.mrb[81].mxu0  ;;  %v6368_v18 = vadd.f32 %v7742_v33, %v7040_v22 }
0x1e53   : > { %v6360_v19 = vadd.f32 %v7040_v22, %v6359_v34  ;;  %v7743_v25 = vpop.f32.mrb[82].mxu0 }
0x1e54   : > { %v6362_v26 = vpop.f32.mrb[83].mxu0  ;;  %v6371_v21 = vadd.f32 %v7743_v25, %v7040_v22  ;;  %v6376_v0 = vadd.f32 %v6368_v18, %v6191_v28 }
0x1e55   : > { %v6374_v29 = vadd.f32 %v6360_v19, %v6189_v59  ;;  %v6363_v61 = vadd.f32 %v7040_v22, %v6362_v26 }
0x1e56   : > { %v6377_v6 = vadd.f32 %v6371_v21, %v6192_v54  ;;  %v6386_v46 = vsel %vm995_vm1, %v6376_v0, 0.0 }
0x1e57   : > { %v6375_v3 = vadd.f32 %v6363_v61, %v6190_v30  ;;  %v6380_v5 = vsel %vm995_vm1, %v6374_v29, 0.0 }
0x1e58   : > { %6381 = vadd.xlane.f32.xlu1 %v6380_v5  ;;  %v6389_v23 = vsel %vm995_vm1, %v6377_v6, 0.0 }
0x1e59   : > { %v6383_v7 = vsel %vm995_vm1, %v6375_v3, 0.0 }
0x1e5a   : > { %6384 = vadd.xlane.f32.xlu0 %v6383_v7 }
0x1e5c   : > { %6387 = vadd.xlane.f32.xlu1 %v6386_v46 }
0x1e5e   : > { %6390 = vadd.xlane.f32.xlu0 %v6389_v23 }
0x1ee5   : > { %v6382_v51 = vpop.xlane.xlu1 %6381 }
0x1ee6   : > { %v6392_v52 = vmul.f32 0.03125, %v6382_v51 }
0x1ee7   : > { %v6385_v39 = vpop.xlane.xlu0 %6384 }
0x1ee8   : > { %v6396_v62 = vsub.f32 %v6374_v29, %v6392_v52  ;;  %v6393_v60 = vmul.f32 0.03125, %v6385_v39 }
0x1ee9   : > { %v6388_v56 = vpop.xlane.xlu1 %6387 }
0x1eea   : > { %v6397_v55 = vsub.f32 %v6375_v3, %v6393_v60  ;;  %v6394_v14 = vmul.f32 0.03125, %v6388_v56  ;;  %v6400_v12 = vmul.f32 %v6396_v62, %v6396_v62 }
0x1eeb   : > { %v6391_v15 = vpop.xlane.xlu0 %6390 }
0x1eec   : > { %v6398_v11 = vsub.f32 %v6376_v0, %v6394_v14  ;;  %v6395_v49 = vmul.f32 0.03125, %v6391_v15  ;;  %v6404_v4 = vsel %vm995_vm1, %v6400_v12, 0.0  ;;  %v6401_v48 = vmul.f32 %v6397_v55, %v6397_v55  ;;  %v7050_v14 = vld [vmem:[%s9762_s18] ss:$0 sm:$0xff] (!%p7049_p6) }
0x1eed   : > { %6405 = vadd.xlane.f32.xlu1 %v6404_v4 }
0x1eee   : > { %v6399_v50 = vsub.f32 %v6377_v6, %v6395_v49  ;;  %v6407_v17 = vsel %vm995_vm1, %v6401_v48, 0.0  ;;  %v6402_v45 = vmul.f32 %v6398_v11, %v6398_v11  ;;  %v7051_v49 = vld [vmem:[%s9763_s6] ss:$0 sm:$0xff] (!%p7049_p6) }
0x1eef   : > { %6408 = vadd.xlane.f32.xlu0 %v6407_v17 }
0x1ef0   : > { %v6410_v63 = vsel %vm995_vm1, %v6402_v45, 0.0  ;;  %v6403_v1 = vmul.f32 %v6399_v50, %v6399_v50 }
0x1ef1   : > { %6411 = vadd.xlane.f32.xlu1 %v6410_v63 }
0x1ef2   : > { %v6413_v2 = vsel %vm995_vm1, %v6403_v1, 0.0 }
0x1ef3   : > { %6414 = vadd.xlane.f32.xlu0 %v6413_v2 }
0x1f7a   : > { %v6406_v8 = vpop.xlane.xlu1 %6405 }
0x1f7b   : > { %v6416_v53 = vmul.f32 0.03125, %v6406_v8 }
0x1f7c   : > { %v6409_v10 = vpop.xlane.xlu0 %6408 }
0x1f7d   : > { %v6420_v59 = vadd.f32 1e-05, %v6416_v53  ;;  %v6417_v30 = vmul.f32 0.03125, %v6409_v10 }
0x1f7e   : > { %v6412_v35 = vpop.xlane.xlu1 %6411 }
0x1f7f   : > { %8190 = vrsqrt.f32 %v6420_v59  ;;  %v6421_v20 = vadd.f32 1e-05, %v6417_v30  ;;  %v6418_v28 = vmul.f32 0.03125, %v6412_v35 }
0x1f80   : > { %v6415_v54 = vpop.xlane.xlu0 %6414 }
0x1f81   : > { %8192 = vrsqrt.f32 %v6421_v20  ;;  %v6422_v42 = vadd.f32 1e-05, %v6418_v28  ;;  %v6419_v9 = vmul.f32 0.03125, %v6415_v54 }
0x1f83   : > { %8194 = vrsqrt.f32 %v6422_v42  ;;  %v6423_v58 = vadd.f32 1e-05, %v6419_v9 }
0x1f85   : > { %8196 = vrsqrt.f32 %v6423_v58 }
0x1f89   : > { %v8191_v16 = vpop.eup %8190 }
0x1f8a   : > { %v6428_v57 = vmul.f32 %v8191_v16, %v6396_v62 }
0x1f8b   : > { %v8193_v43 = vpop.eup %8192 }
0x1f8c   : > { %v6438_v24 = vmul.f32 %v7047_v13, %v6428_v57  ;;  %v6429_v36 = vmul.f32 %v8193_v43, %v6397_v55 }
0x1f8d   : > { %v8195_v37 = vpop.eup %8194 }
0x1f8e   : > { %v6448_v38 = vadd.f32 %v7048_v47, %v6438_v24  ;;  %v6439_v40 = vmul.f32 %v7047_v13, %v6429_v36  ;;  %v6430_v41 = vmul.f32 %v8195_v37, %v6398_v11 }
0x1f8f   : > { %v8197_v44 = vpop.eup %8196 }
0x1f90   : > { %6452 = vst.msk [vmem:[#allocation2] sm:$0xff] %vm995_vm1, %v6448_v38  ;;  %v6449_v27 = vadd.f32 %v7048_v47, %v6439_v40  ;;  %v6440_v31 = vmul.f32 %v7047_v13, %v6430_v41  ;;  %v6431_v32 = vmul.f32 %v8197_v44, %v6399_v50  ;;  %6459 = sbr.rel (%p7049_p6) target bundleno = 8419 (0x20e3), region = 120 }
0x1f92   : > { %6453 = vst.msk [vmem:[#allocation2 + $0x8] sm:$0xff] %vm995_vm1, %v6449_v27  ;;  %v6450_v22 = vadd.f32 %v7048_v47, %v6440_v31  ;;  %v6441_v33 = vmul.f32 %v7047_v13, %v6431_v32 }
0x1f94   : > { %6454 = vst.msk [vmem:[#allocation2 + $0x10] sm:$0xff] %vm995_vm1, %v6450_v22  ;;  %v6451_v34 = vadd.f32 %v7048_v47, %v6441_v33 }
0x1f96   : > { %6455 = vst.msk [vmem:[#allocation2 + $0x18] sm:$0xff] %vm995_vm1, %v6451_v34 }
0x1f97   : > { %v6460_v18 = vld [vmem:[#allocation2] sm:$0x1] }
0x1f9b   : > { %v6461_v19 = vld [vmem:[#allocation2 + $0x10] sm:$0x1] }
0x1f9c   : > { %v6466_v25 = vrot.slane %v6461_v19, 7 }
0x1f9e   : > { %v6468_v26 = vsel %vm6467_vm14, %v6466_v25, %v6460_v18 }
0x1f9f   : > { %v6471_v29 = vsel %vm6470_vm15, %v6468_v26, 0.0 }
0x1fa0   : > { %6472 = vadd.xlane.f32.xlu0 %v6471_v29 }
0x202d   : > { %v6473_v21 = vpop.xlane.xlu0 %6472 }
0x202e   : > { %v6474_v61 = vmul.f32 0.03125, %v6473_v21 }
0x2030   : > { %v6476_v0 = vrot.slane %v6474_v61, 1  ;;  %v6479_v3 = vsub.f32 %v6460_v18, %v6474_v61 }
0x2032   : > { %v6480_v5 = vsub.f32 %v6461_v19, %v6476_v0  ;;  %v6481_v7 = vmul.f32 %v6479_v3, %v6479_v3 }
0x2034   : > { %v6482_v6 = vmul.f32 %v6480_v5, %v6480_v5 }
0x2036   : > { %v6485_v46 = vrot.slane %v6482_v6, 7 }
0x2038   : > { %v6486_v23 = vsel %vm6467_vm14, %v6485_v46, %v6481_v7 }
0x2039   : > { %v6488_v51 = vsel %vm6470_vm15, %v6486_v23, 0.0 }
0x203a   : > { %6489 = vadd.xlane.f32.xlu0 %v6488_v51 }
0x20c7   : > { %v6490_v52 = vpop.xlane.xlu0 %6489 }
0x20c8   : > { %v6491_v39 = vmul.f32 0.03125, %v6490_v52 }
0x20ca   : > { %v6492_v62 = vadd.f32 1e-05, %v6491_v39 }
0x20cc   : > { %8202 = vrsqrt.f32 %v6492_v62 }
0x20d6   : > { %v8203_v60 = vpop.eup %8202 }
0x20d7   : > { %v6495_v56 = vrot.slane %v8203_v60, 1  ;;  %v6498_v55 = vmul.f32 %v8203_v60, %v6479_v3 }
0x20d9   : > { %v6499_v12 = vmul.f32 %v6495_v56, %v6480_v5  ;;  %v6506_v15 = vmul.f32 %v7050_v14, %v6498_v55 }
0x20db   : > { %v6507_v11 = vmul.f32 %v7050_v14, %v6499_v12  ;;  %v6514_v48 = vadd.f32 %v7051_v49, %v6506_v15 }
0x20dd   : > { %v6515_v4 = vadd.f32 %v7051_v49, %v6507_v11 }
0x20df   : > { %v6518_v50 = vrot.slane %v6515_v4, 7 }
0x20e1   : > { %v6519_v17 = vsel %vm6467_vm14, %v6518_v50, %v6514_v48 }
0x20e2   : > { %6521 = vst.msk [vmem:[#allocation12] sm:$0x3] %vm6470_vm15, %v6519_v17 }
0x20e3 PF: > { %s9764_s30 = sld [smem:[#allocation21_spill]]  ;;  %s8435_s8 = smov [#allocation12]  }
0x20e4   : > { %s6531_s27 = sshll.u32 %s8435_s8, 4  ;;  %s6532_s27 = int_to_ptr.vmem [resolvable:$true] %s6531_s27 }
0x20e5   : > { %s8324_s26 = scalar_lea.vmem %s6532_s27, 32  ;;  %p8331_p1 = scmp.lt.s32.totalorder %s6532_s27, %s6532_s27 }
0x20e6   : > { %p8325_p0 = scmp.ne.s32.totalorder %s6532_s27, %s8324_s26  ;;  %p8332_p11 = scmp.lt.s32.totalorder %s8324_s26, %s8324_s26 }
0x20e8   : > { %p8333_p2 = por %p8332_p11, %p8331_p1 }
0x20e9   : > { %p7930_p8 = scmp.eq.s32.totalorder %s9764_s30, 1 }
0x20eb   : > { %p8326_p5 = pnand %p8325_p0, %p7930_p8 }
0x20ed   : > { %p8327_p13 = pneg %p8326_p5 }
0x20ef   : > { %p8334_p3 = pnand %p8333_p2, %p8327_p13 }
0x20f1   : > { %8337 = shalt.err (!%p8334_p3)
}
0x20f2   : > { %s9765_s3 = sld [smem:[#allocation42_spill]] }
0x20f8   : > { %s8338_s14 = scalar_lea.hbm %s9765_s3, 32 }
0x20f9   : > { %p8339_p10 = scmp.ne.s32.totalorder %s9765_s3, %s8338_s14  ;;  %p8344_p12 = scmp.lt.u32.totalorder %s8338_s14, %s9765_s3 }
0x20fb   : > { %p8340_p7 = pnand %p8339_p10, %p7930_p8 }
0x20fd   : > { %p8341_p9 = pneg %p8340_p7 }
0x20ff   : > { %p8346_p4 = pnand %p8344_p12, %p8341_p9 }
0x2101   : > { %8349 = shalt.err (!%p8346_p4)
}
0x2102   : > { %7913 = dma.vmem_to_hbm [thread:$0]  (%p7930_p8), %s6532_s27, 32, %s9765_s3, [#allocation6]  }
0x2103   : > { %8387 = dma.done.wait (%p7930_p8), [#allocation6], 32  }
0x2104   : > { %8389 = vsyncadd (%p7930_p8), [#allocation6], 4294967264 }
0x2105 PF: > { %s9766_s9 = sld [smem:[#allocation20_spill]]  ;;  %s9767_s0 = sld [smem:[#allocation17_spill]] }
0x2106   : > { %s9768_s30 = sld [smem:[#allocation18_spill]]  ;;  %s9769_s20 = sld [smem:[#allocation23_spill]] }
0x2107   : > { %s9770_s21 = sld [smem:[#allocation19_spill]]  ;;  %s9771_s1 = sld [smem:[#allocation22_spill]] }
0x210b   : > { %s39_s22 = sadd.s32 1, %s9766_s9  }
0x210c   : > { %p36_p6 = scmp.ge.s32.totalorder %s39_s22, 4  }
0x210e   :  { %38 = sbr.rel (!%p36_p6) target bundleno = 28 (0x1c), region = 218 }
0x2115   :  { %6544 = vsyncpa [#allocation5], 1 }
0x2116   :  { %6546 = vsyncpa [#allocation5 + $0x1], 1 }
0x2117   :  { %6547 = vsyncpa [#allocation8], 1 }
0x2118   :  { %6549 = vsyncpa [#allocation8 + $0x1], 1 }
0x2119   :  { %6550 = vsyncpa [#allocation11], 1 }
0x211a   :  { %6552 = vsyncpa [#allocation11 + $0x1], 1 }
0x211b   :  { %6553 = vsyncpa [#allocation6], 1 }
0x211c   :  { %6555 = vsyncpa [#allocation6 + $0x1], 1 }

</bundles_post_ra>
